<compile_context>
chip_gen: v6e
topology: v6e:2x2x1
jax: 0.10.0
libtpu: 0.0.40
codegen_flags: <defaults>
</compile_context>

<pallas_src>
import functools

import jax
import jax.numpy as jnp
from jax.experimental import pallas as pl
from jax.experimental.pallas import tpu as pltpu


LANE = 128                      # pad K / Cout to multiples of the lane width
SUBLANE = 8
TILE_M_TARGET = 512             # ~85% of HBM roofline per tile-size sweep
VMEM_LIMIT_BYTES = 32 * 1024 * 1024   # headroom under v7x's 64 MiB physical VMEM
BN_EPS = 1e-5


def _round_up(x, m):
    return (x + m - 1) // m * m


def _tile_m(m, target=TILE_M_TARGET):
    """Largest sublane-aligned tile <= target that divides M."""
    if m <= target:
        return m
    t = target
    while t >= SUBLANE:
        if m % t == 0:
            return t
        t //= 2
    return m  # fall back to one whole-M block


def _leaky(y):
    return jnp.where(y >= 0.0, y, 0.2 * y)


# ---------------------------------------------------------------------------
# Pallas kernels
# ---------------------------------------------------------------------------
def conv_leaky_kernel(p_ref, w_ref, o_ref):
    """One M-tile: bf16 matmul (f32 accumulation) + LeakyReLU(0.2)."""
    y = jnp.dot(p_ref[...], w_ref[...], preferred_element_type=jnp.float32)
    o_ref[...] = _leaky(y).astype(o_ref.dtype)


def conv_stats_kernel(p_ref, w_ref, y_ref, s1_ref, s2_ref):
    """BN pass A: matmul; store pre-BN activations (f32); accumulate
    per-channel sum and sum-of-squares across the M-tile grid axis."""
    y = jnp.dot(p_ref[...], w_ref[...], preferred_element_type=jnp.float32)
    y_ref[...] = y
    rs = jnp.sum(y, axis=0, keepdims=True)
    rq = jnp.sum(y * y, axis=0, keepdims=True)

    @pl.when(pl.program_id(0) == 0)
    def _():
        s1_ref[...] = rs
        s2_ref[...] = rq

    @pl.when(pl.program_id(0) != 0)
    def _():
        s1_ref[...] += rs
        s2_ref[...] += rq


def bn_leaky_kernel(y_ref, s1_ref, s2_ref, g_ref, b_ref, o_ref, *, inv_m, eps):
    """BN pass B: normalize with batch stats (one-sweep variance), affine,
    LeakyReLU(0.2). Fully parallel over M tiles."""
    mean = s1_ref[...] * inv_m
    var = s2_ref[...] * inv_m - mean * mean
    scale = g_ref[...] * jax.lax.rsqrt(var + eps)
    shift = b_ref[...] - mean * scale
    o_ref[...] = _leaky(y_ref[...] * scale + shift).astype(o_ref.dtype)


# ---------------------------------------------------------------------------
# JAX glue: NHWC im2col + operand preparation
# ---------------------------------------------------------------------------
def _im2col_nhwc(x, ksize, stride, pad):
    """x: (N, H, W, C) -> (N*Ho*Wo, ksize*ksize*C), flattened (kh, kw, c)."""
    n, h, w, c = x.shape
    xp = jnp.pad(x, ((0, 0), (pad, pad), (pad, pad), (0, 0)))
    ho = (h + 2 * pad - ksize) // stride + 1
    wo = (w + 2 * pad - ksize) // stride + 1
    cols = []
    for kh in range(ksize):
        for kw in range(ksize):
            cols.append(xp[:, kh:kh + stride * ho:stride,
                            kw:kw + stride * wo:stride, :])
    p = jnp.stack(cols, axis=3)                      # (N, Ho, Wo, kh*kw, C)
    return p.reshape(n * ho * wo, ksize * ksize * c), ho, wo


def _prep_matmul_operands(x_nhwc, w, stride, pad):
    """im2col + weight flattening; K and Cout zero-padded to multiples of 128
    (lane-dense MXU tiles / stores); cast to bf16 for the MXU."""
    cout, cin, k, _ = w.shape
    patches, ho, wo = _im2col_nhwc(x_nhwc, k, stride, pad)
    m, kk = patches.shape
    kp = _round_up(kk, LANE)
    cp = _round_up(cout, LANE)
    p_bf = jnp.pad(patches, ((0, 0), (0, kp - kk))).astype(jnp.bfloat16)
    wm = w.transpose(2, 3, 1, 0).reshape(kk, cout)   # (kh, kw, cin) row order
    wm = jnp.pad(wm, ((0, kp - kk), (0, cp - cout))).astype(jnp.bfloat16)
    return p_bf, wm, m, kp, cp, ho, wo


# ---------------------------------------------------------------------------
# Layer wrappers
# ---------------------------------------------------------------------------
def conv_leaky_layer(x_nhwc, w, stride, pad):
    """Conv(bias=False) + LeakyReLU(0.2). NHWC in/out, bf16 out."""
    n = x_nhwc.shape[0]
    cout = w.shape[0]
    p_bf, wm, m, kp, cp, ho, wo = _prep_matmul_operands(x_nhwc, w, stride, pad)
    tm = _tile_m(m)

    out = pl.pallas_call(
        conv_leaky_kernel,
        out_shape=jax.ShapeDtypeStruct((m, cp), jnp.bfloat16),
        grid=(m // tm,),
        in_specs=[pl.BlockSpec((tm, kp), lambda i: (i, 0)),
                  pl.BlockSpec((kp, cp), lambda i: (0, 0))],
        out_specs=pl.BlockSpec((tm, cp), lambda i: (i, 0)),
        compiler_params=pltpu.CompilerParams(
            dimension_semantics=("parallel",),
            vmem_limit_bytes=VMEM_LIMIT_BYTES),
    )(p_bf, wm)

    return out[:, :cout].reshape(n, ho, wo, cout)


def conv_bn_leaky_layer(x_nhwc, w, gamma, beta, stride, pad):
    """Conv(bias=False) + BatchNorm2d (training-mode batch stats) +
    LeakyReLU(0.2). NHWC in/out, bf16 out. Two-pass so M-tiling is exact."""
    n = x_nhwc.shape[0]
    cout = w.shape[0]
    p_bf, wm, m, kp, cp, ho, wo = _prep_matmul_operands(x_nhwc, w, stride, pad)
    g = jnp.pad(gamma.astype(jnp.float32), (0, cp - cout),
                constant_values=1.0).reshape(1, cp)
    b = jnp.pad(beta.astype(jnp.float32), (0, cp - cout)).reshape(1, cp)
    tm = _tile_m(m)
    n_tiles = m // tm

    # Pass A: tiled matmul; sum / sum-of-squares accumulated in resident
    # output blocks (constant index map) -> "arbitrary" grid axis.
    y, s1, s2 = pl.pallas_call(
        conv_stats_kernel,
        out_shape=(jax.ShapeDtypeStruct((m, cp), jnp.float32),
                   jax.ShapeDtypeStruct((1, cp), jnp.float32),
                   jax.ShapeDtypeStruct((1, cp), jnp.float32)),
        grid=(n_tiles,),
        in_specs=[pl.BlockSpec((tm, kp), lambda i: (i, 0)),
                  pl.BlockSpec((kp, cp), lambda i: (0, 0))],
        out_specs=(pl.BlockSpec((tm, cp), lambda i: (i, 0)),
                   pl.BlockSpec((1, cp), lambda i: (0, 0)),
                   pl.BlockSpec((1, cp), lambda i: (0, 0))),
        compiler_params=pltpu.CompilerParams(
            dimension_semantics=("arbitrary",),
            vmem_limit_bytes=VMEM_LIMIT_BYTES),
    )(p_bf, wm)

    # Pass B: normalize + affine + activation; independent per M tile.
    out = pl.pallas_call(
        functools.partial(bn_leaky_kernel, inv_m=1.0 / m, eps=BN_EPS),
        out_shape=jax.ShapeDtypeStruct((m, cp), jnp.bfloat16),
        grid=(n_tiles,),
        in_specs=[pl.BlockSpec((tm, cp), lambda i: (i, 0)),
                  pl.BlockSpec((1, cp), lambda i: (0, 0)),
                  pl.BlockSpec((1, cp), lambda i: (0, 0)),
                  pl.BlockSpec((1, cp), lambda i: (0, 0)),
                  pl.BlockSpec((1, cp), lambda i: (0, 0))],
        out_specs=pl.BlockSpec((tm, cp), lambda i: (i, 0)),
        compiler_params=pltpu.CompilerParams(
            dimension_semantics=("parallel",),
            vmem_limit_bytes=VMEM_LIMIT_BYTES),
    )(y, s1, s2, g, b)

    return out[:, :cout].reshape(n, ho, wo, cout)


# ---------------------------------------------------------------------------
# Discriminator: parameters + forward
# ---------------------------------------------------------------------------
def init_params(key, in_channels, feature_map):
    fm = feature_map
    shapes = [
        (fm, in_channels, 4, 4),
        (2 * fm, fm, 4, 4),
        (4 * fm, 2 * fm, 4, 4),
        (8 * fm, 4 * fm, 4, 4),
        (1, 8 * fm, 4, 4),
    ]
    keys = jax.random.split(key, len(shapes))
    ws = [0.02 * jax.random.normal(k, s, dtype=jnp.float32)
          for k, s in zip(keys, shapes)]
    # BatchNorm affine params at PyTorch init: gamma=1, beta=0.
    bns = [(jnp.ones((c,), jnp.float32), jnp.zeros((c,), jnp.float32))
           for c in (2 * fm, 4 * fm, 8 * fm)]
    return ws, bns


@jax.jit
def discriminator_forward(x_nchw, ws, bns):
    """(N, C, 64, 64) NCHW -> (N, 1, 1, 1), matching the PyTorch module
    (BatchNorm in default training mode, i.e. batch statistics)."""
    w1, w2, w3, w4, w5 = ws
    (g2, b2), (g3, b3), (g4, b4) = bns

    x = jnp.transpose(x_nchw, (0, 2, 3, 1))        # single NCHW -> NHWC hop
    x = conv_leaky_layer(x, w1, stride=2, pad=1)
    x = conv_bn_leaky_layer(x, w2, g2, b2, stride=2, pad=1)
    x = conv_bn_leaky_layer(x, w3, g3, b3, stride=2, pad=1)
    x = conv_bn_leaky_layer(x, w4, g4, b4, stride=2, pad=1)

    # Final 4x4 valid conv (per-image dot of 4*4*8fm features with 1 filter)
    # + sigmoid in plain JAX: a dedicated pallas_call for an (N x 2048 x 1)
    # matmul is pure launch/DMA overhead (perf-review recommendation).
    n = x.shape[0]
    feat = x.reshape(n, -1).astype(jnp.float32)                  # (h, w, c) order
    w5m = w5.transpose(2, 3, 1, 0).reshape(-1, 1).astype(jnp.float32)
    return jax.nn.sigmoid(feat @ w5m).reshape(n, 1, 1, 1)


# ---------------------------------------------------------------------------
# Pure-JAX f32 reference (for a loose numerical sanity check)
# ---------------------------------------------------------------------------
def reference_forward(x, ws, bns, eps=BN_EPS):
    def conv(x, w, stride, pad):
        return jax.lax.conv_general_dilated(
            x, w, (stride, stride), ((pad, pad), (pad, pad)),
            dimension_numbers=("NCHW", "OIHW", "NCHW"))

    def bn(x, g, b):
        mean = jnp.mean(x, axis=(0, 2, 3), keepdims=True)
        var = jnp.mean(jnp.square(x - mean), axis=(0, 2, 3), keepdims=True)
        xn = (x - mean) * jax.lax.rsqrt(var + eps)
        return xn * g.reshape(1, -1, 1, 1) + b.reshape(1, -1, 1, 1)

    w1, w2, w3, w4, w5 = ws
    (g2, b2), (g3, b3), (g4, b4) = bns
    x = _leaky(conv(x, w1, 2, 1))
    x = _leaky(bn(conv(x, w2, 2, 1), g2, b2))
    x = _leaky(bn(conv(x, w3, 2, 1), g3, b3))
    x = _leaky(bn(conv(x, w4, 2, 1), g4, b4))
    return jax.nn.sigmoid(conv(x, w5, 1, 0))


if __name__ == "__main__":
    # DCGAN discriminator expects a 64x64 input (4 stride-2 convs + a 4x4
    # valid conv -> 1x1 output). Small batch / feature_map for the demo.
    batch, in_channels, feature_map, spatial = 2, 3, 16, 64

    key = jax.random.PRNGKey(0)
    k_x, k_p = jax.random.split(key)
    x = jax.random.normal(k_x, (batch, in_channels, spatial, spatial),
                          dtype=jnp.float32)
    ws, bns = init_params(k_p, in_channels, feature_map)

    out = jax.block_until_ready(discriminator_forward(x, ws, bns))
    ref = jax.block_until_ready(reference_forward(x, ws, bns))

    assert out.shape == (batch, 1, 1, 1), out.shape
    assert bool(jnp.all(jnp.isfinite(out))), "non-finite output"
    assert bool(jnp.all((out > 0.0) & (out < 1.0))), "sigmoid range violated"
    err = float(jnp.max(jnp.abs(out - ref)))
    assert err < 5e-2, f"mismatch vs f32 reference: {err}"
    print("KERNEL_OK")
</pallas_src>

<mosaic_0001>
module attributes {stable_mosaic.version = 11 : i64} {
  func.func @conv_leaky_kernel(%arg0: i32, %arg1: memref<512x128xbf16, #tpu.memory_space<vmem>>, %arg2: memref<128x128xbf16, #tpu.memory_space<vmem>>, %arg3: memref<512x128xbf16, #tpu.memory_space<vmem>>) attributes {dimension_semantics = [#tpu.dimension_semantics<parallel>], iteration_bounds = array<i64: 4>, scalar_prefetch = 0 : i64, scratch_operands = 0 : i64, tpu.core_type = #tpu.core_type<tc>, window_params = [{transform_indices = @transform_0, window_bounds = array<i64: 512, 128>}, {pipeline_mode = #tpu.pipeline_mode<synchronous>, transform_indices = @transform_1, window_bounds = array<i64: 128, 128>}, {transform_indices = @transform_2, window_bounds = array<i64: 512, 128>}]} {
    %c0 = arith.constant 0 : index
    %c0_0 = arith.constant 0 : index
    %0 = vector.load %arg1[%c0, %c0_0] : memref<512x128xbf16, #tpu.memory_space<vmem>>, vector<512x128xbf16>
    %c0_1 = arith.constant 0 : index
    %c0_2 = arith.constant 0 : index
    %1 = vector.load %arg2[%c0_1, %c0_2] : memref<128x128xbf16, #tpu.memory_space<vmem>>, vector<128x128xbf16>
    %cst = arith.constant dense<0.000000e+00> : vector<512x128xf32>
    %2 = tpu.matmul %0, %1, %cst {dimension_numbers = #tpu.dot_dimension_numbers<[1], [0], [0], [1], [0, 0, 1, 1], [], []>} : vector<512x128xbf16>, vector<128x128xbf16>, vector<512x128xf32> -> vector<512x128xf32>
    %cst_3 = arith.constant 0.000000e+00 : f32
    %3 = vector.broadcast %cst_3 : f32 to vector<512x128xf32>
    %4 = arith.cmpf oge, %2, %3 : vector<512x128xf32>
    %cst_4 = arith.constant 2.000000e-01 : f32
    %5 = vector.broadcast %cst_4 : f32 to vector<512x128xf32>
    %6 = arith.mulf %5, %2 : vector<512x128xf32>
    %7 = arith.select %4, %2, %6 : vector<512x128xi1>, vector<512x128xf32>
    %8 = arith.truncf %7 : vector<512x128xf32> to vector<512x128xbf16>
    %c0_5 = arith.constant 0 : index
    %c0_6 = arith.constant 0 : index
    %9 = vector.load %arg3[%c0_5, %c0_6] : memref<512x128xbf16, #tpu.memory_space<vmem>>, vector<512x128xbf16>
    tpu.vector_store %arg3[%c0_5, %c0_6], %8 {strides = array<i32>} : memref<512x128xbf16, #tpu.memory_space<vmem>>, vector<512x128xbf16>,
    return
  }
  func.func @transform_0(%arg0: i32) -> (i32, i32) {
    %c0_i32 = arith.constant 0 : i32
    %c0_i32_0 = arith.constant 0 : i32
    return %arg0, %c0_i32 : i32, i32
  }
  func.func @transform_1(%arg0: i32) -> (i32, i32) {
    %c0_i32 = arith.constant 0 : i32
    %c0_i32_0 = arith.constant 0 : i32
    %c0_i32_1 = arith.constant 0 : i32
    return %c0_i32, %c0_i32_0 : i32, i32
  }
  func.func @transform_2(%arg0: i32) -> (i32, i32) {
    %c0_i32 = arith.constant 0 : i32
    %c0_i32_0 = arith.constant 0 : i32
    return %arg0, %c0_i32 : i32, i32
  }
}

module attributes {stable_mosaic.version = 11 : i64} {
  func.func @conv_stats_kernel(%arg0: i32, %arg1: memref<512x256xbf16, #tpu.memory_space<vmem>>, %arg2: memref<256x128xbf16, #tpu.memory_space<vmem>>, %arg3: memref<512x128xf32, #tpu.memory_space<vmem>>, %arg4: memref<1x128xf32, #tpu.memory_space<vmem>>, %arg5: memref<1x128xf32, #tpu.memory_space<vmem>>) attributes {dimension_semantics = [#tpu.dimension_semantics<arbitrary>], iteration_bounds = array<i64: 1>, scalar_prefetch = 0 : i64, scratch_operands = 0 : i64, tpu.core_type = #tpu.core_type<tc>, window_params = [{transform_indices = @transform_0, window_bounds = array<i64: 512, 256>}, {pipeline_mode = #tpu.pipeline_mode<synchronous>, transform_indices = @transform_1, window_bounds = array<i64: 256, 128>}, {transform_indices = @transform_2, window_bounds = array<i64: 512, 128>}, {pipeline_mode = #tpu.pipeline_mode<synchronous>, transform_indices = @transform_3, window_bounds = array<i64: 1, 128>}, {pipeline_mode = #tpu.pipeline_mode<synchronous>, transform_indices = @transform_4, window_bounds = array<i64: 1, 128>}]} {
    %c0 = arith.constant 0 : index
    %c0_0 = arith.constant 0 : index
    %0 = vector.load %arg1[%c0, %c0_0] : memref<512x256xbf16, #tpu.memory_space<vmem>>, vector<512x256xbf16>
    %c0_1 = arith.constant 0 : index
    %c0_2 = arith.constant 0 : index
    %1 = vector.load %arg2[%c0_1, %c0_2] : memref<256x128xbf16, #tpu.memory_space<vmem>>, vector<256x128xbf16>
    %cst = arith.constant dense<0.000000e+00> : vector<512x128xf32>
    %2 = tpu.matmul %0, %1, %cst {dimension_numbers = #tpu.dot_dimension_numbers<[1], [0], [0], [1], [0, 0, 1, 1], [], []>} : vector<512x256xbf16>, vector<256x128xbf16>, vector<512x128xf32> -> vector<512x128xf32>
    %c0_3 = arith.constant 0 : index
    %c0_4 = arith.constant 0 : index
    %3 = vector.load %arg3[%c0_3, %c0_4] : memref<512x128xf32, #tpu.memory_space<vmem>>, vector<512x128xf32>
    tpu.vector_store %arg3[%c0_3, %c0_4], %2 {strides = array<i32>} : memref<512x128xf32, #tpu.memory_space<vmem>>, vector<512x128xf32>,
    %cst_5 = arith.constant dense<0.000000e+00> : vector<128xf32>
    %4 = vector.multi_reduction <add>, %2, %cst_5 [0] : vector<512x128xf32> to vector<128xf32>
    %5 = vector.shape_cast %4 : vector<128xf32> to vector<1x128xf32>
    %6 = arith.mulf %2, %2 : vector<512x128xf32>
    %cst_6 = arith.constant dense<0.000000e+00> : vector<128xf32>
    %7 = vector.multi_reduction <add>, %6, %cst_6 [0] : vector<512x128xf32> to vector<128xf32>
    %8 = vector.shape_cast %7 : vector<128xf32> to vector<1x128xf32>
    %c0_i32 = arith.constant 0 : i32
    %9 = arith.cmpi eq, %arg0, %c0_i32 : i32
    %10 = arith.extui %9 : i1 to i32
    %c0_i32_7 = arith.constant 0 : i32
    %11 = arith.cmpi ne, %10, %c0_i32_7 : i32
    scf.if %11 {
      %c0_10 = arith.constant 0 : index
      %c0_11 = arith.constant 0 : index
      %15 = vector.load %arg4[%c0_10, %c0_11] : memref<1x128xf32, #tpu.memory_space<vmem>>, vector<1x128xf32>
      tpu.vector_store %arg4[%c0_10, %c0_11], %5 {strides = array<i32>} : memref<1x128xf32, #tpu.memory_space<vmem>>, vector<1x128xf32>,
      %c0_12 = arith.constant 0 : index
      %c0_13 = arith.constant 0 : index
      %16 = vector.load %arg5[%c0_12, %c0_13] : memref<1x128xf32, #tpu.memory_space<vmem>>, vector<1x128xf32>
      tpu.vector_store %arg5[%c0_12, %c0_13], %8 {strides = array<i32>} : memref<1x128xf32, #tpu.memory_space<vmem>>, vector<1x128xf32>,
    } else {
    }
    %c0_i32_8 = arith.constant 0 : i32
    %12 = arith.cmpi ne, %arg0, %c0_i32_8 : i32
    %13 = arith.extui %12 : i1 to i32
    %c0_i32_9 = arith.constant 0 : i32
    %14 = arith.cmpi ne, %13, %c0_i32_9 : i32
    scf.if %14 {
      %c0_10 = arith.constant 0 : index
      %c0_11 = arith.constant 0 : index
      %15 = vector.load %arg4[%c0_10, %c0_11] : memref<1x128xf32, #tpu.memory_space<vmem>>, vector<1x128xf32>
      %16 = arith.addf %15, %5 : vector<1x128xf32>
      %c0_12 = arith.constant 0 : index
      %c0_13 = arith.constant 0 : index
      %17 = vector.load %arg4[%c0_12, %c0_13] : memref<1x128xf32, #tpu.memory_space<vmem>>, vector<1x128xf32>
      tpu.vector_store %arg4[%c0_12, %c0_13], %16 {strides = array<i32>} : memref<1x128xf32, #tpu.memory_space<vmem>>, vector<1x128xf32>,
      %c0_14 = arith.constant 0 : index
      %c0_15 = arith.constant 0 : index
      %18 = vector.load %arg5[%c0_14, %c0_15] : memref<1x128xf32, #tpu.memory_space<vmem>>, vector<1x128xf32>
      %19 = arith.addf %18, %8 : vector<1x128xf32>
      %c0_16 = arith.constant 0 : index
      %c0_17 = arith.constant 0 : index
      %20 = vector.load %arg5[%c0_16, %c0_17] : memref<1x128xf32, #tpu.memory_space<vmem>>, vector<1x128xf32>
      tpu.vector_store %arg5[%c0_16, %c0_17], %19 {strides = array<i32>} : memref<1x128xf32, #tpu.memory_space<vmem>>, vector<1x128xf32>,
    } else {
    }
    return
  }
  func.func @transform_0(%arg0: i32) -> (i32, i32) {
    %c0_i32 = arith.constant 0 : i32
    %c0_i32_0 = arith.constant 0 : i32
    return %arg0, %c0_i32 : i32, i32
  }
  func.func @transform_1(%arg0: i32) -> (i32, i32) {
    %c0_i32 = arith.constant 0 : i32
    %c0_i32_0 = arith.constant 0 : i32
    %c0_i32_1 = arith.constant 0 : i32
    return %c0_i32, %c0_i32_0 : i32, i32
  }
  func.func @transform_2(%arg0: i32) -> (i32, i32) {
    %c0_i32 = arith.constant 0 : i32
    %c0_i32_0 = arith.constant 0 : i32
    return %arg0, %c0_i32 : i32, i32
  }
  func.func @transform_3(%arg0: i32) -> (i32, i32) {
    %c0_i32 = arith.constant 0 : i32
    %c0_i32_0 = arith.constant 0 : i32
    %c0_i32_1 = arith.constant 0 : i32
    return %c0_i32, %c0_i32_0 : i32, i32
  }
  func.func @transform_4(%arg0: i32) -> (i32, i32) {
    %c0_i32 = arith.constant 0 : i32
    %c0_i32_0 = arith.constant 0 : i32
    %c0_i32_1 = arith.constant 0 : i32
    return %c0_i32, %c0_i32_0 : i32, i32
  }
}

module attributes {stable_mosaic.version = 11 : i64} {
  func.func @bn_leaky_kernel(%arg0: i32, %arg1: memref<512x128xf32, #tpu.memory_space<vmem>>, %arg2: memref<1x128xf32, #tpu.memory_space<vmem>>, %arg3: memref<1x128xf32, #tpu.memory_space<vmem>>, %arg4: memref<1x128xf32, #tpu.memory_space<vmem>>, %arg5: memref<1x128xf32, #tpu.memory_space<vmem>>, %arg6: memref<512x128xbf16, #tpu.memory_space<vmem>>) attributes {dimension_semantics = [#tpu.dimension_semantics<parallel>], iteration_bounds = array<i64: 1>, scalar_prefetch = 0 : i64, scratch_operands = 0 : i64, tpu.core_type = #tpu.core_type<tc>, window_params = [{transform_indices = @transform_0, window_bounds = array<i64: 512, 128>}, {pipeline_mode = #tpu.pipeline_mode<synchronous>, transform_indices = @transform_1, window_bounds = array<i64: 1, 128>}, {pipeline_mode = #tpu.pipeline_mode<synchronous>, transform_indices = @transform_2, window_bounds = array<i64: 1, 128>}, {pipeline_mode = #tpu.pipeline_mode<synchronous>, transform_indices = @transform_3, window_bounds = array<i64: 1, 128>}, {pipeline_mode = #tpu.pipeline_mode<synchronous>, transform_indices = @transform_4, window_bounds = array<i64: 1, 128>}, {transform_indices = @transform_5, window_bounds = array<i64: 512, 128>}]} {
    %c0 = arith.constant 0 : index
    %c0_0 = arith.constant 0 : index
    %0 = vector.load %arg2[%c0, %c0_0] : memref<1x128xf32, #tpu.memory_space<vmem>>, vector<1x128xf32>
    %cst = arith.constant 0.001953125 : f32
    %1 = vector.broadcast %cst : f32 to vector<1x128xf32>
    %2 = arith.mulf %0, %1 : vector<1x128xf32>
    %c0_1 = arith.constant 0 : index
    %c0_2 = arith.constant 0 : index
    %3 = vector.load %arg3[%c0_1, %c0_2] : memref<1x128xf32, #tpu.memory_space<vmem>>, vector<1x128xf32>
    %cst_3 = arith.constant 0.001953125 : f32
    %4 = vector.broadcast %cst_3 : f32 to vector<1x128xf32>
    %5 = arith.mulf %3, %4 : vector<1x128xf32>
    %6 = arith.mulf %2, %2 : vector<1x128xf32>
    %7 = arith.subf %5, %6 : vector<1x128xf32>
    %c0_4 = arith.constant 0 : index
    %c0_5 = arith.constant 0 : index
    %8 = vector.load %arg4[%c0_4, %c0_5] : memref<1x128xf32, #tpu.memory_space<vmem>>, vector<1x128xf32>
    %cst_6 = arith.constant 9.99999974E-6 : f32
    %9 = vector.broadcast %cst_6 : f32 to vector<1x128xf32>
    %10 = arith.addf %7, %9 : vector<1x128xf32>
    %11 = math.rsqrt %10 : vector<1x128xf32>
    %12 = arith.mulf %8, %11 : vector<1x128xf32>
    %c0_7 = arith.constant 0 : index
    %c0_8 = arith.constant 0 : index
    %13 = vector.load %arg5[%c0_7, %c0_8] : memref<1x128xf32, #tpu.memory_space<vmem>>, vector<1x128xf32>
    %14 = arith.mulf %2, %12 : vector<1x128xf32>
    %15 = arith.subf %13, %14 : vector<1x128xf32>
    %c0_9 = arith.constant 0 : index
    %c0_10 = arith.constant 0 : index
    %16 = vector.load %arg1[%c0_9, %c0_10] : memref<512x128xf32, #tpu.memory_space<vmem>>, vector<512x128xf32>
    %17 = vector.broadcast %12 : vector<1x128xf32> to vector<512x128xf32>
    %18 = arith.mulf %16, %17 : vector<512x128xf32>
    %19 = vector.broadcast %15 : vector<1x128xf32> to vector<512x128xf32>
    %20 = arith.addf %18, %19 : vector<512x128xf32>
    %cst_11 = arith.constant 0.000000e+00 : f32
    %21 = vector.broadcast %cst_11 : f32 to vector<512x128xf32>
    %22 = arith.cmpf oge, %20, %21 : vector<512x128xf32>
    %cst_12 = arith.constant 2.000000e-01 : f32
    %23 = vector.broadcast %cst_12 : f32 to vector<512x128xf32>
    %24 = arith.mulf %23, %20 : vector<512x128xf32>
    %25 = arith.select %22, %20, %24 : vector<512x128xi1>, vector<512x128xf32>
    %26 = arith.truncf %25 : vector<512x128xf32> to vector<512x128xbf16>
    %c0_13 = arith.constant 0 : index
    %c0_14 = arith.constant 0 : index
    %27 = vector.load %arg6[%c0_13, %c0_14] : memref<512x128xbf16, #tpu.memory_space<vmem>>, vector<512x128xbf16>
    tpu.vector_store %arg6[%c0_13, %c0_14], %26 {strides = array<i32>} : memref<512x128xbf16, #tpu.memory_space<vmem>>, vector<512x128xbf16>,
    return
  }
  func.func @transform_0(%arg0: i32) -> (i32, i32) {
    %c0_i32 = arith.constant 0 : i32
    %c0_i32_0 = arith.constant 0 : i32
    return %arg0, %c0_i32 : i32, i32
  }
  func.func @transform_1(%arg0: i32) -> (i32, i32) {
    %c0_i32 = arith.constant 0 : i32
    %c0_i32_0 = arith.constant 0 : i32
    %c0_i32_1 = arith.constant 0 : i32
    return %c0_i32, %c0_i32_0 : i32, i32
  }
  func.func @transform_2(%arg0: i32) -> (i32, i32) {
    %c0_i32 = arith.constant 0 : i32
    %c0_i32_0 = arith.constant 0 : i32
    %c0_i32_1 = arith.constant 0 : i32
    return %c0_i32, %c0_i32_0 : i32, i32
  }
  func.func @transform_3(%arg0: i32) -> (i32, i32) {
    %c0_i32 = arith.constant 0 : i32
    %c0_i32_0 = arith.constant 0 : i32
    %c0_i32_1 = arith.constant 0 : i32
    return %c0_i32, %c0_i32_0 : i32, i32
  }
  func.func @transform_4(%arg0: i32) -> (i32, i32) {
    %c0_i32 = arith.constant 0 : i32
    %c0_i32_0 = arith.constant 0 : i32
    %c0_i32_1 = arith.constant 0 : i32
    return %c0_i32, %c0_i32_0 : i32, i32
  }
  func.func @transform_5(%arg0: i32) -> (i32, i32) {
    %c0_i32 = arith.constant 0 : i32
    %c0_i32_0 = arith.constant 0 : i32
    return %arg0, %c0_i32 : i32, i32
  }
}

module attributes {stable_mosaic.version = 11 : i64} {
  func.func @conv_stats_kernel(%arg0: i32, %arg1: memref<128x512xbf16, #tpu.memory_space<vmem>>, %arg2: memref<512x128xbf16, #tpu.memory_space<vmem>>, %arg3: memref<128x128xf32, #tpu.memory_space<vmem>>, %arg4: memref<1x128xf32, #tpu.memory_space<vmem>>, %arg5: memref<1x128xf32, #tpu.memory_space<vmem>>) attributes {dimension_semantics = [#tpu.dimension_semantics<arbitrary>], iteration_bounds = array<i64: 1>, scalar_prefetch = 0 : i64, scratch_operands = 0 : i64, tpu.core_type = #tpu.core_type<tc>, window_params = [{transform_indices = @transform_0, window_bounds = array<i64: 128, 512>}, {pipeline_mode = #tpu.pipeline_mode<synchronous>, transform_indices = @transform_1, window_bounds = array<i64: 512, 128>}, {transform_indices = @transform_2, window_bounds = array<i64: 128, 128>}, {pipeline_mode = #tpu.pipeline_mode<synchronous>, transform_indices = @transform_3, window_bounds = array<i64: 1, 128>}, {pipeline_mode = #tpu.pipeline_mode<synchronous>, transform_indices = @transform_4, window_bounds = array<i64: 1, 128>}]} {
    %c0 = arith.constant 0 : index
    %c0_0 = arith.constant 0 : index
    %0 = vector.load %arg1[%c0, %c0_0] : memref<128x512xbf16, #tpu.memory_space<vmem>>, vector<128x512xbf16>
    %c0_1 = arith.constant 0 : index
    %c0_2 = arith.constant 0 : index
    %1 = vector.load %arg2[%c0_1, %c0_2] : memref<512x128xbf16, #tpu.memory_space<vmem>>, vector<512x128xbf16>
    %cst = arith.constant dense<0.000000e+00> : vector<128x128xf32>
    %2 = tpu.matmul %0, %1, %cst {dimension_numbers = #tpu.dot_dimension_numbers<[1], [0], [0], [1], [0, 0, 1, 1], [], []>} : vector<128x512xbf16>, vector<512x128xbf16>, vector<128x128xf32> -> vector<128x128xf32>
    %c0_3 = arith.constant 0 : index
    %c0_4 = arith.constant 0 : index
    %3 = vector.load %arg3[%c0_3, %c0_4] : memref<128x128xf32, #tpu.memory_space<vmem>>, vector<128x128xf32>
    tpu.vector_store %arg3[%c0_3, %c0_4], %2 {strides = array<i32>} : memref<128x128xf32, #tpu.memory_space<vmem>>, vector<128x128xf32>,
    %cst_5 = arith.constant dense<0.000000e+00> : vector<128xf32>
    %4 = vector.multi_reduction <add>, %2, %cst_5 [0] : vector<128x128xf32> to vector<128xf32>
    %5 = vector.shape_cast %4 : vector<128xf32> to vector<1x128xf32>
    %6 = arith.mulf %2, %2 : vector<128x128xf32>
    %cst_6 = arith.constant dense<0.000000e+00> : vector<128xf32>
    %7 = vector.multi_reduction <add>, %6, %cst_6 [0] : vector<128x128xf32> to vector<128xf32>
    %8 = vector.shape_cast %7 : vector<128xf32> to vector<1x128xf32>
    %c0_i32 = arith.constant 0 : i32
    %9 = arith.cmpi eq, %arg0, %c0_i32 : i32
    %10 = arith.extui %9 : i1 to i32
    %c0_i32_7 = arith.constant 0 : i32
    %11 = arith.cmpi ne, %10, %c0_i32_7 : i32
    scf.if %11 {
      %c0_10 = arith.constant 0 : index
      %c0_11 = arith.constant 0 : index
      %15 = vector.load %arg4[%c0_10, %c0_11] : memref<1x128xf32, #tpu.memory_space<vmem>>, vector<1x128xf32>
      tpu.vector_store %arg4[%c0_10, %c0_11], %5 {strides = array<i32>} : memref<1x128xf32, #tpu.memory_space<vmem>>, vector<1x128xf32>,
      %c0_12 = arith.constant 0 : index
      %c0_13 = arith.constant 0 : index
      %16 = vector.load %arg5[%c0_12, %c0_13] : memref<1x128xf32, #tpu.memory_space<vmem>>, vector<1x128xf32>
      tpu.vector_store %arg5[%c0_12, %c0_13], %8 {strides = array<i32>} : memref<1x128xf32, #tpu.memory_space<vmem>>, vector<1x128xf32>,
    } else {
    }
    %c0_i32_8 = arith.constant 0 : i32
    %12 = arith.cmpi ne, %arg0, %c0_i32_8 : i32
    %13 = arith.extui %12 : i1 to i32
    %c0_i32_9 = arith.constant 0 : i32
    %14 = arith.cmpi ne, %13, %c0_i32_9 : i32
    scf.if %14 {
      %c0_10 = arith.constant 0 : index
      %c0_11 = arith.constant 0 : index
      %15 = vector.load %arg4[%c0_10, %c0_11] : memref<1x128xf32, #tpu.memory_space<vmem>>, vector<1x128xf32>
      %16 = arith.addf %15, %5 : vector<1x128xf32>
      %c0_12 = arith.constant 0 : index
      %c0_13 = arith.constant 0 : index
      %17 = vector.load %arg4[%c0_12, %c0_13] : memref<1x128xf32, #tpu.memory_space<vmem>>, vector<1x128xf32>
      tpu.vector_store %arg4[%c0_12, %c0_13], %16 {strides = array<i32>} : memref<1x128xf32, #tpu.memory_space<vmem>>, vector<1x128xf32>,
      %c0_14 = arith.constant 0 : index
      %c0_15 = arith.constant 0 : index
      %18 = vector.load %arg5[%c0_14, %c0_15] : memref<1x128xf32, #tpu.memory_space<vmem>>, vector<1x128xf32>
      %19 = arith.addf %18, %8 : vector<1x128xf32>
      %c0_16 = arith.constant 0 : index
      %c0_17 = arith.constant 0 : index
      %20 = vector.load %arg5[%c0_16, %c0_17] : memref<1x128xf32, #tpu.memory_space<vmem>>, vector<1x128xf32>
      tpu.vector_store %arg5[%c0_16, %c0_17], %19 {strides = array<i32>} : memref<1x128xf32, #tpu.memory_space<vmem>>, vector<1x128xf32>,
    } else {
    }
    return
  }
  func.func @transform_0(%arg0: i32) -> (i32, i32) {
    %c0_i32 = arith.constant 0 : i32
    %c0_i32_0 = arith.constant 0 : i32
    return %arg0, %c0_i32 : i32, i32
  }
  func.func @transform_1(%arg0: i32) -> (i32, i32) {
    %c0_i32 = arith.constant 0 : i32
    %c0_i32_0 = arith.constant 0 : i32
    %c0_i32_1 = arith.constant 0 : i32
    return %c0_i32, %c0_i32_0 : i32, i32
  }
  func.func @transform_2(%arg0: i32) -> (i32, i32) {
    %c0_i32 = arith.constant 0 : i32
    %c0_i32_0 = arith.constant 0 : i32
    return %arg0, %c0_i32 : i32, i32
  }
  func.func @transform_3(%arg0: i32) -> (i32, i32) {
    %c0_i32 = arith.constant 0 : i32
    %c0_i32_0 = arith.constant 0 : i32
    %c0_i32_1 = arith.constant 0 : i32
    return %c0_i32, %c0_i32_0 : i32, i32
  }
  func.func @transform_4(%arg0: i32) -> (i32, i32) {
    %c0_i32 = arith.constant 0 : i32
    %c0_i32_0 = arith.constant 0 : i32
    %c0_i32_1 = arith.constant 0 : i32
    return %c0_i32, %c0_i32_0 : i32, i32
  }
}

module attributes {stable_mosaic.version = 11 : i64} {
  func.func @bn_leaky_kernel(%arg0: i32, %arg1: memref<128x128xf32, #tpu.memory_space<vmem>>, %arg2: memref<1x128xf32, #tpu.memory_space<vmem>>, %arg3: memref<1x128xf32, #tpu.memory_space<vmem>>, %arg4: memref<1x128xf32, #tpu.memory_space<vmem>>, %arg5: memref<1x128xf32, #tpu.memory_space<vmem>>, %arg6: memref<128x128xbf16, #tpu.memory_space<vmem>>) attributes {dimension_semantics = [#tpu.dimension_semantics<parallel>], iteration_bounds = array<i64: 1>, scalar_prefetch = 0 : i64, scratch_operands = 0 : i64, tpu.core_type = #tpu.core_type<tc>, window_params = [{transform_indices = @transform_0, window_bounds = array<i64: 128, 128>}, {pipeline_mode = #tpu.pipeline_mode<synchronous>, transform_indices = @transform_1, window_bounds = array<i64: 1, 128>}, {pipeline_mode = #tpu.pipeline_mode<synchronous>, transform_indices = @transform_2, window_bounds = array<i64: 1, 128>}, {pipeline_mode = #tpu.pipeline_mode<synchronous>, transform_indices = @transform_3, window_bounds = array<i64: 1, 128>}, {pipeline_mode = #tpu.pipeline_mode<synchronous>, transform_indices = @transform_4, window_bounds = array<i64: 1, 128>}, {transform_indices = @transform_5, window_bounds = array<i64: 128, 128>}]} {
    %c0 = arith.constant 0 : index
    %c0_0 = arith.constant 0 : index
    %0 = vector.load %arg2[%c0, %c0_0] : memref<1x128xf32, #tpu.memory_space<vmem>>, vector<1x128xf32>
    %cst = arith.constant 7.812500e-03 : f32
    %1 = vector.broadcast %cst : f32 to vector<1x128xf32>
    %2 = arith.mulf %0, %1 : vector<1x128xf32>
    %c0_1 = arith.constant 0 : index
    %c0_2 = arith.constant 0 : index
    %3 = vector.load %arg3[%c0_1, %c0_2] : memref<1x128xf32, #tpu.memory_space<vmem>>, vector<1x128xf32>
    %cst_3 = arith.constant 7.812500e-03 : f32
    %4 = vector.broadcast %cst_3 : f32 to vector<1x128xf32>
    %5 = arith.mulf %3, %4 : vector<1x128xf32>
    %6 = arith.mulf %2, %2 : vector<1x128xf32>
    %7 = arith.subf %5, %6 : vector<1x128xf32>
    %c0_4 = arith.constant 0 : index
    %c0_5 = arith.constant 0 : index
    %8 = vector.load %arg4[%c0_4, %c0_5] : memref<1x128xf32, #tpu.memory_space<vmem>>, vector<1x128xf32>
    %cst_6 = arith.constant 9.99999974E-6 : f32
    %9 = vector.broadcast %cst_6 : f32 to vector<1x128xf32>
    %10 = arith.addf %7, %9 : vector<1x128xf32>
    %11 = math.rsqrt %10 : vector<1x128xf32>
    %12 = arith.mulf %8, %11 : vector<1x128xf32>
    %c0_7 = arith.constant 0 : index
    %c0_8 = arith.constant 0 : index
    %13 = vector.load %arg5[%c0_7, %c0_8] : memref<1x128xf32, #tpu.memory_space<vmem>>, vector<1x128xf32>
    %14 = arith.mulf %2, %12 : vector<1x128xf32>
    %15 = arith.subf %13, %14 : vector<1x128xf32>
    %c0_9 = arith.constant 0 : index
    %c0_10 = arith.constant 0 : index
    %16 = vector.load %arg1[%c0_9, %c0_10] : memref<128x128xf32, #tpu.memory_space<vmem>>, vector<128x128xf32>
    %17 = vector.broadcast %12 : vector<1x128xf32> to vector<128x128xf32>
    %18 = arith.mulf %16, %17 : vector<128x128xf32>
    %19 = vector.broadcast %15 : vector<1x128xf32> to vector<128x128xf32>
    %20 = arith.addf %18, %19 : vector<128x128xf32>
    %cst_11 = arith.constant 0.000000e+00 : f32
    %21 = vector.broadcast %cst_11 : f32 to vector<128x128xf32>
    %22 = arith.cmpf oge, %20, %21 : vector<128x128xf32>
    %cst_12 = arith.constant 2.000000e-01 : f32
    %23 = vector.broadcast %cst_12 : f32 to vector<128x128xf32>
    %24 = arith.mulf %23, %20 : vector<128x128xf32>
    %25 = arith.select %22, %20, %24 : vector<128x128xi1>, vector<128x128xf32>
    %26 = arith.truncf %25 : vector<128x128xf32> to vector<128x128xbf16>
    %c0_13 = arith.constant 0 : index
    %c0_14 = arith.constant 0 : index
    %27 = vector.load %arg6[%c0_13, %c0_14] : memref<128x128xbf16, #tpu.memory_space<vmem>>, vector<128x128xbf16>
    tpu.vector_store %arg6[%c0_13, %c0_14], %26 {strides = array<i32>} : memref<128x128xbf16, #tpu.memory_space<vmem>>, vector<128x128xbf16>,
    return
  }
  func.func @transform_0(%arg0: i32) -> (i32, i32) {
    %c0_i32 = arith.constant 0 : i32
    %c0_i32_0 = arith.constant 0 : i32
    return %arg0, %c0_i32 : i32, i32
  }
  func.func @transform_1(%arg0: i32) -> (i32, i32) {
    %c0_i32 = arith.constant 0 : i32
    %c0_i32_0 = arith.constant 0 : i32
    %c0_i32_1 = arith.constant 0 : i32
    return %c0_i32, %c0_i32_0 : i32, i32
  }
  func.func @transform_2(%arg0: i32) -> (i32, i32) {
    %c0_i32 = arith.constant 0 : i32
    %c0_i32_0 = arith.constant 0 : i32
    %c0_i32_1 = arith.constant 0 : i32
    return %c0_i32, %c0_i32_0 : i32, i32
  }
  func.func @transform_3(%arg0: i32) -> (i32, i32) {
    %c0_i32 = arith.constant 0 : i32
    %c0_i32_0 = arith.constant 0 : i32
    %c0_i32_1 = arith.constant 0 : i32
    return %c0_i32, %c0_i32_0 : i32, i32
  }
  func.func @transform_4(%arg0: i32) -> (i32, i32) {
    %c0_i32 = arith.constant 0 : i32
    %c0_i32_0 = arith.constant 0 : i32
    %c0_i32_1 = arith.constant 0 : i32
    return %c0_i32, %c0_i32_0 : i32, i32
  }
  func.func @transform_5(%arg0: i32) -> (i32, i32) {
    %c0_i32 = arith.constant 0 : i32
    %c0_i32_0 = arith.constant 0 : i32
    return %arg0, %c0_i32 : i32, i32
  }
}

module attributes {stable_mosaic.version = 11 : i64} {
  func.func @conv_stats_kernel(%arg0: i32, %arg1: memref<32x1024xbf16, #tpu.memory_space<vmem>>, %arg2: memref<1024x128xbf16, #tpu.memory_space<vmem>>, %arg3: memref<32x128xf32, #tpu.memory_space<vmem>>, %arg4: memref<1x128xf32, #tpu.memory_space<vmem>>, %arg5: memref<1x128xf32, #tpu.memory_space<vmem>>) attributes {dimension_semantics = [#tpu.dimension_semantics<arbitrary>], iteration_bounds = array<i64: 1>, scalar_prefetch = 0 : i64, scratch_operands = 0 : i64, tpu.core_type = #tpu.core_type<tc>, window_params = [{transform_indices = @transform_0, window_bounds = array<i64: 32, 1024>}, {pipeline_mode = #tpu.pipeline_mode<synchronous>, transform_indices = @transform_1, window_bounds = array<i64: 1024, 128>}, {transform_indices = @transform_2, window_bounds = array<i64: 32, 128>}, {pipeline_mode = #tpu.pipeline_mode<synchronous>, transform_indices = @transform_3, window_bounds = array<i64: 1, 128>}, {pipeline_mode = #tpu.pipeline_mode<synchronous>, transform_indices = @transform_4, window_bounds = array<i64: 1, 128>}]} {
    %c0 = arith.constant 0 : index
    %c0_0 = arith.constant 0 : index
    %0 = vector.load %arg1[%c0, %c0_0] : memref<32x1024xbf16, #tpu.memory_space<vmem>>, vector<32x1024xbf16>
    %c0_1 = arith.constant 0 : index
    %c0_2 = arith.constant 0 : index
    %1 = vector.load %arg2[%c0_1, %c0_2] : memref<1024x128xbf16, #tpu.memory_space<vmem>>, vector<1024x128xbf16>
    %cst = arith.constant dense<0.000000e+00> : vector<32x128xf32>
    %2 = tpu.matmul %0, %1, %cst {dimension_numbers = #tpu.dot_dimension_numbers<[1], [0], [0], [1], [0, 0, 1, 1], [], []>} : vector<32x1024xbf16>, vector<1024x128xbf16>, vector<32x128xf32> -> vector<32x128xf32>
    %c0_3 = arith.constant 0 : index
    %c0_4 = arith.constant 0 : index
    %3 = vector.load %arg3[%c0_3, %c0_4] : memref<32x128xf32, #tpu.memory_space<vmem>>, vector<32x128xf32>
    tpu.vector_store %arg3[%c0_3, %c0_4], %2 {strides = array<i32>} : memref<32x128xf32, #tpu.memory_space<vmem>>, vector<32x128xf32>,
    %cst_5 = arith.constant dense<0.000000e+00> : vector<128xf32>
    %4 = vector.multi_reduction <add>, %2, %cst_5 [0] : vector<32x128xf32> to vector<128xf32>
    %5 = vector.shape_cast %4 : vector<128xf32> to vector<1x128xf32>
    %6 = arith.mulf %2, %2 : vector<32x128xf32>
    %cst_6 = arith.constant dense<0.000000e+00> : vector<128xf32>
    %7 = vector.multi_reduction <add>, %6, %cst_6 [0] : vector<32x128xf32> to vector<128xf32>
    %8 = vector.shape_cast %7 : vector<128xf32> to vector<1x128xf32>
    %c0_i32 = arith.constant 0 : i32
    %9 = arith.cmpi eq, %arg0, %c0_i32 : i32
    %10 = arith.extui %9 : i1 to i32
    %c0_i32_7 = arith.constant 0 : i32
    %11 = arith.cmpi ne, %10, %c0_i32_7 : i32
    scf.if %11 {
      %c0_10 = arith.constant 0 : index
      %c0_11 = arith.constant 0 : index
      %15 = vector.load %arg4[%c0_10, %c0_11] : memref<1x128xf32, #tpu.memory_space<vmem>>, vector<1x128xf32>
      tpu.vector_store %arg4[%c0_10, %c0_11], %5 {strides = array<i32>} : memref<1x128xf32, #tpu.memory_space<vmem>>, vector<1x128xf32>,
      %c0_12 = arith.constant 0 : index
      %c0_13 = arith.constant 0 : index
      %16 = vector.load %arg5[%c0_12, %c0_13] : memref<1x128xf32, #tpu.memory_space<vmem>>, vector<1x128xf32>
      tpu.vector_store %arg5[%c0_12, %c0_13], %8 {strides = array<i32>} : memref<1x128xf32, #tpu.memory_space<vmem>>, vector<1x128xf32>,
    } else {
    }
    %c0_i32_8 = arith.constant 0 : i32
    %12 = arith.cmpi ne, %arg0, %c0_i32_8 : i32
    %13 = arith.extui %12 : i1 to i32
    %c0_i32_9 = arith.constant 0 : i32
    %14 = arith.cmpi ne, %13, %c0_i32_9 : i32
    scf.if %14 {
      %c0_10 = arith.constant 0 : index
      %c0_11 = arith.constant 0 : index
      %15 = vector.load %arg4[%c0_10, %c0_11] : memref<1x128xf32, #tpu.memory_space<vmem>>, vector<1x128xf32>
      %16 = arith.addf %15, %5 : vector<1x128xf32>
      %c0_12 = arith.constant 0 : index
      %c0_13 = arith.constant 0 : index
      %17 = vector.load %arg4[%c0_12, %c0_13] : memref<1x128xf32, #tpu.memory_space<vmem>>, vector<1x128xf32>
      tpu.vector_store %arg4[%c0_12, %c0_13], %16 {strides = array<i32>} : memref<1x128xf32, #tpu.memory_space<vmem>>, vector<1x128xf32>,
      %c0_14 = arith.constant 0 : index
      %c0_15 = arith.constant 0 : index
      %18 = vector.load %arg5[%c0_14, %c0_15] : memref<1x128xf32, #tpu.memory_space<vmem>>, vector<1x128xf32>
      %19 = arith.addf %18, %8 : vector<1x128xf32>
      %c0_16 = arith.constant 0 : index
      %c0_17 = arith.constant 0 : index
      %20 = vector.load %arg5[%c0_16, %c0_17] : memref<1x128xf32, #tpu.memory_space<vmem>>, vector<1x128xf32>
      tpu.vector_store %arg5[%c0_16, %c0_17], %19 {strides = array<i32>} : memref<1x128xf32, #tpu.memory_space<vmem>>, vector<1x128xf32>,
    } else {
    }
    return
  }
  func.func @transform_0(%arg0: i32) -> (i32, i32) {
    %c0_i32 = arith.constant 0 : i32
    %c0_i32_0 = arith.constant 0 : i32
    return %arg0, %c0_i32 : i32, i32
  }
  func.func @transform_1(%arg0: i32) -> (i32, i32) {
    %c0_i32 = arith.constant 0 : i32
    %c0_i32_0 = arith.constant 0 : i32
    %c0_i32_1 = arith.constant 0 : i32
    return %c0_i32, %c0_i32_0 : i32, i32
  }
  func.func @transform_2(%arg0: i32) -> (i32, i32) {
    %c0_i32 = arith.constant 0 : i32
    %c0_i32_0 = arith.constant 0 : i32
    return %arg0, %c0_i32 : i32, i32
  }
  func.func @transform_3(%arg0: i32) -> (i32, i32) {
    %c0_i32 = arith.constant 0 : i32
    %c0_i32_0 = arith.constant 0 : i32
    %c0_i32_1 = arith.constant 0 : i32
    return %c0_i32, %c0_i32_0 : i32, i32
  }
  func.func @transform_4(%arg0: i32) -> (i32, i32) {
    %c0_i32 = arith.constant 0 : i32
    %c0_i32_0 = arith.constant 0 : i32
    %c0_i32_1 = arith.constant 0 : i32
    return %c0_i32, %c0_i32_0 : i32, i32
  }
}

module attributes {stable_mosaic.version = 11 : i64} {
  func.func @bn_leaky_kernel(%arg0: i32, %arg1: memref<32x128xf32, #tpu.memory_space<vmem>>, %arg2: memref<1x128xf32, #tpu.memory_space<vmem>>, %arg3: memref<1x128xf32, #tpu.memory_space<vmem>>, %arg4: memref<1x128xf32, #tpu.memory_space<vmem>>, %arg5: memref<1x128xf32, #tpu.memory_space<vmem>>, %arg6: memref<32x128xbf16, #tpu.memory_space<vmem>>) attributes {dimension_semantics = [#tpu.dimension_semantics<parallel>], iteration_bounds = array<i64: 1>, scalar_prefetch = 0 : i64, scratch_operands = 0 : i64, tpu.core_type = #tpu.core_type<tc>, window_params = [{transform_indices = @transform_0, window_bounds = array<i64: 32, 128>}, {pipeline_mode = #tpu.pipeline_mode<synchronous>, transform_indices = @transform_1, window_bounds = array<i64: 1, 128>}, {pipeline_mode = #tpu.pipeline_mode<synchronous>, transform_indices = @transform_2, window_bounds = array<i64: 1, 128>}, {pipeline_mode = #tpu.pipeline_mode<synchronous>, transform_indices = @transform_3, window_bounds = array<i64: 1, 128>}, {pipeline_mode = #tpu.pipeline_mode<synchronous>, transform_indices = @transform_4, window_bounds = array<i64: 1, 128>}, {transform_indices = @transform_5, window_bounds = array<i64: 32, 128>}]} {
    %c0 = arith.constant 0 : index
    %c0_0 = arith.constant 0 : index
    %0 = vector.load %arg2[%c0, %c0_0] : memref<1x128xf32, #tpu.memory_space<vmem>>, vector<1x128xf32>
    %cst = arith.constant 3.125000e-02 : f32
    %1 = vector.broadcast %cst : f32 to vector<1x128xf32>
    %2 = arith.mulf %0, %1 : vector<1x128xf32>
    %c0_1 = arith.constant 0 : index
    %c0_2 = arith.constant 0 : index
    %3 = vector.load %arg3[%c0_1, %c0_2] : memref<1x128xf32, #tpu.memory_space<vmem>>, vector<1x128xf32>
    %cst_3 = arith.constant 3.125000e-02 : f32
    %4 = vector.broadcast %cst_3 : f32 to vector<1x128xf32>
    %5 = arith.mulf %3, %4 : vector<1x128xf32>
    %6 = arith.mulf %2, %2 : vector<1x128xf32>
    %7 = arith.subf %5, %6 : vector<1x128xf32>
    %c0_4 = arith.constant 0 : index
    %c0_5 = arith.constant 0 : index
    %8 = vector.load %arg4[%c0_4, %c0_5] : memref<1x128xf32, #tpu.memory_space<vmem>>, vector<1x128xf32>
    %cst_6 = arith.constant 9.99999974E-6 : f32
    %9 = vector.broadcast %cst_6 : f32 to vector<1x128xf32>
    %10 = arith.addf %7, %9 : vector<1x128xf32>
    %11 = math.rsqrt %10 : vector<1x128xf32>
    %12 = arith.mulf %8, %11 : vector<1x128xf32>
    %c0_7 = arith.constant 0 : index
    %c0_8 = arith.constant 0 : index
    %13 = vector.load %arg5[%c0_7, %c0_8] : memref<1x128xf32, #tpu.memory_space<vmem>>, vector<1x128xf32>
    %14 = arith.mulf %2, %12 : vector<1x128xf32>
    %15 = arith.subf %13, %14 : vector<1x128xf32>
    %c0_9 = arith.constant 0 : index
    %c0_10 = arith.constant 0 : index
    %16 = vector.load %arg1[%c0_9, %c0_10] : memref<32x128xf32, #tpu.memory_space<vmem>>, vector<32x128xf32>
    %17 = vector.broadcast %12 : vector<1x128xf32> to vector<32x128xf32>
    %18 = arith.mulf %16, %17 : vector<32x128xf32>
    %19 = vector.broadcast %15 : vector<1x128xf32> to vector<32x128xf32>
    %20 = arith.addf %18, %19 : vector<32x128xf32>
    %cst_11 = arith.constant 0.000000e+00 : f32
    %21 = vector.broadcast %cst_11 : f32 to vector<32x128xf32>
    %22 = arith.cmpf oge, %20, %21 : vector<32x128xf32>
    %cst_12 = arith.constant 2.000000e-01 : f32
    %23 = vector.broadcast %cst_12 : f32 to vector<32x128xf32>
    %24 = arith.mulf %23, %20 : vector<32x128xf32>
    %25 = arith.select %22, %20, %24 : vector<32x128xi1>, vector<32x128xf32>
    %26 = arith.truncf %25 : vector<32x128xf32> to vector<32x128xbf16>
    %c0_13 = arith.constant 0 : index
    %c0_14 = arith.constant 0 : index
    %27 = vector.load %arg6[%c0_13, %c0_14] : memref<32x128xbf16, #tpu.memory_space<vmem>>, vector<32x128xbf16>
    tpu.vector_store %arg6[%c0_13, %c0_14], %26 {strides = array<i32>} : memref<32x128xbf16, #tpu.memory_space<vmem>>, vector<32x128xbf16>,
    return
  }
  func.func @transform_0(%arg0: i32) -> (i32, i32) {
    %c0_i32 = arith.constant 0 : i32
    %c0_i32_0 = arith.constant 0 : i32
    return %arg0, %c0_i32 : i32, i32
  }
  func.func @transform_1(%arg0: i32) -> (i32, i32) {
    %c0_i32 = arith.constant 0 : i32
    %c0_i32_0 = arith.constant 0 : i32
    %c0_i32_1 = arith.constant 0 : i32
    return %c0_i32, %c0_i32_0 : i32, i32
  }
  func.func @transform_2(%arg0: i32) -> (i32, i32) {
    %c0_i32 = arith.constant 0 : i32
    %c0_i32_0 = arith.constant 0 : i32
    %c0_i32_1 = arith.constant 0 : i32
    return %c0_i32, %c0_i32_0 : i32, i32
  }
  func.func @transform_3(%arg0: i32) -> (i32, i32) {
    %c0_i32 = arith.constant 0 : i32
    %c0_i32_0 = arith.constant 0 : i32
    %c0_i32_1 = arith.constant 0 : i32
    return %c0_i32, %c0_i32_0 : i32, i32
  }
  func.func @transform_4(%arg0: i32) -> (i32, i32) {
    %c0_i32 = arith.constant 0 : i32
    %c0_i32_0 = arith.constant 0 : i32
    %c0_i32_1 = arith.constant 0 : i32
    return %c0_i32, %c0_i32_0 : i32, i32
  }
  func.func @transform_5(%arg0: i32) -> (i32, i32) {
    %c0_i32 = arith.constant 0 : i32
    %c0_i32_0 = arith.constant 0 : i32
    return %arg0, %c0_i32 : i32, i32
  }
}

</mosaic_0001>

<bundles_post_ra>
// kernel: discriminator_forward.7
= control target key start
LH: loop header
LB: loop body
LE: loop exit
PB: predicated region body
PF: predicated region fallthrough
CT: control target
= control target key end

     0   :  { %s1902_s9 = smov 0   ;;  %s2027_s0 = inlined_call_operand.vmem [shape: bf16[2048,128], index: 0, kind: input, shape index: {}]   ;;  %s2028_s1 = inlined_call_operand.vmem [shape: bf16[128,128], index: 1, kind: input, shape index: {}]   ;;  %s2029_s2 = inlined_call_operand.vmem [shape: bf16[2048,128], index: 2, kind: output, shape index: {}]  }
   0x1 LB: > { %s1325_s10 = sadd.s32 4294967295, %s1885_s9   ;;  %p1329_p0 = scmp.ge.s32.totalorder %s1885_s9, 1  ;;  %s1885_s9 = sphi %s1902_s9, %s12_s9  }
   0x2   : > { %p113_p1 = scmp.lt.s32.totalorder %s1885_s9, 5 }
   0x4   : > { %p114_p2 = pnand %p1329_p0, %p113_p1 }
   0x5   : > { %s1330_s13 = sshll.u32 (!%p114_p2), %s1325_s10, 6 }
   0x6   : > { %117 = sbr.rel (%p114_p2) target bundleno = 306 (0x132), region = 28  ;;  %p136_p3 = scmp.lt.s32.totalorder (!%p114_p2), %s1330_s13, 255 }
   0xb   : > { %v1839_v0 = vld [vmem:[%s2028_s1 + $0x38] sm:$0xff]   ;;  %v1840_v1 = vld [vmem:[%s2028_s1 + $0x30] sm:$0xff]   ;;  %s2031_s13 = smov (!%p136_p3, %s1330_s13), 255  ;;  %v1841_v2 = vld [vmem:[%s2028_s1 + $0x28] sm:$0xff]  }
   0xc   : > { %1735 = vmatprep.subr.bf16.mxu0 %v1839_v0  ;;  %1815 = vmatprep.subr.bf16.mxu1 %v1839_v0  ;;  %s1331_s18 = sshll.u32 %s2031_s13, 2  ;;  %v1842_v3 = vld [vmem:[%s2028_s1 + $0x20] sm:$0xff]   ;;  %v1843_v6 = vld [vmem:[%s2028_s1 + $0x18] sm:$0xff]   ;;  %v1844_v7 = vld [vmem:[%s2028_s1 + $0x10] sm:$0xff]  }
   0xd   : > { %1736 = vmatpush3.bf16.msra.mxu0 %v1839_v0  ;;  %1823 = vmatpush3.bf16.msra.mxu1 %v1839_v0  ;;  %s1927_s21 = scalar_lea.vmem %s2027_s0, %s1331_s18  ;;  %v1845_v8 = vld [vmem:[%s2028_s1 + $0x8] sm:$0xff]   ;;  %v1846_v9 = vld [vmem:[%s2028_s1] sm:$0xff]   ;;  %s1981_s6 = scalar_lea.vmem %s2029_s2, %s1331_s18 }
   0xe   : > { %1737 = vmatprep.subr.bf16.mxu0 %v1840_v1  ;;  %1816 = vmatprep.subr.bf16.mxu1 %v1840_v1  ;;  %v1847_v4 = vld [vmem:[%s1927_s21] sm:$0xff]   ;;  %v1849_v10 = vld [vmem:[%s1927_s21 + $0x8] sm:$0xff]   ;;  %v1851_v12 = vld [vmem:[%s1927_s21 + $0x10] sm:$0xff]  }
   0xf   : > { %v1848_v5 = vld [vmem:[%s1927_s21 + $0x80] sm:$0xff]   ;;  %1751 = vmatprep.mubr.bf16.mxu0 %v1847_v4  ;;  %v1850_v11 = vld [vmem:[%s1927_s21 + $0x88] sm:$0xff]   ;;  %v1852_v13 = vld [vmem:[%s1927_s21 + $0x90] sm:$0xff]  }
  0x10   : > { %1783 = vmatprep.mubr.bf16.mxu1 %v1848_v5  ;;  %v1853_v14 = vld [vmem:[%s1927_s21 + $0x18] sm:$0xff]   ;;  %v1855_v16 = vld [vmem:[%s1927_s21 + $0x20] sm:$0xff]   ;;  %v1857_v18 = vld [vmem:[%s1927_s21 + $0x28] sm:$0xff]  }
  0x11   : > { %1738 = vmatpush3.bf16.msra.mxu0 %v1840_v1  ;;  %1824 = vmatpush3.bf16.msra.mxu1 %v1840_v1  ;;  %v1854_v15 = vld [vmem:[%s1927_s21 + $0x98] sm:$0xff]   ;;  %v1856_v17 = vld [vmem:[%s1927_s21 + $0xa0] sm:$0xff]   ;;  %v1858_v19 = vld [vmem:[%s1927_s21 + $0xa8] sm:$0xff]  }
  0x12   : > { %1739 = vmatprep.subr.bf16.mxu0 %v1841_v2  ;;  %1817 = vmatprep.subr.bf16.mxu1 %v1841_v2  ;;  %v1859_v20 = vld [vmem:[%s1927_s21 + $0x30] sm:$0xff]   ;;  %v1861_v22 = vld [vmem:[%s1927_s21 + $0x38] sm:$0xff]   ;;  %v1863_v24 = vld [vmem:[%s1927_s21 + $0x40] sm:$0xff]  }
  0x13   : > { %v1860_v21 = vld [vmem:[%s1927_s21 + $0xb0] sm:$0xff]   ;;  %v1862_v23 = vld [vmem:[%s1927_s21 + $0xb8] sm:$0xff]   ;;  %v1864_v25 = vld [vmem:[%s1927_s21 + $0xc0] sm:$0xff]  }
  0x14   : > { %v1865_v26 = vld [vmem:[%s1927_s21 + $0x48] sm:$0xff]   ;;  %v1867_v28 = vld [vmem:[%s1927_s21 + $0x50] sm:$0xff]   ;;  %v1869_v30 = vld [vmem:[%s1927_s21 + $0x58] sm:$0xff]  }
  0x15   : > { %1740 = vmatpush3.bf16.msra.mxu0 %v1841_v2  ;;  %1825 = vmatpush3.bf16.msra.mxu1 %v1841_v2  ;;  %v1866_v27 = vld [vmem:[%s1927_s21 + $0xc8] sm:$0xff]   ;;  %v1868_v29 = vld [vmem:[%s1927_s21 + $0xd0] sm:$0xff]   ;;  %v1870_v31 = vld [vmem:[%s1927_s21 + $0xd8] sm:$0xff]  }
  0x16   : > { %1741 = vmatprep.subr.bf16.mxu0 %v1842_v3  ;;  %1818 = vmatprep.subr.bf16.mxu1 %v1842_v3  ;;  %v1871_v32 = vld [vmem:[%s1927_s21 + $0x60] sm:$0xff]   ;;  %v1873_v34 = vld [vmem:[%s1927_s21 + $0x68] sm:$0xff]   ;;  %v1875_v36 = vld [vmem:[%s1927_s21 + $0x70] sm:$0xff]  }
  0x17   : > { %v1872_v33 = vld [vmem:[%s1927_s21 + $0xe0] sm:$0xff]   ;;  %v1874_v35 = vld [vmem:[%s1927_s21 + $0xe8] sm:$0xff]   ;;  %v1876_v37 = vld [vmem:[%s1927_s21 + $0xf0] sm:$0xff]  }
  0x18   : > { %v1877_v38 = vld [vmem:[%s1927_s21 + $0x78] sm:$0xff]  }
  0x19   : > { %1742 = vmatpush3.bf16.msra.mxu0 %v1842_v3  ;;  %1826 = vmatpush3.bf16.msra.mxu1 %v1842_v3  ;;  %v1878_v39 = vld [vmem:[%s1927_s21 + $0xf8] sm:$0xff]  }
  0x1a   : > { %1743 = vmatprep.subr.bf16.mxu0 %v1843_v6  ;;  %1819 = vmatprep.subr.bf16.mxu1 %v1843_v6 }
  0x1d   : > { %1744 = vmatpush3.bf16.msra.mxu0 %v1843_v6  ;;  %1827 = vmatpush3.bf16.msra.mxu1 %v1843_v6 }
  0x1e   : > { %1745 = vmatprep.subr.bf16.mxu0 %v1844_v7  ;;  %1820 = vmatprep.subr.bf16.mxu1 %v1844_v7 }
  0x21   : > { %1746 = vmatpush3.bf16.msra.mxu0 %v1844_v7  ;;  %1828 = vmatpush3.bf16.msra.mxu1 %v1844_v7 }
  0x22   : > { %1747 = vmatprep.subr.bf16.mxu0 %v1845_v8  ;;  %1821 = vmatprep.subr.bf16.mxu1 %v1845_v8 }
  0x25   : > { %1748 = vmatpush3.bf16.msra.mxu0 %v1845_v8  ;;  %1829 = vmatpush3.bf16.msra.mxu1 %v1845_v8 }
  0x26   : > { %1749 = vmatprep.subr.bf16.mxu0 %v1846_v9  ;;  %1822 = vmatprep.subr.bf16.mxu1 %v1846_v9 }
  0x29   : > { %1750 = vmatpush3.bf16.msra.mxu0 %v1846_v9  ;;  %1830 = vmatpush3.bf16.msra.mxu1 %v1846_v9 }
  0x2c   : > { %1752 = vmatmul.mubr.bf16.vlgmr.msra.gmra.mxu0 %v1849_v10  ;;  %1784 = vmatmul.mubr.bf16.vlgmr.msra.gmra.mxu1 %v1850_v11 }
  0x2d   : > { %1755 = vmatprep.mubr.bf16.mxu0 %v1851_v12  ;;  %1787 = vmatprep.mubr.bf16.mxu1 %v1852_v13 }
  0x34   : > { %1756 = vmatmul.mubr.bf16.gmra.mxu0 %v1853_v14  ;;  %1788 = vmatmul.mubr.bf16.gmra.mxu1 %v1854_v15 }
  0x35   : > { %1759 = vmatprep.mubr.bf16.mxu0 %v1855_v16  ;;  %1791 = vmatprep.mubr.bf16.mxu1 %v1856_v17 }
  0x3c   : > { %1760 = vmatmul.mubr.bf16.gmra.mxu0 %v1857_v18  ;;  %1792 = vmatmul.mubr.bf16.gmra.mxu1 %v1858_v19 }
  0x3d   : > { %1763 = vmatprep.mubr.bf16.mxu0 %v1859_v20  ;;  %1795 = vmatprep.mubr.bf16.mxu1 %v1860_v21 }
  0x44   : > { %1764 = vmatmul.mubr.bf16.gmra.mxu0 %v1861_v22  ;;  %1796 = vmatmul.mubr.bf16.gmra.mxu1 %v1862_v23 }
  0x45   : > { %1767 = vmatprep.mubr.bf16.mxu0 %v1863_v24  ;;  %1799 = vmatprep.mubr.bf16.mxu1 %v1864_v25 }
  0x4c   : > { %1768 = vmatmul.mubr.bf16.gmra.mxu0 %v1865_v26  ;;  %1800 = vmatmul.mubr.bf16.gmra.mxu1 %v1866_v27 }
  0x4d   : > { %1771 = vmatprep.mubr.bf16.mxu0 %v1867_v28  ;;  %1803 = vmatprep.mubr.bf16.mxu1 %v1868_v29 }
  0x54   : > { %1772 = vmatmul.mubr.bf16.gmra.mxu0 %v1869_v30  ;;  %1804 = vmatmul.mubr.bf16.gmra.mxu1 %v1870_v31 }
  0x55   : > { %1775 = vmatprep.mubr.bf16.mxu0 %v1871_v32  ;;  %1807 = vmatprep.mubr.bf16.mxu1 %v1872_v33 }
  0x5c   : > { %1776 = vmatmul.mubr.bf16.gmra.mxu0 %v1873_v34  ;;  %1808 = vmatmul.mubr.bf16.gmra.mxu1 %v1874_v35 }
  0x5d   : > { %1779 = vmatprep.mubr.bf16.mxu0 %v1875_v36  ;;  %1811 = vmatprep.mubr.bf16.mxu1 %v1876_v37 }
  0x64   : > { %1780 = vmatmul.mubr.bf16.gmra.mxu0 %v1877_v38  ;;  %1812 = vmatmul.mubr.bf16.gmra.mxu1 %v1878_v39 }
  0xec   : > { %v1753_v40 = vpop.f32.mrf.mxu0  ;;  %v1785_v41 = vpop.f32.mrf.mxu1 }
  0xed   : > { %vm759_vm0 = vcmp.ge.f32.partialorder %v1753_v40, 0.0  ;;  %v823_v42 = vmul.f32 0.2, %v1753_v40  ;;  %v855_v43 = vmul.f32 0.2, %v1785_v41  ;;  %vm791_vm1 = vcmp.ge.f32.partialorder %v1785_v41, 0.0 }
  0xee   : > { %v502_v44 = vpop.f32.mrf.mxu0  ;;  %v630_v45 = vpop.f32.mrf.mxu1 }
  0xef   : > { %v887_v46 = vsel %vm759_vm0, %v1753_v40, %v823_v42  ;;  %v821_v47 = vmul.f32 0.2, %v502_v44  ;;  %vm757_vm2 = vcmp.ge.f32.partialorder %v502_v44, 0.0  ;;  %v919_v51 = vsel %vm791_vm1, %v1785_v41, %v855_v43 }
  0xf0   : > { %v1754_v48 = vpop.f32.mrf.mxu0  ;;  %v1786_v49 = vpop.f32.mrf.mxu1  ;;  %vm789_vm5 = vcmp.ge.f32.partialorder %v630_v45, 0.0  ;;  %v853_v52 = vmul.f32 0.2, %v630_v45 }
  0xf1   : > { %vm760_vm3 = vcmp.ge.f32.partialorder %v1754_v48, 0.0  ;;  %v824_v50 = vmul.f32 0.2, %v1754_v48  ;;  %vm792_vm4 = vcmp.ge.f32.partialorder %v1786_v49, 0.0  ;;  %v856_v53 = vmul.f32 0.2, %v1786_v49 }
  0xf2   : > { %v505_v54 = vpop.f32.mrf.mxu0  ;;  %v633_v55 = vpop.f32.mrf.mxu1  ;;  %v885_v58 = vsel %vm757_vm2, %v502_v44, %v821_v47  ;;  %v917_v3 = vsel %vm789_vm5, %v630_v45, %v853_v52 }
  0xf3   : > { %v888_v56 = vsel %vm760_vm3, %v1754_v48, %v824_v50  ;;  %vm758_vm6 = vcmp.ge.f32.partialorder %v505_v54, 0.0  ;;  %v822_v57 = vmul.f32 0.2, %v505_v54  ;;  %vm790_vm7 = vcmp.ge.f32.partialorder %v633_v55, 0.0 }
  0xf4   : > { %v1512_v59 = vpack.c.bf16 %v888_v56, %v887_v46  ;;  %v920_v60 = vsel %vm792_vm4, %v1786_v49, %v856_v53  ;;  %v854_v61 = vmul.f32 0.2, %v633_v55  ;;  %v1757_v62 = vpop.f32.mrf.mxu0  ;;  %v1789_v63 = vpop.f32.mrf.mxu1 }
  0xf5   : > { %v1592_v0 = vpack.c.bf16 %v920_v60, %v919_v51  ;;  %v886_v1 = vsel %vm758_vm6, %v505_v54, %v822_v57  ;;  %vm763_vm8 = vcmp.ge.f32.partialorder %v1757_v62, 0.0  ;;  %v827_v2 = vmul.f32 0.2, %v1757_v62 }
  0xf6   : > { %1664 = vst [vmem:[%s1981_s6 + $0x8] sm:$0xff] %v1512_v59   ;;  %v1507_v4 = vpack.c.bf16 %v886_v1, %v885_v58  ;;  %v918_v5 = vsel %vm790_vm7, %v633_v55, %v854_v61  ;;  %v859_v6 = vmul.f32 0.2, %v1789_v63  ;;  %v518_v7 = vpop.f32.mrf.mxu0  ;;  %v646_v8 = vpop.f32.mrf.mxu1  ;;  %vm795_vm9 = vcmp.ge.f32.partialorder %v1789_v63, 0.0 }
  0xf7   : > { %1680 = vst [vmem:[%s1981_s6 + $0x88] sm:$0xff] %v1592_v0   ;;  %v1587_v9 = vpack.c.bf16 %v918_v5, %v917_v3  ;;  %v891_v10 = vsel %vm763_vm8, %v1757_v62, %v827_v2  ;;  %v825_v11 = vmul.f32 0.2, %v518_v7  ;;  %vm761_vm10 = vcmp.ge.f32.partialorder %v518_v7, 0.0 }
  0xf8   : > { %1508 = vst [vmem:[%s1981_s6] sm:$0xff] %v1507_v4   ;;  %v1758_v12 = vpop.f32.mrf.mxu0  ;;  %v1790_v13 = vpop.f32.mrf.mxu1  ;;  %v923_v15 = vsel %vm795_vm9, %v1789_v63, %v859_v6  ;;  %vm793_vm13 = vcmp.ge.f32.partialorder %v646_v8, 0.0  ;;  %v857_v16 = vmul.f32 0.2, %v646_v8 }
  0xf9   : > { %1679 = vst [vmem:[%s1981_s6 + $0x80] sm:$0xff] %v1587_v9   ;;  %vm764_vm11 = vcmp.ge.f32.partialorder %v1758_v12, 0.0  ;;  %v828_v14 = vmul.f32 0.2, %v1758_v12  ;;  %vm796_vm12 = vcmp.ge.f32.partialorder %v1790_v13, 0.0  ;;  %v889_v22 = vsel %vm761_vm10, %v518_v7, %v825_v11 }
  0xfa   : > { %v860_v17 = vmul.f32 0.2, %v1790_v13  ;;  %v521_v18 = vpop.f32.mrf.mxu0  ;;  %v649_v19 = vpop.f32.mrf.mxu1  ;;  %v921_v31 = vsel %vm793_vm13, %v646_v8, %v857_v16 }
  0xfb   : > { %v892_v20 = vsel %vm764_vm11, %v1758_v12, %v828_v14  ;;  %vm762_vm14 = vcmp.ge.f32.partialorder %v521_v18, 0.0  ;;  %v826_v21 = vmul.f32 0.2, %v521_v18  ;;  %vm794_vm15 = vcmp.ge.f32.partialorder %v649_v19, 0.0 }
  0xfc   : > { %v1522_v23 = vpack.c.bf16 %v892_v20, %v891_v10  ;;  %v924_v24 = vsel %vm796_vm12, %v1790_v13, %v860_v17  ;;  %v858_v25 = vmul.f32 0.2, %v649_v19  ;;  %v1761_v26 = vpop.f32.mrf.mxu0  ;;  %v1793_v27 = vpop.f32.mrf.mxu1 }
  0xfd   : > { %v1602_v28 = vpack.c.bf16 %v924_v24, %v923_v15  ;;  %v890_v29 = vsel %vm762_vm14, %v521_v18, %v826_v21  ;;  %vm767_vm0 = vcmp.ge.f32.partialorder %v1761_v26, 0.0  ;;  %v831_v30 = vmul.f32 0.2, %v1761_v26 }
  0xfe   : > { %1666 = vst [vmem:[%s1981_s6 + $0x18] sm:$0xff] %v1522_v23   ;;  %v1517_v32 = vpack.c.bf16 %v890_v29, %v889_v22  ;;  %v922_v33 = vsel %vm794_vm15, %v649_v19, %v858_v25  ;;  %v863_v34 = vmul.f32 0.2, %v1793_v27  ;;  %v534_v35 = vpop.f32.mrf.mxu0  ;;  %v662_v36 = vpop.f32.mrf.mxu1  ;;  %vm799_vm1 = vcmp.ge.f32.partialorder %v1793_v27, 0.0 }
  0xff   : > { %1682 = vst [vmem:[%s1981_s6 + $0x98] sm:$0xff] %v1602_v28   ;;  %v1597_v37 = vpack.c.bf16 %v922_v33, %v921_v31  ;;  %v895_v38 = vsel %vm767_vm0, %v1761_v26, %v831_v30  ;;  %v829_v39 = vmul.f32 0.2, %v534_v35  ;;  %vm765_vm2 = vcmp.ge.f32.partialorder %v534_v35, 0.0 }
 0x100   : > { %1665 = vst [vmem:[%s1981_s6 + $0x10] sm:$0xff] %v1517_v32   ;;  %v1762_v40 = vpop.f32.mrf.mxu0  ;;  %v1794_v41 = vpop.f32.mrf.mxu1  ;;  %v927_v43 = vsel %vm799_vm1, %v1793_v27, %v863_v34  ;;  %vm797_vm5 = vcmp.ge.f32.partialorder %v662_v36, 0.0  ;;  %v861_v44 = vmul.f32 0.2, %v662_v36 }
 0x101   : > { %1681 = vst [vmem:[%s1981_s6 + $0x90] sm:$0xff] %v1597_v37   ;;  %vm768_vm3 = vcmp.ge.f32.partialorder %v1762_v40, 0.0  ;;  %v832_v42 = vmul.f32 0.2, %v1762_v40  ;;  %vm800_vm4 = vcmp.ge.f32.partialorder %v1794_v41, 0.0  ;;  %v893_v50 = vsel %vm765_vm2, %v534_v35, %v829_v39 }
 0x102   : > { %v864_v45 = vmul.f32 0.2, %v1794_v41  ;;  %v537_v46 = vpop.f32.mrf.mxu0  ;;  %v665_v47 = vpop.f32.mrf.mxu1  ;;  %v925_v59 = vsel %vm797_vm5, %v662_v36, %v861_v44 }
 0x103   : > { %v896_v48 = vsel %vm768_vm3, %v1762_v40, %v832_v42  ;;  %vm766_vm6 = vcmp.ge.f32.partialorder %v537_v46, 0.0  ;;  %v830_v49 = vmul.f32 0.2, %v537_v46  ;;  %vm798_vm7 = vcmp.ge.f32.partialorder %v665_v47, 0.0 }
 0x104   : > { %v1532_v51 = vpack.c.bf16 %v896_v48, %v895_v38  ;;  %v928_v52 = vsel %vm800_vm4, %v1794_v41, %v864_v45  ;;  %v862_v53 = vmul.f32 0.2, %v665_v47  ;;  %v1765_v54 = vpop.f32.mrf.mxu0  ;;  %v1797_v55 = vpop.f32.mrf.mxu1 }
 0x105   : > { %v1612_v56 = vpack.c.bf16 %v928_v52, %v927_v43  ;;  %v894_v57 = vsel %vm766_vm6, %v537_v46, %v830_v49  ;;  %vm771_vm8 = vcmp.ge.f32.partialorder %v1765_v54, 0.0  ;;  %v835_v58 = vmul.f32 0.2, %v1765_v54 }
 0x106   : > { %1668 = vst [vmem:[%s1981_s6 + $0x28] sm:$0xff] %v1532_v51   ;;  %v1527_v60 = vpack.c.bf16 %v894_v57, %v893_v50  ;;  %v926_v61 = vsel %vm798_vm7, %v665_v47, %v862_v53  ;;  %v867_v62 = vmul.f32 0.2, %v1797_v55  ;;  %v550_v63 = vpop.f32.mrf.mxu0  ;;  %v678_v0 = vpop.f32.mrf.mxu1  ;;  %vm803_vm9 = vcmp.ge.f32.partialorder %v1797_v55, 0.0 }
 0x107   : > { %1684 = vst [vmem:[%s1981_s6 + $0xa8] sm:$0xff] %v1612_v56   ;;  %v1607_v1 = vpack.c.bf16 %v926_v61, %v925_v59  ;;  %v899_v2 = vsel %vm771_vm8, %v1765_v54, %v835_v58  ;;  %v833_v3 = vmul.f32 0.2, %v550_v63  ;;  %vm769_vm10 = vcmp.ge.f32.partialorder %v550_v63, 0.0 }
 0x108   : > { %1667 = vst [vmem:[%s1981_s6 + $0x20] sm:$0xff] %v1527_v60   ;;  %v1766_v4 = vpop.f32.mrf.mxu0  ;;  %v1798_v5 = vpop.f32.mrf.mxu1  ;;  %v931_v7 = vsel %vm803_vm9, %v1797_v55, %v867_v62  ;;  %vm801_vm13 = vcmp.ge.f32.partialorder %v678_v0, 0.0  ;;  %v865_v8 = vmul.f32 0.2, %v678_v0 }
 0x109   : > { %1683 = vst [vmem:[%s1981_s6 + $0xa0] sm:$0xff] %v1607_v1   ;;  %vm772_vm11 = vcmp.ge.f32.partialorder %v1766_v4, 0.0  ;;  %v836_v6 = vmul.f32 0.2, %v1766_v4  ;;  %vm804_vm12 = vcmp.ge.f32.partialorder %v1798_v5, 0.0  ;;  %v897_v14 = vsel %vm769_vm10, %v550_v63, %v833_v3 }
 0x10a   : > { %v868_v9 = vmul.f32 0.2, %v1798_v5  ;;  %v553_v10 = vpop.f32.mrf.mxu0  ;;  %v681_v11 = vpop.f32.mrf.mxu1  ;;  %v929_v23 = vsel %vm801_vm13, %v678_v0, %v865_v8 }
 0x10b   : > { %v900_v12 = vsel %vm772_vm11, %v1766_v4, %v836_v6  ;;  %vm770_vm14 = vcmp.ge.f32.partialorder %v553_v10, 0.0  ;;  %v834_v13 = vmul.f32 0.2, %v553_v10  ;;  %vm802_vm15 = vcmp.ge.f32.partialorder %v681_v11, 0.0 }
 0x10c   : > { %v1542_v15 = vpack.c.bf16 %v900_v12, %v899_v2  ;;  %v932_v16 = vsel %vm804_vm12, %v1798_v5, %v868_v9  ;;  %v866_v17 = vmul.f32 0.2, %v681_v11  ;;  %v1769_v18 = vpop.f32.mrf.mxu0  ;;  %v1801_v19 = vpop.f32.mrf.mxu1 }
 0x10d   : > { %v1622_v20 = vpack.c.bf16 %v932_v16, %v931_v7  ;;  %v898_v21 = vsel %vm770_vm14, %v553_v10, %v834_v13  ;;  %vm775_vm0 = vcmp.ge.f32.partialorder %v1769_v18, 0.0  ;;  %v839_v22 = vmul.f32 0.2, %v1769_v18 }
 0x10e   : > { %1670 = vst [vmem:[%s1981_s6 + $0x38] sm:$0xff] %v1542_v15   ;;  %v1537_v24 = vpack.c.bf16 %v898_v21, %v897_v14  ;;  %v930_v25 = vsel %vm802_vm15, %v681_v11, %v866_v17  ;;  %v871_v26 = vmul.f32 0.2, %v1801_v19  ;;  %v566_v27 = vpop.f32.mrf.mxu0  ;;  %v694_v28 = vpop.f32.mrf.mxu1  ;;  %vm807_vm1 = vcmp.ge.f32.partialorder %v1801_v19, 0.0 }
 0x10f   : > { %1686 = vst [vmem:[%s1981_s6 + $0xb8] sm:$0xff] %v1622_v20   ;;  %v1617_v29 = vpack.c.bf16 %v930_v25, %v929_v23  ;;  %v903_v30 = vsel %vm775_vm0, %v1769_v18, %v839_v22  ;;  %v837_v31 = vmul.f32 0.2, %v566_v27  ;;  %vm773_vm2 = vcmp.ge.f32.partialorder %v566_v27, 0.0 }
 0x110   : > { %1669 = vst [vmem:[%s1981_s6 + $0x30] sm:$0xff] %v1537_v24   ;;  %v1770_v32 = vpop.f32.mrf.mxu0  ;;  %v1802_v33 = vpop.f32.mrf.mxu1  ;;  %v935_v35 = vsel %vm807_vm1, %v1801_v19, %v871_v26  ;;  %vm805_vm5 = vcmp.ge.f32.partialorder %v694_v28, 0.0  ;;  %v869_v36 = vmul.f32 0.2, %v694_v28 }
 0x111   : > { %1685 = vst [vmem:[%s1981_s6 + $0xb0] sm:$0xff] %v1617_v29   ;;  %vm776_vm3 = vcmp.ge.f32.partialorder %v1770_v32, 0.0  ;;  %v840_v34 = vmul.f32 0.2, %v1770_v32  ;;  %vm808_vm4 = vcmp.ge.f32.partialorder %v1802_v33, 0.0  ;;  %v901_v42 = vsel %vm773_vm2, %v566_v27, %v837_v31 }
 0x112   : > { %v872_v37 = vmul.f32 0.2, %v1802_v33  ;;  %v569_v38 = vpop.f32.mrf.mxu0  ;;  %v697_v39 = vpop.f32.mrf.mxu1  ;;  %v933_v51 = vsel %vm805_vm5, %v694_v28, %v869_v36 }
 0x113   : > { %v904_v40 = vsel %vm776_vm3, %v1770_v32, %v840_v34  ;;  %vm774_vm6 = vcmp.ge.f32.partialorder %v569_v38, 0.0  ;;  %v838_v41 = vmul.f32 0.2, %v569_v38  ;;  %vm806_vm7 = vcmp.ge.f32.partialorder %v697_v39, 0.0 }
 0x114   : > { %v1552_v43 = vpack.c.bf16 %v904_v40, %v903_v30  ;;  %v936_v44 = vsel %vm808_vm4, %v1802_v33, %v872_v37  ;;  %v870_v45 = vmul.f32 0.2, %v697_v39  ;;  %v1773_v46 = vpop.f32.mrf.mxu0  ;;  %v1805_v47 = vpop.f32.mrf.mxu1 }
 0x115   : > { %v1632_v48 = vpack.c.bf16 %v936_v44, %v935_v35  ;;  %v902_v49 = vsel %vm774_vm6, %v569_v38, %v838_v41  ;;  %vm779_vm8 = vcmp.ge.f32.partialorder %v1773_v46, 0.0  ;;  %v843_v50 = vmul.f32 0.2, %v1773_v46 }
 0x116   : > { %1672 = vst [vmem:[%s1981_s6 + $0x48] sm:$0xff] %v1552_v43   ;;  %v1547_v52 = vpack.c.bf16 %v902_v49, %v901_v42  ;;  %v934_v53 = vsel %vm806_vm7, %v697_v39, %v870_v45  ;;  %v875_v54 = vmul.f32 0.2, %v1805_v47  ;;  %v582_v55 = vpop.f32.mrf.mxu0  ;;  %v710_v56 = vpop.f32.mrf.mxu1  ;;  %vm811_vm9 = vcmp.ge.f32.partialorder %v1805_v47, 0.0 }
 0x117   : > { %1688 = vst [vmem:[%s1981_s6 + $0xc8] sm:$0xff] %v1632_v48   ;;  %v1627_v57 = vpack.c.bf16 %v934_v53, %v933_v51  ;;  %v907_v58 = vsel %vm779_vm8, %v1773_v46, %v843_v50  ;;  %v841_v59 = vmul.f32 0.2, %v582_v55  ;;  %vm777_vm10 = vcmp.ge.f32.partialorder %v582_v55, 0.0 }
 0x118   : > { %1671 = vst [vmem:[%s1981_s6 + $0x40] sm:$0xff] %v1547_v52   ;;  %v1774_v60 = vpop.f32.mrf.mxu0  ;;  %v1806_v61 = vpop.f32.mrf.mxu1  ;;  %v939_v63 = vsel %vm811_vm9, %v1805_v47, %v875_v54  ;;  %vm809_vm13 = vcmp.ge.f32.partialorder %v710_v56, 0.0  ;;  %v873_v0 = vmul.f32 0.2, %v710_v56 }
 0x119   : > { %1687 = vst [vmem:[%s1981_s6 + $0xc0] sm:$0xff] %v1627_v57   ;;  %vm780_vm11 = vcmp.ge.f32.partialorder %v1774_v60, 0.0  ;;  %v844_v62 = vmul.f32 0.2, %v1774_v60  ;;  %vm812_vm12 = vcmp.ge.f32.partialorder %v1806_v61, 0.0  ;;  %v905_v6 = vsel %vm777_vm10, %v582_v55, %v841_v59 }
 0x11a   : > { %v876_v1 = vmul.f32 0.2, %v1806_v61  ;;  %v585_v2 = vpop.f32.mrf.mxu0  ;;  %v713_v3 = vpop.f32.mrf.mxu1  ;;  %v937_v15 = vsel %vm809_vm13, %v710_v56, %v873_v0 }
 0x11b   : > { %v908_v4 = vsel %vm780_vm11, %v1774_v60, %v844_v62  ;;  %vm778_vm14 = vcmp.ge.f32.partialorder %v585_v2, 0.0  ;;  %v842_v5 = vmul.f32 0.2, %v585_v2  ;;  %vm810_vm15 = vcmp.ge.f32.partialorder %v713_v3, 0.0 }
 0x11c   : > { %v1562_v7 = vpack.c.bf16 %v908_v4, %v907_v58  ;;  %v940_v8 = vsel %vm812_vm12, %v1806_v61, %v876_v1  ;;  %v874_v9 = vmul.f32 0.2, %v713_v3  ;;  %v1777_v10 = vpop.f32.mrf.mxu0  ;;  %v1809_v11 = vpop.f32.mrf.mxu1 }
 0x11d   : > { %v1642_v12 = vpack.c.bf16 %v940_v8, %v939_v63  ;;  %v906_v13 = vsel %vm778_vm14, %v585_v2, %v842_v5  ;;  %vm783_vm0 = vcmp.ge.f32.partialorder %v1777_v10, 0.0  ;;  %v847_v14 = vmul.f32 0.2, %v1777_v10 }
 0x11e   : > { %1674 = vst [vmem:[%s1981_s6 + $0x58] sm:$0xff] %v1562_v7   ;;  %v1557_v16 = vpack.c.bf16 %v906_v13, %v905_v6  ;;  %v938_v17 = vsel %vm810_vm15, %v713_v3, %v874_v9  ;;  %v879_v18 = vmul.f32 0.2, %v1809_v11  ;;  %v598_v19 = vpop.f32.mrf.mxu0  ;;  %v726_v20 = vpop.f32.mrf.mxu1  ;;  %vm815_vm1 = vcmp.ge.f32.partialorder %v1809_v11, 0.0 }
 0x11f   : > { %1690 = vst [vmem:[%s1981_s6 + $0xd8] sm:$0xff] %v1642_v12   ;;  %v1637_v21 = vpack.c.bf16 %v938_v17, %v937_v15  ;;  %v911_v22 = vsel %vm783_vm0, %v1777_v10, %v847_v14  ;;  %v845_v23 = vmul.f32 0.2, %v598_v19  ;;  %vm781_vm2 = vcmp.ge.f32.partialorder %v598_v19, 0.0 }
 0x120   : > { %1673 = vst [vmem:[%s1981_s6 + $0x50] sm:$0xff] %v1557_v16   ;;  %v1778_v24 = vpop.f32.mrf.mxu0  ;;  %v1810_v25 = vpop.f32.mrf.mxu1  ;;  %v943_v27 = vsel %vm815_vm1, %v1809_v11, %v879_v18  ;;  %vm813_vm5 = vcmp.ge.f32.partialorder %v726_v20, 0.0  ;;  %v877_v28 = vmul.f32 0.2, %v726_v20 }
 0x121   : > { %1689 = vst [vmem:[%s1981_s6 + $0xd0] sm:$0xff] %v1637_v21   ;;  %vm784_vm3 = vcmp.ge.f32.partialorder %v1778_v24, 0.0  ;;  %v848_v26 = vmul.f32 0.2, %v1778_v24  ;;  %vm816_vm4 = vcmp.ge.f32.partialorder %v1810_v25, 0.0  ;;  %v909_v34 = vsel %vm781_vm2, %v598_v19, %v845_v23 }
 0x122   : > { %v880_v29 = vmul.f32 0.2, %v1810_v25  ;;  %v601_v30 = vpop.f32.mrf.mxu0  ;;  %v729_v31 = vpop.f32.mrf.mxu1  ;;  %v941_v43 = vsel %vm813_vm5, %v726_v20, %v877_v28 }
 0x123   : > { %v912_v32 = vsel %vm784_vm3, %v1778_v24, %v848_v26  ;;  %vm782_vm6 = vcmp.ge.f32.partialorder %v601_v30, 0.0  ;;  %v846_v33 = vmul.f32 0.2, %v601_v30  ;;  %vm814_vm7 = vcmp.ge.f32.partialorder %v729_v31, 0.0 }
 0x124   : > { %v1572_v35 = vpack.c.bf16 %v912_v32, %v911_v22  ;;  %v944_v36 = vsel %vm816_vm4, %v1810_v25, %v880_v29  ;;  %v878_v37 = vmul.f32 0.2, %v729_v31  ;;  %v1781_v38 = vpop.f32.mrf.mxu0  ;;  %v1813_v39 = vpop.f32.mrf.mxu1 }
 0x125   : > { %v1652_v40 = vpack.c.bf16 %v944_v36, %v943_v27  ;;  %v910_v41 = vsel %vm782_vm6, %v601_v30, %v846_v33  ;;  %vm787_vm8 = vcmp.ge.f32.partialorder %v1781_v38, 0.0  ;;  %v851_v42 = vmul.f32 0.2, %v1781_v38 }
 0x126   : > { %1676 = vst [vmem:[%s1981_s6 + $0x68] sm:$0xff] %v1572_v35   ;;  %v1567_v44 = vpack.c.bf16 %v910_v41, %v909_v34  ;;  %v942_v45 = vsel %vm814_vm7, %v729_v31, %v878_v37  ;;  %v614_v46 = vpop.f32.mrf.mxu0  ;;  %v742_v47 = vpop.f32.mrf.mxu1  ;;  %vm819_vm9 = vcmp.ge.f32.partialorder %v1813_v39, 0.0  ;;  %v883_v50 = vmul.f32 0.2, %v1813_v39 }
 0x127   : > { %1692 = vst [vmem:[%s1981_s6 + $0xe8] sm:$0xff] %v1652_v40   ;;  %v1647_v48 = vpack.c.bf16 %v942_v45, %v941_v43  ;;  %v915_v49 = vsel %vm787_vm8, %v1781_v38, %v851_v42  ;;  %v849_v53 = vmul.f32 0.2, %v614_v46  ;;  %vm785_vm12 = vcmp.ge.f32.partialorder %v614_v46, 0.0 }
 0x128   : > { %1675 = vst [vmem:[%s1981_s6 + $0x60] sm:$0xff] %v1567_v44   ;;  %v1782_v51 = vpop.f32.mrf.mxu0  ;;  %v1814_v52 = vpop.f32.mrf.mxu1  ;;  %vm817_vm13 = vcmp.ge.f32.partialorder %v742_v47, 0.0  ;;  %v881_v55 = vmul.f32 0.2, %v742_v47  ;;  %v947_v61 = vsel %vm819_vm9, %v1813_v39, %v883_v50 }
 0x129   : > { %1691 = vst [vmem:[%s1981_s6 + $0xe0] sm:$0xff] %v1647_v48   ;;  %vm788_vm10 = vcmp.ge.f32.partialorder %v1782_v51, 0.0  ;;  %v852_v54 = vmul.f32 0.2, %v1782_v51  ;;  %vm820_vm11 = vcmp.ge.f32.partialorder %v1814_v52, 0.0  ;;  %v913_v1 = vsel %vm785_vm12, %v614_v46, %v849_v53 }
 0x12a   : > { %v884_v56 = vmul.f32 0.2, %v1814_v52  ;;  %v617_v57 = vpop.f32.mrf.mxu0  ;;  %v745_v58 = vpop.f32.mrf.mxu1  ;;  %v945_v4 = vsel %vm817_vm13, %v742_v47, %v881_v55 }
 0x12b   : > { %v916_v59 = vsel %vm788_vm10, %v1782_v51, %v852_v54  ;;  %vm786_vm14 = vcmp.ge.f32.partialorder %v617_v57, 0.0  ;;  %v850_v60 = vmul.f32 0.2, %v617_v57  ;;  %vm818_vm15 = vcmp.ge.f32.partialorder %v745_v58, 0.0 }
 0x12c   : > { %v1582_v62 = vpack.c.bf16 %v916_v59, %v915_v49  ;;  %v948_v63 = vsel %vm820_vm11, %v1814_v52, %v884_v56  ;;  %v882_v0 = vmul.f32 0.2, %v745_v58 }
 0x12d   : > { %v1662_v2 = vpack.c.bf16 %v948_v63, %v947_v61  ;;  %v914_v3 = vsel %vm786_vm14, %v617_v57, %v850_v60 }
 0x12e   : > { %1678 = vst [vmem:[%s1981_s6 + $0x78] sm:$0xff] %v1582_v62   ;;  %v1577_v5 = vpack.c.bf16 %v914_v3, %v913_v1  ;;  %v946_v6 = vsel %vm818_vm15, %v745_v58, %v882_v0 }
 0x12f   : > { %1694 = vst [vmem:[%s1981_s6 + $0xf8] sm:$0xff] %v1662_v2   ;;  %v1657_v7 = vpack.c.bf16 %v946_v6, %v945_v4 }
 0x130   : > { %1677 = vst [vmem:[%s1981_s6 + $0x70] sm:$0xff] %v1577_v5  }
 0x131   : > { %1693 = vst [vmem:[%s1981_s6 + $0xf0] sm:$0xff] %v1657_v7  }
 0x132 PF: > { %s12_s9 = sadd.s32 1, %s1885_s9  }
 0x133   : > { %p9_p4 = scmp.ge.s32.totalorder %s12_s9, 6  }
 0x135   :  { %11 = sbr.rel (!%p9_p4) target bundleno = 1 (0x1), region = 58 }

// kernel: discriminator_forward.8
= control target key start
LH: loop header
LB: loop body
LE: loop exit
PB: predicated region body
PF: predicated region fallthrough
CT: control target
= control target key end

     0   :  { %v1335_v0 = vmov 0   ;;  %s2155_s1 = inlined_call_operand.vmem [shape: bf16[256,128], index: 1, kind: input, shape index: {}]   ;;  %s2156_s0 = inlined_call_operand.vmem [shape: bf16[512,256], index: 0, kind: input, shape index: {}]   ;;  %s2157_s2 = inlined_call_operand.vmem [shape: f32[512,128], index: 2, kind: output, shape index: {0}]   ;;  %s2158_s3 = inlined_call_operand.vmem [shape: f32[1,128], index: 3, kind: output, shape index: {1}]   ;;  %s2159_s4 = inlined_call_operand.vmem [shape: f32[1,128], index: 4, kind: output, shape index: {2}]  }
   0x1   :  { %527 = vmatprep.subr.bf16.mxu0 %v1335_v0  ;;  %v1223_v1 = vld [vmem:[%s2155_s1 + $0x38] sm:$0xff]   ;;  %1190 = vmatprep.subr.bf16.mxu1 %v1335_v0  ;;  %v1224_v2 = vld [vmem:[%s2155_s1 + $0x30] sm:$0xff]   ;;  %v1225_v3 = vld [vmem:[%s2155_s1 + $0x28] sm:$0xff]  }
   0x2   :  { %528 = vmatpush1.bf16.msra.mxu0 %v1223_v1  ;;  %1206 = vmatpush1.bf16.msra.mxu1 %v1223_v1  ;;  %v1226_v4 = vld [vmem:[%s2155_s1 + $0x20] sm:$0xff]   ;;  %v1227_v5 = vld [vmem:[%s2155_s1 + $0x18] sm:$0xff]   ;;  %v1228_v7 = vld [vmem:[%s2155_s1 + $0x10] sm:$0xff]  }
   0x3   :  { %529 = vmatprep.subr.bf16.mxu0 %v1335_v0  ;;  %1191 = vmatprep.subr.bf16.mxu1 %v1335_v0  ;;  %v1241_v6 = vld [vmem:[%s2156_s0 + $0x4] ss:$8 sps:$4 sm:$0xff]   ;;  %v1231_v11 = vld [vmem:[%s2155_s1 + $0x78] sm:$0xff]   ;;  %v1232_v12 = vld [vmem:[%s2155_s1 + $0x70] sm:$0xff]  }
   0x4   :  { %559 = vmatprep.mubr.bf16.mxu0 %v1241_v6  ;;  %v1229_v8 = vld [vmem:[%s2155_s1 + $0x8] sm:$0xff]   ;;  %v1230_v9 = vld [vmem:[%s2155_s1] sm:$0xff]   ;;  %v1235_v15 = vld [vmem:[%s2155_s1 + $0x58] sm:$0xff]  }
   0x5   :  { %v1265_v10 = vld [vmem:[%s2156_s0 + $0x104] ss:$8 sps:$4 sm:$0xff]   ;;  %v1236_v16 = vld [vmem:[%s2155_s1 + $0x50] sm:$0xff]   ;;  %v1239_v19 = vld [vmem:[%s2156_s0] ss:$8 sps:$4 sm:$0xff]  }
   0x6   :  { %530 = vmatpush1.bf16.msra.mxu0 %v1224_v2  ;;  %1207 = vmatpush1.bf16.msra.mxu1 %v1224_v2  ;;  %v1233_v13 = vld [vmem:[%s2155_s1 + $0x68] sm:$0xff]   ;;  %v1234_v14 = vld [vmem:[%s2155_s1 + $0x60] sm:$0xff]   ;;  %v1242_v21 = vld [vmem:[%s2156_s0 + $0x14] ss:$8 sps:$4 sm:$0xff]  }
   0x7   :  { %531 = vmatprep.subr.bf16.mxu0 %v1335_v0  ;;  %1192 = vmatprep.subr.bf16.mxu1 %v1335_v0  ;;  %v1237_v17 = vld [vmem:[%s2155_s1 + $0x48] sm:$0xff]   ;;  %v1238_v18 = vld [vmem:[%s2155_s1 + $0x40] sm:$0xff]   ;;  %v1269_v22 = vld [vmem:[%s2156_s0 + $0x114] ss:$8 sps:$4 sm:$0xff]  }
   0x8   :  { %687 = vmatprep.mubr.bf16.mxu1 %v1265_v10  ;;  %v1263_v20 = vld [vmem:[%s2156_s0 + $0x100] ss:$8 sps:$4 sm:$0xff]   ;;  %v1244_v23 = vld [vmem:[%s2156_s0 + $0x10] ss:$8 sps:$4 sm:$0xff]   ;;  %v1245_v25 = vld [vmem:[%s2156_s0 + $0x24] ss:$8 sps:$4 sm:$0xff]  }
   0x9   :  { %v1271_v24 = vld [vmem:[%s2156_s0 + $0x110] ss:$8 sps:$4 sm:$0xff]   ;;  %v1275_v26 = vld [vmem:[%s2156_s0 + $0x124] ss:$8 sps:$4 sm:$0xff]   ;;  %v1247_v27 = vld [vmem:[%s2156_s0 + $0x20] ss:$8 sps:$4 sm:$0xff]  }
   0xa   :  { %532 = vmatpush1.bf16.msra.mxu0 %v1225_v3  ;;  %1208 = vmatpush1.bf16.msra.mxu1 %v1225_v3  ;;  %v1277_v28 = vld [vmem:[%s2156_s0 + $0x120] ss:$8 sps:$4 sm:$0xff]   ;;  %v1248_v29 = vld [vmem:[%s2156_s0 + $0x34] ss:$8 sps:$4 sm:$0xff]   ;;  %v1250_v31 = vld [vmem:[%s2156_s0 + $0x30] ss:$8 sps:$4 sm:$0xff]  }
   0xb   :  { %533 = vmatprep.subr.bf16.mxu0 %v1335_v0  ;;  %1193 = vmatprep.subr.bf16.mxu1 %v1335_v0  ;;  %v1281_v30 = vld [vmem:[%s2156_s0 + $0x134] ss:$8 sps:$4 sm:$0xff]   ;;  %v1283_v32 = vld [vmem:[%s2156_s0 + $0x130] ss:$8 sps:$4 sm:$0xff]   ;;  %v1251_v33 = vld [vmem:[%s2156_s0 + $0x44] ss:$8 sps:$4 sm:$0xff]  }
   0xc   :  { %v1287_v34 = vld [vmem:[%s2156_s0 + $0x144] ss:$8 sps:$4 sm:$0xff]   ;;  %v1253_v35 = vld [vmem:[%s2156_s0 + $0x40] ss:$8 sps:$4 sm:$0xff]   ;;  %v1254_v37 = vld [vmem:[%s2156_s0 + $0x54] ss:$8 sps:$4 sm:$0xff]  }
   0xd   :  { %v1289_v36 = vld [vmem:[%s2156_s0 + $0x140] ss:$8 sps:$4 sm:$0xff]   ;;  %v1293_v38 = vld [vmem:[%s2156_s0 + $0x154] ss:$8 sps:$4 sm:$0xff]   ;;  %v1256_v39 = vld [vmem:[%s2156_s0 + $0x50] ss:$8 sps:$4 sm:$0xff]  }
   0xe   :  { %534 = vmatpush1.bf16.msra.mxu0 %v1226_v4  ;;  %1209 = vmatpush1.bf16.msra.mxu1 %v1226_v4  ;;  %v1295_v40 = vld [vmem:[%s2156_s0 + $0x150] ss:$8 sps:$4 sm:$0xff]   ;;  %v1257_v41 = vld [vmem:[%s2156_s0 + $0x64] ss:$8 sps:$4 sm:$0xff]   ;;  %v1259_v43 = vld [vmem:[%s2156_s0 + $0x60] ss:$8 sps:$4 sm:$0xff]  }
   0xf   :  { %535 = vmatprep.subr.bf16.mxu0 %v1335_v0  ;;  %1194 = vmatprep.subr.bf16.mxu1 %v1335_v0  ;;  %v1299_v42 = vld [vmem:[%s2156_s0 + $0x164] ss:$8 sps:$4 sm:$0xff]   ;;  %v1301_v44 = vld [vmem:[%s2156_s0 + $0x160] ss:$8 sps:$4 sm:$0xff]   ;;  %v1260_v45 = vld [vmem:[%s2156_s0 + $0x74] ss:$8 sps:$4 sm:$0xff]  }
  0x10   :  { %v1305_v46 = vld [vmem:[%s2156_s0 + $0x174] ss:$8 sps:$4 sm:$0xff]   ;;  %v1262_v47 = vld [vmem:[%s2156_s0 + $0x70] ss:$8 sps:$4 sm:$0xff]   ;;  %v1266_v49 = vld [vmem:[%s2156_s0 + $0x84] ss:$8 sps:$4 sm:$0xff]  }
  0x11   :  { %v1307_v48 = vld [vmem:[%s2156_s0 + $0x170] ss:$8 sps:$4 sm:$0xff]   ;;  %v1311_v50 = vld [vmem:[%s2156_s0 + $0x184] ss:$8 sps:$4 sm:$0xff]   ;;  %v1268_v51 = vld [vmem:[%s2156_s0 + $0x80] ss:$8 sps:$4 sm:$0xff]  }
  0x12   :  { %536 = vmatpush1.bf16.msra.mxu0 %v1227_v5  ;;  %1210 = vmatpush1.bf16.msra.mxu1 %v1227_v5  ;;  %v1313_v52 = vld [vmem:[%s2156_s0 + $0x180] ss:$8 sps:$4 sm:$0xff]   ;;  %v1272_v53 = vld [vmem:[%s2156_s0 + $0x94] ss:$8 sps:$4 sm:$0xff]   ;;  %v1274_v55 = vld [vmem:[%s2156_s0 + $0x90] ss:$8 sps:$4 sm:$0xff]  }
  0x13   :  { %537 = vmatprep.subr.bf16.mxu0 %v1335_v0  ;;  %1195 = vmatprep.subr.bf16.mxu1 %v1335_v0  ;;  %v1314_v54 = vld [vmem:[%s2156_s0 + $0x194] ss:$8 sps:$4 sm:$0xff]   ;;  %v1316_v56 = vld [vmem:[%s2156_s0 + $0x190] ss:$8 sps:$4 sm:$0xff]   ;;  %v1278_v57 = vld [vmem:[%s2156_s0 + $0xa4] ss:$8 sps:$4 sm:$0xff]  }
  0x14   :  { %v1317_v58 = vld [vmem:[%s2156_s0 + $0x1a4] ss:$8 sps:$4 sm:$0xff]   ;;  %v1280_v59 = vld [vmem:[%s2156_s0 + $0xa0] ss:$8 sps:$4 sm:$0xff]   ;;  %v1284_v61 = vld [vmem:[%s2156_s0 + $0xb4] ss:$8 sps:$4 sm:$0xff]  }
  0x15   :  { %v1319_v60 = vld [vmem:[%s2156_s0 + $0x1a0] ss:$8 sps:$4 sm:$0xff]   ;;  %v1320_v62 = vld [vmem:[%s2156_s0 + $0x1b4] ss:$8 sps:$4 sm:$0xff]   ;;  %v1286_v63 = vld [vmem:[%s2156_s0 + $0xb0] ss:$8 sps:$4 sm:$0xff]  }
  0x16   :  { %538 = vmatpush1.bf16.msra.mxu0 %v1228_v7  ;;  %1211 = vmatpush1.bf16.msra.mxu1 %v1228_v7  ;;  %v1290_v1 = vld [vmem:[%s2156_s0 + $0xc4] ss:$8 sps:$4 sm:$0xff]   ;;  %v1292_v3 = vld [vmem:[%s2156_s0 + $0xc0] ss:$8 sps:$4 sm:$0xff]   ;;  %v1296_v5 = vld [vmem:[%s2156_s0 + $0xd4] ss:$8 sps:$4 sm:$0xff]  }
  0x17   :  { %539 = vmatprep.subr.bf16.mxu0 %v1335_v0  ;;  %1196 = vmatprep.subr.bf16.mxu1 %v1335_v0  ;;  %v1323_v2 = vld [vmem:[%s2156_s0 + $0x1c4] ss:$8 sps:$4 sm:$0xff]   ;;  %v1325_v4 = vld [vmem:[%s2156_s0 + $0x1c0] ss:$8 sps:$4 sm:$0xff]   ;;  %v1326_v6 = vld [vmem:[%s2156_s0 + $0x1d4] ss:$8 sps:$4 sm:$0xff]  }
  0x18   :  { %v1298_v7 = vld [vmem:[%s2156_s0 + $0xd0] ss:$8 sps:$4 sm:$0xff]   ;;  %v1329_v10 = vld [vmem:[%s2156_s0 + $0x1e4] ss:$8 sps:$4 sm:$0xff]  }
  0x1a   :  { %540 = vmatpush1.bf16.msra.mxu0 %v1229_v8  ;;  %1212 = vmatpush1.bf16.msra.mxu1 %v1229_v8  ;;  %v1328_v8 = vld [vmem:[%s2156_s0 + $0x1d0] ss:$8 sps:$4 sm:$0xff]  }
  0x1b   :  { %541 = vmatprep.subr.bf16.mxu0 %v1335_v0  ;;  %1197 = vmatprep.subr.bf16.mxu1 %v1335_v0 }
  0x1e   :  { %542 = vmatpush1.bf16.msra.mxu0 %v1230_v9  ;;  %1213 = vmatpush1.bf16.msra.mxu1 %v1230_v9  ;;  %v1302_v9 = vld [vmem:[%s2156_s0 + $0xe4] ss:$8 sps:$4 sm:$0xff]  }
  0x1f   :  { %543 = vmatprep.subr.bf16.mxu0 %v1335_v0  ;;  %1198 = vmatprep.subr.bf16.mxu1 %v1335_v0 }
  0x22   :  { %544 = vmatpush2.bf16.msra.mxu0 %v1231_v11  ;;  %1214 = vmatpush2.bf16.msra.mxu1 %v1231_v11  ;;  %v1304_v11 = vld [vmem:[%s2156_s0 + $0xe0] ss:$8 sps:$4 sm:$0xff]  }
  0x23   :  { %545 = vmatprep.subr.bf16.mxu0 %v1335_v0  ;;  %1199 = vmatprep.subr.bf16.mxu1 %v1335_v0 }
  0x26   :  { %546 = vmatpush2.bf16.msra.mxu0 %v1232_v12  ;;  %1215 = vmatpush2.bf16.msra.mxu1 %v1232_v12  ;;  %v1331_v12 = vld [vmem:[%s2156_s0 + $0x1e0] ss:$8 sps:$4 sm:$0xff]  }
  0x27   :  { %547 = vmatprep.subr.bf16.mxu0 %v1335_v0  ;;  %1200 = vmatprep.subr.bf16.mxu1 %v1335_v0 }
  0x2a   :  { %548 = vmatpush2.bf16.msra.mxu0 %v1233_v13  ;;  %1216 = vmatpush2.bf16.msra.mxu1 %v1233_v13  ;;  %v1308_v13 = vld [vmem:[%s2156_s0 + $0xf4] ss:$8 sps:$4 sm:$0xff]  }
  0x2b   :  { %549 = vmatprep.subr.bf16.mxu0 %v1335_v0  ;;  %1201 = vmatprep.subr.bf16.mxu1 %v1335_v0 }
  0x2e   :  { %550 = vmatpush2.bf16.msra.mxu0 %v1234_v14  ;;  %1217 = vmatpush2.bf16.msra.mxu1 %v1234_v14  ;;  %v1332_v14 = vld [vmem:[%s2156_s0 + $0x1f4] ss:$8 sps:$4 sm:$0xff]  }
  0x2f   :  { %551 = vmatprep.subr.bf16.mxu0 %v1335_v0  ;;  %1202 = vmatprep.subr.bf16.mxu1 %v1335_v0 }
  0x32   :  { %552 = vmatpush2.bf16.msra.mxu0 %v1235_v15  ;;  %1218 = vmatpush2.bf16.msra.mxu1 %v1235_v15  ;;  %v1310_v15 = vld [vmem:[%s2156_s0 + $0xf0] ss:$8 sps:$4 sm:$0xff]  }
  0x33   :  { %553 = vmatprep.subr.bf16.mxu0 %v1335_v0  ;;  %1203 = vmatprep.subr.bf16.mxu1 %v1335_v0 }
  0x36   :  { %554 = vmatpush2.bf16.msra.mxu0 %v1236_v16  ;;  %1219 = vmatpush2.bf16.msra.mxu1 %v1236_v16  ;;  %v1334_v16 = vld [vmem:[%s2156_s0 + $0x1f0] ss:$8 sps:$4 sm:$0xff]  }
  0x37   :  { %555 = vmatprep.subr.bf16.mxu0 %v1335_v0  ;;  %1204 = vmatprep.subr.bf16.mxu1 %v1335_v0 }
  0x3a   :  { %556 = vmatpush2.bf16.msra.mxu0 %v1237_v17  ;;  %1220 = vmatpush2.bf16.msra.mxu1 %v1237_v17 }
  0x3b   :  { %557 = vmatprep.subr.bf16.mxu0 %v1335_v0  ;;  %1205 = vmatprep.subr.bf16.mxu1 %v1335_v0  ;;  %v1322_v0 = vld [vmem:[%s2156_s0 + $0x1b0] ss:$8 sps:$4 sm:$0xff]  }
  0x3e   :  { %558 = vmatpush2.bf16.msra.mxu0 %v1238_v18  ;;  %1221 = vmatpush2.bf16.msra.mxu1 %v1238_v18 }
  0x41   :  { %560 = vmatmul.mubr.bf16.vlgmr.msra.gmra.mxu0 %v1239_v19  ;;  %688 = vmatmul.mubr.bf16.vlgmr.msra.gmra.mxu1 %v1263_v20 }
  0x42   :  { %567 = vmatprep.mubr.bf16.mxu0 %v1242_v21  ;;  %695 = vmatprep.mubr.bf16.mxu1 %v1269_v22 }
  0x49   :  { %568 = vmatmul.mubr.bf16.gmra.mxu0 %v1244_v23  ;;  %696 = vmatmul.mubr.bf16.gmra.mxu1 %v1271_v24 }
  0x4a   :  { %575 = vmatprep.mubr.bf16.mxu0 %v1245_v25  ;;  %703 = vmatprep.mubr.bf16.mxu1 %v1275_v26 }
  0x51   :  { %576 = vmatmul.mubr.bf16.gmra.mxu0 %v1247_v27  ;;  %704 = vmatmul.mubr.bf16.gmra.mxu1 %v1277_v28 }
  0x52   :  { %583 = vmatprep.mubr.bf16.mxu0 %v1248_v29  ;;  %711 = vmatprep.mubr.bf16.mxu1 %v1281_v30 }
  0x59   :  { %584 = vmatmul.mubr.bf16.gmra.mxu0 %v1250_v31  ;;  %712 = vmatmul.mubr.bf16.gmra.mxu1 %v1283_v32 }
  0x5a   :  { %591 = vmatprep.mubr.bf16.mxu0 %v1251_v33  ;;  %719 = vmatprep.mubr.bf16.mxu1 %v1287_v34 }
  0x61   :  { %592 = vmatmul.mubr.bf16.gmra.mxu0 %v1253_v35  ;;  %720 = vmatmul.mubr.bf16.gmra.mxu1 %v1289_v36 }
  0x62   :  { %599 = vmatprep.mubr.bf16.mxu0 %v1254_v37  ;;  %727 = vmatprep.mubr.bf16.mxu1 %v1293_v38 }
  0x69   :  { %600 = vmatmul.mubr.bf16.gmra.mxu0 %v1256_v39  ;;  %728 = vmatmul.mubr.bf16.gmra.mxu1 %v1295_v40 }
  0x6a   :  { %607 = vmatprep.mubr.bf16.mxu0 %v1257_v41  ;;  %735 = vmatprep.mubr.bf16.mxu1 %v1299_v42 }
  0x71   :  { %608 = vmatmul.mubr.bf16.gmra.mxu0 %v1259_v43  ;;  %736 = vmatmul.mubr.bf16.gmra.mxu1 %v1301_v44 }
  0x72   :  { %615 = vmatprep.mubr.bf16.mxu0 %v1260_v45  ;;  %743 = vmatprep.mubr.bf16.mxu1 %v1305_v46 }
  0x79   :  { %616 = vmatmul.mubr.bf16.gmra.mxu0 %v1262_v47  ;;  %744 = vmatmul.mubr.bf16.gmra.mxu1 %v1307_v48 }
  0x7a   :  { %623 = vmatprep.mubr.bf16.mxu0 %v1266_v49  ;;  %751 = vmatprep.mubr.bf16.mxu1 %v1311_v50 }
  0x81   :  { %624 = vmatmul.mubr.bf16.gmra.mxu0 %v1268_v51  ;;  %752 = vmatmul.mubr.bf16.gmra.mxu1 %v1313_v52 }
  0x82   :  { %631 = vmatprep.mubr.bf16.mxu0 %v1272_v53  ;;  %759 = vmatprep.mubr.bf16.mxu1 %v1314_v54 }
  0x89   :  { %632 = vmatmul.mubr.bf16.gmra.mxu0 %v1274_v55  ;;  %760 = vmatmul.mubr.bf16.gmra.mxu1 %v1316_v56 }
  0x8a   :  { %639 = vmatprep.mubr.bf16.mxu0 %v1278_v57  ;;  %767 = vmatprep.mubr.bf16.mxu1 %v1317_v58 }
  0x91   :  { %640 = vmatmul.mubr.bf16.gmra.mxu0 %v1280_v59  ;;  %768 = vmatmul.mubr.bf16.gmra.mxu1 %v1319_v60 }
  0x92   :  { %647 = vmatprep.mubr.bf16.mxu0 %v1284_v61  ;;  %775 = vmatprep.mubr.bf16.mxu1 %v1320_v62 }
  0x99   :  { %648 = vmatmul.mubr.bf16.gmra.mxu0 %v1286_v63  ;;  %776 = vmatmul.mubr.bf16.gmra.mxu1 %v1322_v0 }
  0x9a   :  { %655 = vmatprep.mubr.bf16.mxu0 %v1290_v1  ;;  %783 = vmatprep.mubr.bf16.mxu1 %v1323_v2 }
  0xa1   :  { %656 = vmatmul.mubr.bf16.gmra.mxu0 %v1292_v3  ;;  %784 = vmatmul.mubr.bf16.gmra.mxu1 %v1325_v4 }
  0xa2   :  { %663 = vmatprep.mubr.bf16.mxu0 %v1296_v5  ;;  %791 = vmatprep.mubr.bf16.mxu1 %v1326_v6 }
  0xa9   :  { %664 = vmatmul.mubr.bf16.gmra.mxu0 %v1298_v7  ;;  %792 = vmatmul.mubr.bf16.gmra.mxu1 %v1328_v8 }
  0xaa   :  { %671 = vmatprep.mubr.bf16.mxu0 %v1302_v9  ;;  %799 = vmatprep.mubr.bf16.mxu1 %v1329_v10 }
  0xb1   :  { %672 = vmatmul.mubr.bf16.gmra.mxu0 %v1304_v11  ;;  %800 = vmatmul.mubr.bf16.gmra.mxu1 %v1331_v12 }
  0xb2   :  { %679 = vmatprep.mubr.bf16.mxu0 %v1308_v13  ;;  %807 = vmatprep.mubr.bf16.mxu1 %v1332_v14 }
  0xb9   :  { %680 = vmatmul.mubr.bf16.gmra.mxu0 %v1310_v15  ;;  %808 = vmatmul.mubr.bf16.gmra.mxu1 %v1334_v16 }
 0x101   :  { %v1633_v17 = vpop.f32.mrf.mxu0  ;;  %v1635_v18 = vpop.f32.mrf.mxu1 }
 0x102   :  { %816 = vst [vmem:[%s2157_s2] sm:$0xff] %v1633_v17  ;;  %848 = vst [vmem:[%s2157_s2 + $0x100] sm:$0xff] %v1635_v18 }
 0x103   :  { %v563_v19 = vpop.f32.mrf.mxu0  ;;  %v691_v20 = vpop.f32.mrf.mxu1 }
 0x105   :  { %v1645_v21 = vpop.f32.mrf.mxu0  ;;  %v1647_v22 = vpop.f32.mrf.mxu1 }
 0x106   :  { %817 = vst [vmem:[%s2157_s2 + $0x8] sm:$0xff] %v1645_v21  ;;  %849 = vst [vmem:[%s2157_s2 + $0x108] sm:$0xff] %v1647_v22  ;;  %v950_v19 = vmul.f32 %v1645_v21, %v1645_v21 }
 0x107   :  { %v566_v23 = vpop.f32.mrf.mxu0  ;;  %v694_v24 = vpop.f32.mrf.mxu1 }
 0x108   :  { %v949_v24 = vmul.f32 %v1633_v17, %v1633_v17 }
 0x109   :  { %v1657_v25 = vpop.f32.mrf.mxu0  ;;  %v1659_v26 = vpop.f32.mrf.mxu1 }
 0x10a   :  { %818 = vst [vmem:[%s2157_s2 + $0x10] sm:$0xff] %v1657_v25  ;;  %850 = vst [vmem:[%s2157_s2 + $0x110] sm:$0xff] %v1659_v26 }
 0x10b   :  { %v571_v27 = vpop.f32.mrf.mxu0  ;;  %v699_v28 = vpop.f32.mrf.mxu1 }
 0x10c   :  { %v880_v27 = vadd.f32 %v1645_v21, %v1633_v17  ;;  %v951_v28 = vmul.f32 %v1657_v25, %v1657_v25 }
 0x10d   :  { %v1669_v29 = vpop.f32.mrf.mxu0  ;;  %v1671_v30 = vpop.f32.mrf.mxu1 }
 0x10e   :  { %819 = vst [vmem:[%s2157_s2 + $0x18] sm:$0xff] %v1669_v29  ;;  %851 = vst [vmem:[%s2157_s2 + $0x118] sm:$0xff] %v1671_v30  ;;  %v952_v17 = vmul.f32 %v1669_v29, %v1669_v29 }
 0x10f   :  { %v574_v31 = vpop.f32.mrf.mxu0  ;;  %v702_v32 = vpop.f32.mrf.mxu1 }
 0x111   :  { %v1681_v33 = vpop.f32.mrf.mxu0  ;;  %v1683_v34 = vpop.f32.mrf.mxu1 }
 0x112   :  { %820 = vst [vmem:[%s2157_s2 + $0x20] sm:$0xff] %v1681_v33  ;;  %852 = vst [vmem:[%s2157_s2 + $0x120] sm:$0xff] %v1683_v34 }
 0x113   :  { %v579_v35 = vpop.f32.mrf.mxu0  ;;  %v707_v36 = vpop.f32.mrf.mxu1 }
 0x114   :  { %v1013_v35 = vadd.f32 %v950_v19, %v949_v24  ;;  %v881_v36 = vadd.f32 %v880_v27, %v1657_v25 }
 0x115   :  { %v1693_v37 = vpop.f32.mrf.mxu0  ;;  %v1695_v38 = vpop.f32.mrf.mxu1 }
 0x116   :  { %821 = vst [vmem:[%s2157_s2 + $0x28] sm:$0xff] %v1693_v37  ;;  %853 = vst [vmem:[%s2157_s2 + $0x128] sm:$0xff] %v1695_v38 }
 0x117   :  { %v582_v39 = vpop.f32.mrf.mxu0  ;;  %v710_v40 = vpop.f32.mrf.mxu1 }
 0x118   :  { %v1014_v40 = vadd.f32 %v1013_v35, %v951_v28 }
 0x119   :  { %v1705_v41 = vpop.f32.mrf.mxu0  ;;  %v1707_v42 = vpop.f32.mrf.mxu1 }
 0x11a   :  { %822 = vst [vmem:[%s2157_s2 + $0x30] sm:$0xff] %v1705_v41  ;;  %854 = vst [vmem:[%s2157_s2 + $0x130] sm:$0xff] %v1707_v42 }
 0x11b   :  { %v587_v43 = vpop.f32.mrf.mxu0  ;;  %v715_v44 = vpop.f32.mrf.mxu1 }
 0x11c   :  { %v882_v43 = vadd.f32 %v881_v36, %v1669_v29  ;;  %v953_v44 = vmul.f32 %v1681_v33, %v1681_v33  ;;  %v954_v29 = vmul.f32 %v1693_v37, %v1693_v37 }
 0x11d   :  { %v1717_v45 = vpop.f32.mrf.mxu0  ;;  %v1719_v46 = vpop.f32.mrf.mxu1 }
 0x11e   :  { %823 = vst [vmem:[%s2157_s2 + $0x38] sm:$0xff] %v1717_v45  ;;  %855 = vst [vmem:[%s2157_s2 + $0x138] sm:$0xff] %v1719_v46 }
 0x11f   :  { %v590_v47 = vpop.f32.mrf.mxu0  ;;  %v718_v48 = vpop.f32.mrf.mxu1 }
 0x120   :  { %v1015_v48 = vadd.f32 %v1014_v40, %v952_v17 }
 0x121   :  { %v1729_v49 = vpop.f32.mrf.mxu0  ;;  %v1731_v50 = vpop.f32.mrf.mxu1 }
 0x122   :  { %824 = vst [vmem:[%s2157_s2 + $0x40] sm:$0xff] %v1729_v49  ;;  %856 = vst [vmem:[%s2157_s2 + $0x140] sm:$0xff] %v1731_v50 }
 0x123   :  { %v595_v51 = vpop.f32.mrf.mxu0  ;;  %v723_v52 = vpop.f32.mrf.mxu1 }
 0x124   :  { %v883_v51 = vadd.f32 %v882_v43, %v1681_v33 }
 0x125   :  { %v1741_v53 = vpop.f32.mrf.mxu0  ;;  %v1743_v54 = vpop.f32.mrf.mxu1 }
 0x126   :  { %825 = vst [vmem:[%s2157_s2 + $0x48] sm:$0xff] %v1741_v53  ;;  %857 = vst [vmem:[%s2157_s2 + $0x148] sm:$0xff] %v1743_v54 }
 0x127   :  { %v598_v55 = vpop.f32.mrf.mxu0  ;;  %v726_v56 = vpop.f32.mrf.mxu1 }
 0x128   :  { %v1016_v56 = vadd.f32 %v1015_v48, %v953_v44 }
 0x129   :  { %v1753_v57 = vpop.f32.mrf.mxu0  ;;  %v1755_v58 = vpop.f32.mrf.mxu1 }
 0x12a   :  { %826 = vst [vmem:[%s2157_s2 + $0x50] sm:$0xff] %v1753_v57  ;;  %858 = vst [vmem:[%s2157_s2 + $0x150] sm:$0xff] %v1755_v58 }
 0x12b   :  { %v603_v59 = vpop.f32.mrf.mxu0  ;;  %v731_v60 = vpop.f32.mrf.mxu1 }
 0x12c   :  { %v884_v59 = vadd.f32 %v883_v51, %v1693_v37  ;;  %v955_v60 = vmul.f32 %v1705_v41, %v1705_v41  ;;  %v956_v37 = vmul.f32 %v1717_v45, %v1717_v45 }
 0x12d   :  { %v1765_v61 = vpop.f32.mrf.mxu0  ;;  %v1767_v62 = vpop.f32.mrf.mxu1 }
 0x12e   :  { %827 = vst [vmem:[%s2157_s2 + $0x58] sm:$0xff] %v1765_v61  ;;  %859 = vst [vmem:[%s2157_s2 + $0x158] sm:$0xff] %v1767_v62 }
 0x12f   :  { %v606_v63 = vpop.f32.mrf.mxu0  ;;  %v734_v0 = vpop.f32.mrf.mxu1 }
 0x130   :  { %v1017_v0 = vadd.f32 %v1016_v56, %v954_v29 }
 0x131   :  { %v1777_v1 = vpop.f32.mrf.mxu0  ;;  %v1779_v2 = vpop.f32.mrf.mxu1 }
 0x132   :  { %828 = vst [vmem:[%s2157_s2 + $0x60] sm:$0xff] %v1777_v1  ;;  %860 = vst [vmem:[%s2157_s2 + $0x160] sm:$0xff] %v1779_v2 }
 0x133   :  { %v611_v3 = vpop.f32.mrf.mxu0  ;;  %v739_v4 = vpop.f32.mrf.mxu1 }
 0x134   :  { %v885_v3 = vadd.f32 %v884_v59, %v1705_v41 }
 0x135   :  { %v1789_v5 = vpop.f32.mrf.mxu0  ;;  %v1791_v6 = vpop.f32.mrf.mxu1 }
 0x136   :  { %829 = vst [vmem:[%s2157_s2 + $0x68] sm:$0xff] %v1789_v5  ;;  %861 = vst [vmem:[%s2157_s2 + $0x168] sm:$0xff] %v1791_v6 }
 0x137   :  { %v614_v7 = vpop.f32.mrf.mxu0  ;;  %v742_v8 = vpop.f32.mrf.mxu1 }
 0x138   :  { %v1018_v8 = vadd.f32 %v1017_v0, %v955_v60 }
 0x139   :  { %v1801_v9 = vpop.f32.mrf.mxu0  ;;  %v1803_v10 = vpop.f32.mrf.mxu1 }
 0x13a   :  { %830 = vst [vmem:[%s2157_s2 + $0x70] sm:$0xff] %v1801_v9  ;;  %862 = vst [vmem:[%s2157_s2 + $0x170] sm:$0xff] %v1803_v10 }
 0x13b   :  { %v619_v11 = vpop.f32.mrf.mxu0  ;;  %v747_v12 = vpop.f32.mrf.mxu1 }
 0x13c   :  { %v886_v11 = vadd.f32 %v885_v3, %v1717_v45  ;;  %v957_v12 = vmul.f32 %v1729_v49, %v1729_v49  ;;  %v958_v45 = vmul.f32 %v1741_v53, %v1741_v53 }
 0x13d   :  { %v1813_v13 = vpop.f32.mrf.mxu0  ;;  %v1815_v14 = vpop.f32.mrf.mxu1 }
 0x13e   :  { %831 = vst [vmem:[%s2157_s2 + $0x78] sm:$0xff] %v1813_v13  ;;  %863 = vst [vmem:[%s2157_s2 + $0x178] sm:$0xff] %v1815_v14  ;;  %v887_v19 = vadd.f32 %v886_v11, %v1729_v49 }
 0x13f   :  { %v622_v15 = vpop.f32.mrf.mxu0  ;;  %v750_v16 = vpop.f32.mrf.mxu1 }
 0x140   :  { %v1019_v16 = vadd.f32 %v1018_v8, %v956_v37 }
 0x141   :  { %v1827_v20 = vpop.f32.mrf.mxu0  ;;  %v1829_v23 = vpop.f32.mrf.mxu1 }
 0x142   :  { %832 = vst [vmem:[%s2157_s2 + $0x80] sm:$0xff] %v1827_v20  ;;  %864 = vst [vmem:[%s2157_s2 + $0x180] sm:$0xff] %v1829_v23  ;;  %v1020_v28 = vadd.f32 %v1019_v16, %v957_v12 }
 0x143   :  { %v627_v31 = vpop.f32.mrf.mxu0  ;;  %v755_v32 = vpop.f32.mrf.mxu1 }
 0x144   :  { %v888_v31 = vadd.f32 %v887_v19, %v1741_v53  ;;  %v959_v32 = vmul.f32 %v1753_v57, %v1753_v57  ;;  %v1021_v36 = vadd.f32 %v1020_v28, %v958_v45  ;;  %v960_v53 = vmul.f32 %v1765_v61, %v1765_v61 }
 0x145   :  { %v1848_v21 = vpop.f32.mrf.mxu0  ;;  %v1850_v39 = vpop.f32.mrf.mxu1 }
 0x146   :  { %833 = vst [vmem:[%s2157_s2 + $0x88] sm:$0xff] %v1848_v21  ;;  %865 = vst [vmem:[%s2157_s2 + $0x188] sm:$0xff] %v1850_v39  ;;  %v889_v17 = vadd.f32 %v888_v31, %v1753_v57  ;;  %v1022_v44 = vadd.f32 %v1021_v36, %v959_v32 }
 0x147   :  { %v630_v25 = vpop.f32.mrf.mxu0  ;;  %v758_v47 = vpop.f32.mrf.mxu1 }
 0x148   :  { %v890_v25 = vadd.f32 %v889_v17, %v1765_v61  ;;  %v961_v47 = vmul.f32 %v1777_v1, %v1777_v1  ;;  %v1023_v51 = vadd.f32 %v1022_v44, %v960_v53  ;;  %v962_v61 = vmul.f32 %v1789_v5, %v1789_v5 }
 0x149   :  { %v1866_v52 = vpop.f32.mrf.mxu0  ;;  %v1868_v55 = vpop.f32.mrf.mxu1 }
 0x14a   :  { %834 = vst [vmem:[%s2157_s2 + $0x90] sm:$0xff] %v1866_v52  ;;  %866 = vst [vmem:[%s2157_s2 + $0x190] sm:$0xff] %v1868_v55  ;;  %v891_v29 = vadd.f32 %v890_v25, %v1777_v1  ;;  %v1024_v60 = vadd.f32 %v1023_v51, %v961_v47 }
 0x14b   :  { %v635_v33 = vpop.f32.mrf.mxu0  ;;  %v763_v63 = vpop.f32.mrf.mxu1 }
 0x14c   :  { %v892_v33 = vadd.f32 %v891_v29, %v1789_v5  ;;  %v963_v63 = vmul.f32 %v1801_v9, %v1801_v9  ;;  %v1025_v3 = vadd.f32 %v1024_v60, %v962_v61  ;;  %v964_v5 = vmul.f32 %v1813_v13, %v1813_v13 }
 0x14d   :  { %v1884_v4 = vpop.f32.mrf.mxu0  ;;  %v1886_v7 = vpop.f32.mrf.mxu1 }
 0x14e   :  { %835 = vst [vmem:[%s2157_s2 + $0x98] sm:$0xff] %v1884_v4  ;;  %867 = vst [vmem:[%s2157_s2 + $0x198] sm:$0xff] %v1886_v7  ;;  %v893_v37 = vadd.f32 %v892_v33, %v1801_v9  ;;  %v1026_v12 = vadd.f32 %v1025_v3, %v963_v63 }
 0x14f   :  { %v638_v41 = vpop.f32.mrf.mxu0  ;;  %v766_v15 = vpop.f32.mrf.mxu1 }
 0x150   :  { %v894_v41 = vadd.f32 %v893_v37, %v1813_v13  ;;  %v965_v15 = vmul.f32 %v1827_v20, %v1827_v20  ;;  %v1027_v19 = vadd.f32 %v1026_v12, %v964_v5  ;;  %v966_v13 = vmul.f32 %v1848_v21, %v1848_v21 }
 0x151   :  { %v1902_v24 = vpop.f32.mrf.mxu0  ;;  %v1904_v27 = vpop.f32.mrf.mxu1 }
 0x152   :  { %836 = vst [vmem:[%s2157_s2 + $0xa0] sm:$0xff] %v1902_v24  ;;  %868 = vst [vmem:[%s2157_s2 + $0x1a0] sm:$0xff] %v1904_v27  ;;  %v895_v45 = vadd.f32 %v894_v41, %v1827_v20  ;;  %v1028_v32 = vadd.f32 %v1027_v19, %v965_v15 }
 0x153   :  { %v643_v49 = vpop.f32.mrf.mxu0  ;;  %v771_v35 = vpop.f32.mrf.mxu1 }
 0x154   :  { %v896_v49 = vadd.f32 %v895_v45, %v1848_v21  ;;  %v967_v35 = vmul.f32 %v1866_v52, %v1866_v52  ;;  %v1029_v17 = vadd.f32 %v1028_v32, %v966_v13  ;;  %v968_v21 = vmul.f32 %v1884_v4, %v1884_v4 }
 0x155   :  { %v1920_v40 = vpop.f32.mrf.mxu0  ;;  %v1922_v43 = vpop.f32.mrf.mxu1 }
 0x156   :  { %837 = vst [vmem:[%s2157_s2 + $0xa8] sm:$0xff] %v1920_v40  ;;  %869 = vst [vmem:[%s2157_s2 + $0x1a8] sm:$0xff] %v1922_v43  ;;  %v897_v53 = vadd.f32 %v896_v49, %v1866_v52  ;;  %v1030_v47 = vadd.f32 %v1029_v17, %v967_v35 }
 0x157   :  { %v646_v57 = vpop.f32.mrf.mxu0  ;;  %v774_v48 = vpop.f32.mrf.mxu1 }
 0x158   :  { %v898_v57 = vadd.f32 %v897_v53, %v1884_v4  ;;  %v969_v48 = vmul.f32 %v1902_v24, %v1902_v24  ;;  %v1031_v29 = vadd.f32 %v1030_v47, %v968_v21  ;;  %v970_v4 = vmul.f32 %v1920_v40, %v1920_v40 }
 0x159   :  { %v649_v56 = vpop.f32.mrf.mxu0  ;;  %v1938_v59 = vpop.f32.mrf.mxu1 }
 0x15a   :  { %838 = vst [vmem:[%s2157_s2 + $0xb0] sm:$0xff] %v649_v56  ;;  %870 = vst [vmem:[%s2157_s2 + $0x1b0] sm:$0xff] %v1938_v59  ;;  %v899_v61 = vadd.f32 %v898_v57, %v1902_v24  ;;  %v1032_v63 = vadd.f32 %v1031_v29, %v969_v48 }
 0x15b   :  { %v651_v1 = vpop.f32.mrf.mxu0  ;;  %v779_v0 = vpop.f32.mrf.mxu1 }
 0x15c   :  { %v900_v1 = vadd.f32 %v899_v61, %v1920_v40  ;;  %v971_v0 = vmul.f32 %v649_v56, %v649_v56  ;;  %v1033_v37 = vadd.f32 %v1032_v63, %v970_v4 }
 0x15d   :  { %v652_v8 = vpop.f32.mrf.mxu0  ;;  %v1953_v11 = vpop.f32.mrf.mxu1 }
 0x15e   :  { %839 = vst [vmem:[%s2157_s2 + $0xb8] sm:$0xff] %v652_v8  ;;  %871 = vst [vmem:[%s2157_s2 + $0x1b8] sm:$0xff] %v1953_v11  ;;  %v901_v5 = vadd.f32 %v900_v1, %v649_v56  ;;  %v972_v12 = vmul.f32 %v652_v8, %v652_v8 }
 0x15f   :  { %v654_v9 = vpop.f32.mrf.mxu0  ;;  %v782_v16 = vpop.f32.mrf.mxu1 }
 0x160   :  { %v1034_v9 = vadd.f32 %v1033_v37, %v971_v0  ;;  %v902_v40 = vadd.f32 %v901_v5, %v652_v8 }
 0x161   :  { %v657_v28 = vpop.f32.mrf.mxu0  ;;  %v1968_v31 = vpop.f32.mrf.mxu1 }
 0x162   :  { %840 = vst [vmem:[%s2157_s2 + $0xc0] sm:$0xff] %v657_v28  ;;  %872 = vst [vmem:[%s2157_s2 + $0x1c0] sm:$0xff] %v1968_v31  ;;  %v973_v16 = vmul.f32 %v657_v28, %v657_v28  ;;  %v1035_v13 = vadd.f32 %v1034_v9, %v972_v12  ;;  %v903_v56 = vadd.f32 %v902_v40, %v657_v28 }
 0x163   :  { %v659_v20 = vpop.f32.mrf.mxu0  ;;  %v787_v36 = vpop.f32.mrf.mxu1 }
 0x164   :  { %v1036_v20 = vadd.f32 %v1035_v13, %v973_v16 }
 0x165   :  { %v660_v44 = vpop.f32.mrf.mxu0  ;;  %v1983_v25 = vpop.f32.mrf.mxu1 }
 0x166   :  { %841 = vst [vmem:[%s2157_s2 + $0xc8] sm:$0xff] %v660_v44  ;;  %873 = vst [vmem:[%s2157_s2 + $0x1c8] sm:$0xff] %v1983_v25  ;;  %v974_v32 = vmul.f32 %v660_v44, %v660_v44  ;;  %v904_v8 = vadd.f32 %v903_v56, %v660_v44 }
 0x167   :  { %v662_v52 = vpop.f32.mrf.mxu0  ;;  %v790_v51 = vpop.f32.mrf.mxu1 }
 0x168   :  { %v1037_v21 = vadd.f32 %v1036_v20, %v974_v32 }
 0x169   :  { %v665_v60 = vpop.f32.mrf.mxu0  ;;  %v1998_v33 = vpop.f32.mrf.mxu1 }
 0x16a   :  { %842 = vst [vmem:[%s2157_s2 + $0xd0] sm:$0xff] %v665_v60  ;;  %874 = vst [vmem:[%s2157_s2 + $0x1d0] sm:$0xff] %v1998_v33  ;;  %v975_v36 = vmul.f32 %v665_v60, %v665_v60  ;;  %v905_v28 = vadd.f32 %v904_v8, %v665_v60 }
 0x16b   :  { %v667_v24 = vpop.f32.mrf.mxu0  ;;  %v795_v3 = vpop.f32.mrf.mxu1 }
 0x16c   :  { %v1038_v52 = vadd.f32 %v1037_v21, %v975_v36  ;;  %v982_v36 = vmul.f32 %v1647_v22, %v1647_v22  ;;  %v983_v21 = vmul.f32 %v1659_v26, %v1659_v26 }
 0x16d   :  { %v668_v41 = vpop.f32.mrf.mxu0  ;;  %v2008_v15 = vpop.f32.mrf.mxu1 }
 0x16e   :  { %843 = vst [vmem:[%s2157_s2 + $0xd8] sm:$0xff] %v668_v41  ;;  %875 = vst [vmem:[%s2157_s2 + $0x1d8] sm:$0xff] %v2008_v15  ;;  %v976_v47 = vmul.f32 %v668_v41, %v668_v41  ;;  %v906_v44 = vadd.f32 %v905_v28, %v668_v41 }
 0x16f   :  { %v670_v19 = vpop.f32.mrf.mxu0  ;;  %v798_v45 = vpop.f32.mrf.mxu1 }
 0x170   :  { %v1039_v4 = vadd.f32 %v1038_v52, %v976_v47 }
 0x171   :  { %v673_v49 = vpop.f32.mrf.mxu0  ;;  %v2017_v35 = vpop.f32.mrf.mxu1 }
 0x172   :  { %844 = vst [vmem:[%s2157_s2 + $0xe0] sm:$0xff] %v673_v49  ;;  %876 = vst [vmem:[%s2157_s2 + $0x1e0] sm:$0xff] %v2017_v35  ;;  %v977_v51 = vmul.f32 %v673_v49, %v673_v49  ;;  %v907_v60 = vadd.f32 %v906_v44, %v673_v49  ;;  %v981_v49 = vmul.f32 %v1635_v18, %v1635_v18 }
 0x173   :  { %v675_v17 = vpop.f32.mrf.mxu0  ;;  %v803_v53 = vpop.f32.mrf.mxu1 }
 0x174   :  { %v1040_v24 = vadd.f32 %v1039_v4, %v977_v51 }
 0x175   :  { %v676_v57 = vpop.f32.mrf.mxu0  ;;  %v2026_v48 = vpop.f32.mrf.mxu1 }
 0x176   :  { %845 = vst [vmem:[%s2157_s2 + $0xe8] sm:$0xff] %v676_v57  ;;  %877 = vst [vmem:[%s2157_s2 + $0x1e8] sm:$0xff] %v2026_v48  ;;  %v978_v63 = vmul.f32 %v676_v57, %v676_v57  ;;  %v908_v3 = vadd.f32 %v907_v60, %v676_v57  ;;  %v984_v57 = vmul.f32 %v1671_v30, %v1671_v30 }
 0x177   :  { %v678_v29 = vpop.f32.mrf.mxu0  ;;  %v806_v61 = vpop.f32.mrf.mxu1 }
 0x178   :  { %v1041_v41 = vadd.f32 %v1040_v24, %v978_v63 }
 0x179   :  { %v681_v1 = vpop.f32.mrf.mxu0  ;;  %v2035_v0 = vpop.f32.mrf.mxu1 }
 0x17a   :  { %846 = vst [vmem:[%s2157_s2 + $0xf0] sm:$0xff] %v681_v1  ;;  %v979_v37 = vmul.f32 %v681_v1, %v681_v1  ;;  %878 = vst [vmem:[%s2157_s2 + $0x1f0] sm:$0xff] %v2035_v0  ;;  %v909_v9 = vadd.f32 %v908_v3, %v681_v1 }
 0x17b   :  { %v683_v5 = vpop.f32.mrf.mxu0  ;;  %v811_v12 = vpop.f32.mrf.mxu1 }
 0x17c   :  { %v1042_v19 = vadd.f32 %v1041_v41, %v979_v37 }
 0x17d   :  { %v684_v40 = vpop.f32.mrf.mxu0  ;;  %v2044_v16 = vpop.f32.mrf.mxu1 }
 0x17e   :  { %847 = vst [vmem:[%s2157_s2 + $0xf8] sm:$0xff] %v684_v40  ;;  %v910_v45 = vadd.f32 %v909_v9, %v684_v40  ;;  %v980_v13 = vmul.f32 %v684_v40, %v684_v40  ;;  %879 = vst [vmem:[%s2157_s2 + $0x1f8] sm:$0xff] %v2044_v16 }
 0x17f   :  { %v686_v56 = vpop.f32.mrf.mxu0  ;;  %v814_v32 = vpop.f32.mrf.mxu1 }
 0x180   :  { %v911_v20 = vadd.f32 %v910_v45, %v1635_v18  ;;  %v1043_v8 = vadd.f32 %v1042_v19, %v980_v13  ;;  %v985_v18 = vmul.f32 %v1683_v34, %v1683_v34 }
 0x182   :  { %v912_v17 = vadd.f32 %v911_v20, %v1647_v22  ;;  %v1044_v53 = vadd.f32 %v1043_v8, %v981_v49  ;;  %v986_v22 = vmul.f32 %v1695_v38, %v1695_v38 }
 0x184   :  { %v913_v28 = vadd.f32 %v912_v17, %v1659_v26  ;;  %v1045_v47 = vadd.f32 %v1044_v53, %v982_v36  ;;  %v987_v26 = vmul.f32 %v1707_v42, %v1707_v42 }
 0x186   :  { %v914_v52 = vadd.f32 %v913_v28, %v1671_v30  ;;  %v1046_v44 = vadd.f32 %v1045_v47, %v983_v21  ;;  %v988_v30 = vmul.f32 %v1719_v46, %v1719_v46  ;;  %v998_v21 = vmul.f32 %v1850_v39, %v1850_v39 }
 0x188   :  { %v915_v51 = vadd.f32 %v914_v52, %v1683_v34  ;;  %v1047_v29 = vadd.f32 %v1046_v44, %v984_v57  ;;  %v989_v34 = vmul.f32 %v1731_v50, %v1731_v50  ;;  %v999_v57 = vmul.f32 %v1868_v55, %v1868_v55 }
 0x189   :  { %v1000_v44 = vmul.f32 %v1886_v7, %v1886_v7 }
 0x18a   :  { %v916_v61 = vadd.f32 %v915_v51, %v1695_v38  ;;  %v1048_v4 = vadd.f32 %v1047_v29, %v985_v18  ;;  %v990_v38 = vmul.f32 %v1743_v54, %v1743_v54  ;;  %v1001_v51 = vmul.f32 %v1904_v27, %v1904_v27 }
 0x18c   :  { %v917_v60 = vadd.f32 %v916_v61, %v1707_v42  ;;  %v1049_v63 = vadd.f32 %v1048_v4, %v986_v22  ;;  %v991_v42 = vmul.f32 %v1755_v58, %v1755_v58  ;;  %v1002_v22 = vmul.f32 %v1922_v43, %v1922_v43 }
 0x18d   :  { %v1003_v4 = vmul.f32 %v1938_v59, %v1938_v59 }
 0x18e   :  { %v918_v1 = vadd.f32 %v917_v60, %v1719_v46  ;;  %v1050_v24 = vadd.f32 %v1049_v63, %v987_v26  ;;  %v992_v46 = vmul.f32 %v1767_v62, %v1767_v62  ;;  %v1004_v60 = vmul.f32 %v1953_v11, %v1953_v11 }
 0x190   :  { %v1051_v3 = vadd.f32 %v1050_v24, %v988_v30  ;;  %v919_v37 = vadd.f32 %v918_v1, %v1731_v50  ;;  %v993_v50 = vmul.f32 %v1779_v2, %v1779_v2  ;;  %v1005_v30 = vmul.f32 %v1968_v31, %v1968_v31 }
 0x191   :  { %v1006_v24 = vmul.f32 %v1983_v25, %v1983_v25 }
 0x192   :  { %v920_v5 = vadd.f32 %v919_v37, %v1743_v54  ;;  %v1052_v12 = vadd.f32 %v1051_v3, %v989_v34  ;;  %v994_v54 = vmul.f32 %v1791_v6, %v1791_v6  ;;  %v1007_v3 = vmul.f32 %v1998_v33, %v1998_v33 }
 0x194   :  { %v921_v41 = vadd.f32 %v920_v5, %v1755_v58  ;;  %v1053_v9 = vadd.f32 %v1052_v12, %v990_v38  ;;  %v995_v58 = vmul.f32 %v1803_v10, %v1803_v10  ;;  %v1008_v38 = vmul.f32 %v2008_v15, %v2008_v15 }
 0x195   :  { %v1009_v12 = vmul.f32 %v2017_v35, %v2017_v35 }
 0x196   :  { %v922_v40 = vadd.f32 %v921_v41, %v1767_v62  ;;  %v1054_v19 = vadd.f32 %v1053_v9, %v991_v42  ;;  %v996_v62 = vmul.f32 %v1815_v14, %v1815_v14  ;;  %v1010_v41 = vmul.f32 %v2026_v48, %v2026_v48 }
 0x198   :  { %v923_v45 = vadd.f32 %v922_v40, %v1779_v2  ;;  %v1055_v13 = vadd.f32 %v1054_v19, %v992_v46  ;;  %v997_v2 = vmul.f32 %v1829_v23, %v1829_v23  ;;  %v1011_v46 = vmul.f32 %v2035_v0, %v2035_v0 }
 0x199   :  { %v1012_v19 = vmul.f32 %v2044_v16, %v2044_v16 }
 0x19a   :  { %v924_v56 = vadd.f32 %v923_v45, %v1791_v6  ;;  %v1056_v32 = vadd.f32 %v1055_v13, %v993_v50 }
 0x19c   :  { %v925_v49 = vadd.f32 %v924_v56, %v1803_v10  ;;  %v1057_v20 = vadd.f32 %v1056_v32, %v994_v54 }
 0x19e   :  { %v926_v8 = vadd.f32 %v925_v49, %v1815_v14  ;;  %v1058_v36 = vadd.f32 %v1057_v20, %v995_v58 }
 0x1a0   :  { %v927_v17 = vadd.f32 %v926_v8, %v1829_v23  ;;  %v1059_v53 = vadd.f32 %v1058_v36, %v996_v62 }
 0x1a2   :  { %v928_v6 = vadd.f32 %v927_v17, %v1850_v39  ;;  %v1060_v28 = vadd.f32 %v1059_v53, %v997_v2 }
 0x1a4   :  { %v1061_v10 = vadd.f32 %v1060_v28, %v998_v21  ;;  %v929_v47 = vadd.f32 %v928_v6, %v1868_v55 }
 0x1a6   :  { %v1062_v14 = vadd.f32 %v1061_v10, %v999_v57  ;;  %v930_v52 = vadd.f32 %v929_v47, %v1886_v7 }
 0x1a8   :  { %v1063_v23 = vadd.f32 %v1062_v14, %v1000_v44  ;;  %v931_v18 = vadd.f32 %v930_v52, %v1904_v27 }
 0x1aa   :  { %v1064_v39 = vadd.f32 %v1063_v23, %v1001_v51  ;;  %v932_v29 = vadd.f32 %v931_v18, %v1922_v43 }
 0x1ac   :  { %v1065_v61 = vadd.f32 %v1064_v39, %v1002_v22  ;;  %v933_v55 = vadd.f32 %v932_v29, %v1938_v59 }
 0x1ae   :  { %v1066_v26 = vadd.f32 %v1065_v61, %v1003_v4  ;;  %v934_v7 = vadd.f32 %v933_v55, %v1953_v11 }
 0x1b0   :  { %v1067_v63 = vadd.f32 %v1066_v26, %v1004_v60  ;;  %v935_v27 = vadd.f32 %v934_v7, %v1968_v31 }
 0x1b2   :  { %v1068_v1 = vadd.f32 %v1067_v63, %v1005_v30  ;;  %v936_v43 = vadd.f32 %v935_v27, %v1983_v25 }
 0x1b4   :  { %v1069_v34 = vadd.f32 %v1068_v1, %v1006_v24  ;;  %v937_v59 = vadd.f32 %v936_v43, %v1998_v33 }
 0x1b6   :  { %v1070_v37 = vadd.f32 %v1069_v34, %v1007_v3  ;;  %v938_v11 = vadd.f32 %v937_v59, %v2008_v15 }
 0x1b8   :  { %v1071_v5 = vadd.f32 %v1070_v37, %v1008_v38  ;;  %v939_v31 = vadd.f32 %v938_v11, %v2017_v35 }
 0x1ba   :  { %v1072_v42 = vadd.f32 %v1071_v5, %v1009_v12  ;;  %v940_v25 = vadd.f32 %v939_v31, %v2026_v48 }
 0x1bc   :  { %v1073_v9 = vadd.f32 %v1072_v42, %v1010_v41  ;;  %v941_v33 = vadd.f32 %v940_v25, %v2035_v0 }
 0x1be   :  { %v1074_v40 = vadd.f32 %v1073_v9, %v1011_v46  ;;  %v942_v15 = vadd.f32 %v941_v33, %v2044_v16 }
 0x1c0   :  { %v943_v50 = vrot.slane %v942_v15, 4  ;;  %v1075_v35 = vadd.f32 %v1074_v40, %v1012_v19 }
 0x1c2   :  { %v944_v45 = vadd.f32 %v943_v50, %v942_v15  ;;  %v1076_v13 = vrot.slane %v1075_v35, 4 }
 0x1c4   :  { %v945_v54 = vrot.slane %v944_v45, 2  ;;  %v1077_v56 = vadd.f32 %v1076_v13, %v1075_v35 }
 0x1c6   :  { %v946_v32 = vadd.f32 %v945_v54, %v944_v45  ;;  %v1078_v48 = vrot.slane %v1077_v56, 2 }
 0x1c8   :  { %v947_v58 = vrot.slane %v946_v32, 1  ;;  %v1079_v49 = vadd.f32 %v1078_v48, %v1077_v56 }
 0x1ca   :  { %v948_v20 = vadd.f32 %v947_v58, %v946_v32  ;;  %v1080_v62 = vrot.slane %v1079_v49, 1 }
 0x1cc   :  { %v1081_v8 = vadd.f32 %v1080_v62, %v1079_v49  ;;  %1086 = vst [vmem:[%s2158_s3] sm:$0x1] %v948_v20 }
 0x1ce   :  { %1087 = vst [vmem:[%s2159_s4] sm:$0x1] %v1081_v8 }

// kernel: discriminator_forward.9
= control target key start
LH: loop header
LB: loop body
LE: loop exit
PB: predicated region body
PF: predicated region fallthrough
CT: control target
= control target key end

     0   :  { %v98_v7 = vlaneseq  ;;  %s1536_s1 = inlined_call_operand.vmem [shape: f32[1,128], index: 1, kind: input, shape index: {}]   ;;  %s1537_s2 = inlined_call_operand.vmem [shape: f32[1,128], index: 2, kind: input, shape index: {}]   ;;  %s1538_s3 = inlined_call_operand.vmem [shape: f32[1,128], index: 3, kind: input, shape index: {}]   ;;  %s1539_s0 = inlined_call_operand.vmem [shape: f32[512,128], index: 0, kind: input, shape index: {}]   ;;  %s1540_s4 = inlined_call_operand.vmem [shape: f32[1,128], index: 4, kind: input, shape index: {}]   ;;  %s1541_s5 = inlined_call_operand.vmem [shape: bf16[512,128], index: 5, kind: output, shape index: {}]  }
   0x1   :  { %v20_v0 = vld [vmem:[%s1536_s1] sm:$0x1]  ;;  %v34_v15 = vld [vmem:[%s1539_s0 + $0x8] sm:$0xff]  ;;  %v35_v16 = vld [vmem:[%s1539_s0 + $0x10] sm:$0xff] }
   0x2   :  { %v22_v1 = vld [vmem:[%s1537_s2] sm:$0x1]  ;;  %v21_v2 = vmul.f32 0.001953125, %v20_v0  ;;  %v99_v8 = vshrl.u32 %v98_v7, 7  ;;  %v36_v17 = vld [vmem:[%s1539_s0 + $0x18] sm:$0xff]  ;;  %v38_v21 = vld [vmem:[%s1539_s0 + $0x28] sm:$0xff] }
   0x3   :  { %v23_v3 = vmul.f32 0.001953125, %v22_v1  ;;  %v26_v9 = vld [vmem:[%s1538_s3] sm:$0x1]  ;;  %v39_v22 = vld [vmem:[%s1539_s0 + $0x30] sm:$0xff]  ;;  %v40_v23 = vld [vmem:[%s1539_s0 + $0x38] sm:$0xff] }
   0x4   :  { %v24_v4 = vmul.f32 %v21_v2, %v21_v2  ;;  %v100_v10 = vsub.s32 0, %v99_v8  ;;  %v30_v13 = vld [vmem:[%s1540_s4] sm:$0x1]  ;;  %v42_v25 = vld [vmem:[%s1539_s0 + $0x48] sm:$0xff]  ;;  %v43_v26 = vld [vmem:[%s1539_s0 + $0x50] sm:$0xff] }
   0x5   :  { %v33_v14 = vld [vmem:[%s1539_s0] sm:$0xff]  ;;  %v44_v31 = vld [vmem:[%s1539_s0 + $0x58] sm:$0xff]  ;;  %v46_v33 = vld [vmem:[%s1539_s0 + $0x68] sm:$0xff] }
   0x6   :  { %v25_v5 = vsub.f32 %v23_v3, %v24_v4  ;;  %v37_v18 = vld [vmem:[%s1539_s0 + $0x20] sm:$0xff] }
   0x7   :  { %v41_v24 = vld [vmem:[%s1539_s0 + $0x40] sm:$0xff] }
   0x8   :  { %v27_v6 = vadd.f32 1e-05, %v25_v5  ;;  %v45_v32 = vld [vmem:[%s1539_s0 + $0x60] sm:$0xff] }
   0xa   :  { %1072 = vrsqrt.f32 %v27_v6 }
  0x17   :  { %v1073_v11 = vpop.eup %1072 }
  0x18   :  { %v29_v12 = vmul.f32 %v1073_v11, %v26_v9 }
  0x1a   :  { %v31_v19 = vmul.f32 %v29_v12, %v21_v2  ;;  %v1131_v20 = vrot.slane %v29_v12, %v100_v10 }
  0x1c   :  { %v32_v27 = vsub.f32 %v30_v13, %v31_v19  ;;  %v103_v28 = vmul.f32 %v1131_v20, %v33_v14  ;;  %v104_v29 = vmul.f32 %v1131_v20, %v34_v15  ;;  %v105_v30 = vmul.f32 %v1131_v20, %v35_v16  ;;  %v47_v16 = vld [vmem:[%s1539_s0 + $0x70] sm:$0xff] }
  0x1d   :  { %v106_v34 = vmul.f32 %v1131_v20, %v36_v17  ;;  %v107_v35 = vmul.f32 %v1131_v20, %v37_v18  ;;  %v108_v36 = vmul.f32 %v1131_v20, %v38_v21  ;;  %v109_v37 = vmul.f32 %v1131_v20, %v39_v22 }
  0x1e   :  { %v1167_v38 = vrot.slane %v32_v27, %v100_v10  ;;  %v110_v39 = vmul.f32 %v1131_v20, %v40_v23  ;;  %v111_v40 = vmul.f32 %v1131_v20, %v41_v24  ;;  %v112_v41 = vmul.f32 %v1131_v20, %v42_v25  ;;  %v48_v24 = vld [vmem:[%s1539_s0 + $0x78] sm:$0xff]  ;;  %v49_v25 = vld [vmem:[%s1539_s0 + $0x80] sm:$0xff] }
  0x1f   :  { %v113_v42 = vmul.f32 %v1131_v20, %v43_v26  ;;  %v114_v43 = vmul.f32 %v1131_v20, %v44_v31  ;;  %v115_v44 = vmul.f32 %v1131_v20, %v45_v32  ;;  %v116_v45 = vmul.f32 %v1131_v20, %v46_v33  ;;  %v51_v31 = vld [vmem:[%s1539_s0 + $0x90] sm:$0xff]  ;;  %v52_v32 = vld [vmem:[%s1539_s0 + $0x98] sm:$0xff] }
  0x20   :  { %v173_v46 = vadd.f32 %v1167_v38, %v103_v28  ;;  %v174_v47 = vadd.f32 %v1167_v38, %v104_v29  ;;  %v175_v48 = vadd.f32 %v1167_v38, %v105_v30  ;;  %v176_v49 = vadd.f32 %v1167_v38, %v106_v34  ;;  %v50_v30 = vld [vmem:[%s1539_s0 + $0x88] sm:$0xff] }
  0x21   :  { %v177_v50 = vadd.f32 %v1167_v38, %v107_v35  ;;  %v178_v51 = vadd.f32 %v1167_v38, %v108_v36  ;;  %v179_v52 = vadd.f32 %v1167_v38, %v109_v37  ;;  %v180_v53 = vadd.f32 %v1167_v38, %v110_v39 }
  0x22   :  { %vm237_vm0 = vcmp.ge.f32.partialorder %v173_v46, 0.0  ;;  %vm238_vm1 = vcmp.ge.f32.partialorder %v174_v47, 0.0  ;;  %v301_v54 = vmul.f32 0.2, %v173_v46  ;;  %v302_v55 = vmul.f32 0.2, %v174_v47 }
  0x23   :  { %vm239_vm2 = vcmp.ge.f32.partialorder %v175_v48, 0.0  ;;  %vm240_vm3 = vcmp.ge.f32.partialorder %v176_v49, 0.0  ;;  %v303_v56 = vmul.f32 0.2, %v175_v48  ;;  %v304_v57 = vmul.f32 0.2, %v176_v49 }
  0x24   :  { %v365_v58 = vsel %vm237_vm0, %v173_v46, %v301_v54  ;;  %v366_v59 = vsel %vm238_vm1, %v174_v47, %v302_v55  ;;  %vm241_vm4 = vcmp.ge.f32.partialorder %v177_v50, 0.0  ;;  %vm242_vm5 = vcmp.ge.f32.partialorder %v178_v51, 0.0  ;;  %v53_v54 = vld [vmem:[%s1539_s0 + $0xa0] sm:$0xff]  ;;  %v54_v55 = vld [vmem:[%s1539_s0 + $0xa8] sm:$0xff] }
  0x25   :  { %v884_v60 = vpack.c.bf16 %v366_v59, %v365_v58  ;;  %v367_v61 = vsel %vm239_vm2, %v175_v48, %v303_v56  ;;  %v368_v62 = vsel %vm240_vm3, %v176_v49, %v304_v57  ;;  %v305_v63 = vmul.f32 0.2, %v177_v50  ;;  %v55_v56 = vld [vmem:[%s1539_s0 + $0xb0] sm:$0xff] }
  0x26   :  { %v889_v0 = vpack.c.bf16 %v368_v62, %v367_v61  ;;  %v306_v1 = vmul.f32 0.2, %v178_v51  ;;  %vm243_vm6 = vcmp.ge.f32.partialorder %v179_v52, 0.0  ;;  %vm244_vm7 = vcmp.ge.f32.partialorder %v180_v53, 0.0  ;;  %v56_v61 = vld [vmem:[%s1539_s0 + $0xb8] sm:$0xff]  ;;  %v57_v62 = vld [vmem:[%s1539_s0 + $0xc0] sm:$0xff] }
  0x27   :  { %885 = vst [vmem:[%s1541_s5] sm:$0xff] %v884_v60   ;;  %v369_v2 = vsel %vm241_vm4, %v177_v50, %v305_v63  ;;  %v307_v3 = vmul.f32 0.2, %v179_v52  ;;  %v308_v4 = vmul.f32 0.2, %v180_v53  ;;  %v181_v5 = vadd.f32 %v1167_v38, %v111_v40 }
  0x28   :  { %1041 = vst [vmem:[%s1541_s5 + $0x8] sm:$0xff] %v889_v0   ;;  %v370_v6 = vsel %vm242_vm5, %v178_v51, %v306_v1  ;;  %v182_v7 = vadd.f32 %v1167_v38, %v112_v41  ;;  %v183_v8 = vadd.f32 %v1167_v38, %v113_v42  ;;  %v184_v9 = vadd.f32 %v1167_v38, %v114_v43 }
  0x29   :  { %v894_v10 = vpack.c.bf16 %v370_v6, %v369_v2  ;;  %v371_v11 = vsel %vm243_vm6, %v179_v52, %v307_v3  ;;  %v372_v12 = vsel %vm244_vm7, %v180_v53, %v308_v4  ;;  %vm245_vm8 = vcmp.ge.f32.partialorder %v181_v5, 0.0  ;;  %v58_v3 = vld [vmem:[%s1539_s0 + $0xc8] sm:$0xff] }
  0x2a   :  { %v899_v13 = vpack.c.bf16 %v372_v12, %v371_v11  ;;  %vm246_vm9 = vcmp.ge.f32.partialorder %v182_v7, 0.0  ;;  %v309_v14 = vmul.f32 0.2, %v181_v5  ;;  %v310_v15 = vmul.f32 0.2, %v182_v7 }
  0x2b   :  { %1042 = vst [vmem:[%s1541_s5 + $0x10] sm:$0xff] %v894_v10   ;;  %vm247_vm10 = vcmp.ge.f32.partialorder %v183_v8, 0.0  ;;  %vm248_vm11 = vcmp.ge.f32.partialorder %v184_v9, 0.0  ;;  %v311_v17 = vmul.f32 0.2, %v183_v8  ;;  %v185_v22 = vadd.f32 %v1167_v38, %v115_v44 }
  0x2c   :  { %v312_v18 = vmul.f32 0.2, %v184_v9  ;;  %1043 = vst [vmem:[%s1541_s5 + $0x18] sm:$0xff] %v899_v13   ;;  %v373_v19 = vsel %vm245_vm8, %v181_v5, %v309_v14  ;;  %v374_v21 = vsel %vm246_vm9, %v182_v7, %v310_v15  ;;  %v186_v23 = vadd.f32 %v1167_v38, %v116_v45 }
  0x2d   :  { %v904_v26 = vpack.c.bf16 %v374_v21, %v373_v19  ;;  %v375_v27 = vsel %vm247_vm10, %v183_v8, %v311_v17  ;;  %v117_v29 = vmul.f32 %v1131_v20, %v47_v16  ;;  %vm249_vm12 = vcmp.ge.f32.partialorder %v185_v22, 0.0  ;;  %v59_v8 = vld [vmem:[%s1539_s0 + $0xd0] sm:$0xff]  ;;  %v60_v21 = vld [vmem:[%s1539_s0 + $0xd8] sm:$0xff] }
  0x2e   :  { %v376_v28 = vsel %vm248_vm11, %v184_v9, %v312_v18  ;;  %vm250_vm13 = vcmp.ge.f32.partialorder %v186_v23, 0.0  ;;  %v313_v34 = vmul.f32 0.2, %v185_v22  ;;  %v314_v35 = vmul.f32 0.2, %v186_v23 }
  0x2f   :  { %v909_v33 = vpack.c.bf16 %v376_v28, %v375_v27  ;;  %1044 = vst [vmem:[%s1541_s5 + $0x20] sm:$0xff] %v904_v26   ;;  %v118_v36 = vmul.f32 %v1131_v20, %v48_v24  ;;  %v187_v37 = vadd.f32 %v1167_v38, %v117_v29  ;;  %v119_v39 = vmul.f32 %v1131_v20, %v49_v25 }
  0x30   :  { %v377_v40 = vsel %vm249_vm12, %v185_v22, %v313_v34  ;;  %v120_v41 = vmul.f32 %v1131_v20, %v50_v30  ;;  %v121_v42 = vmul.f32 %v1131_v20, %v51_v31  ;;  %v122_v43 = vmul.f32 %v1131_v20, %v52_v32  ;;  %v61_v30 = vld [vmem:[%s1539_s0 + $0xe0] sm:$0xff]  ;;  %v62_v31 = vld [vmem:[%s1539_s0 + $0xe8] sm:$0xff] }
  0x31   :  { %1045 = vst [vmem:[%s1541_s5 + $0x28] sm:$0xff] %v909_v33   ;;  %v378_v44 = vsel %vm250_vm13, %v186_v23, %v314_v35  ;;  %v188_v45 = vadd.f32 %v1167_v38, %v118_v36  ;;  %vm251_vm14 = vcmp.ge.f32.partialorder %v187_v37, 0.0  ;;  %v315_v46 = vmul.f32 0.2, %v187_v37  ;;  %v63_v36 = vld [vmem:[%s1539_s0 + $0xf0] sm:$0xff] }
  0x32   :  { %v914_v47 = vpack.c.bf16 %v378_v44, %v377_v40  ;;  %v189_v48 = vadd.f32 %v1167_v38, %v119_v39  ;;  %v190_v49 = vadd.f32 %v1167_v38, %v120_v41  ;;  %v191_v50 = vadd.f32 %v1167_v38, %v121_v42 }
  0x33   :  { %vm252_vm15 = vcmp.ge.f32.partialorder %v188_v45, 0.0  ;;  %v316_v51 = vmul.f32 0.2, %v188_v45  ;;  %v379_v52 = vsel %vm251_vm14, %v187_v37, %v315_v46  ;;  %v192_v53 = vadd.f32 %v1167_v38, %v122_v43  ;;  %v64_v37 = vld [vmem:[%s1539_s0 + $0xf8] sm:$0xff] }
  0x34   :  { %1046 = vst [vmem:[%s1541_s5 + $0x30] sm:$0xff] %v914_v47   ;;  %vm253_vm0 = vcmp.ge.f32.partialorder %v189_v48, 0.0  ;;  %vm254_vm1 = vcmp.ge.f32.partialorder %v190_v49, 0.0  ;;  %v317_v57 = vmul.f32 0.2, %v189_v48  ;;  %vm255_vm2 = vcmp.ge.f32.partialorder %v191_v50, 0.0 }
  0x35   :  { %v318_v58 = vmul.f32 0.2, %v190_v49  ;;  %v380_v59 = vsel %vm252_vm15, %v188_v45, %v316_v51  ;;  %vm256_vm3 = vcmp.ge.f32.partialorder %v192_v53, 0.0  ;;  %v319_v60 = vmul.f32 0.2, %v191_v50 }
  0x36   :  { %v919_v63 = vpack.c.bf16 %v380_v59, %v379_v52  ;;  %v381_v0 = vsel %vm253_vm0, %v189_v48, %v317_v57  ;;  %v320_v2 = vmul.f32 0.2, %v192_v53  ;;  %v123_v6 = vmul.f32 %v1131_v20, %v53_v54  ;;  %v65_v59 = vld [vmem:[%s1539_s0 + $0x100] sm:$0xff] }
  0x37   :  { %v382_v1 = vsel %vm254_vm1, %v190_v49, %v318_v58  ;;  %v383_v5 = vsel %vm255_vm2, %v191_v50, %v319_v60  ;;  %v124_v7 = vmul.f32 %v1131_v20, %v54_v55  ;;  %v125_v10 = vmul.f32 %v1131_v20, %v55_v56  ;;  %v66_v60 = vld [vmem:[%s1539_s0 + $0x108] sm:$0xff] }
  0x38   :  { %v924_v4 = vpack.c.bf16 %v382_v1, %v381_v0  ;;  %1047 = vst [vmem:[%s1541_s5 + $0x38] sm:$0xff] %v919_v63   ;;  %v384_v9 = vsel %vm256_vm3, %v192_v53, %v320_v2  ;;  %v126_v11 = vmul.f32 %v1131_v20, %v56_v61  ;;  %v127_v12 = vmul.f32 %v1131_v20, %v57_v62  ;;  %v67_v63 = vld [vmem:[%s1539_s0 + $0x110] sm:$0xff]  ;;  %v68_v0 = vld [vmem:[%s1539_s0 + $0x118] sm:$0xff] }
  0x39   :  { %v929_v13 = vpack.c.bf16 %v384_v9, %v383_v5  ;;  %v193_v14 = vadd.f32 %v1167_v38, %v123_v6  ;;  %v194_v15 = vadd.f32 %v1167_v38, %v124_v7  ;;  %v128_v16 = vmul.f32 %v1131_v20, %v58_v3  ;;  %v70_v9 = vld [vmem:[%s1539_s0 + $0x128] sm:$0xff] }
  0x3a   :  { %1048 = vst [vmem:[%s1541_s5 + $0x40] sm:$0xff] %v924_v4   ;;  %v195_v17 = vadd.f32 %v1167_v38, %v125_v10  ;;  %v196_v18 = vadd.f32 %v1167_v38, %v126_v11  ;;  %v197_v19 = vadd.f32 %v1167_v38, %v127_v12  ;;  %v129_v22 = vmul.f32 %v1131_v20, %v59_v8  ;;  %v69_v4 = vld [vmem:[%s1539_s0 + $0x120] sm:$0xff] }
  0x3b   :  { %1049 = vst [vmem:[%s1541_s5 + $0x48] sm:$0xff] %v929_v13   ;;  %vm257_vm4 = vcmp.ge.f32.partialorder %v193_v14, 0.0  ;;  %vm258_vm5 = vcmp.ge.f32.partialorder %v194_v15, 0.0  ;;  %v321_v23 = vmul.f32 0.2, %v193_v14  ;;  %v198_v29 = vadd.f32 %v1167_v38, %v128_v16 }
  0x3c   :  { %v322_v24 = vmul.f32 0.2, %v194_v15  ;;  %vm259_vm6 = vcmp.ge.f32.partialorder %v195_v17, 0.0  ;;  %vm260_vm7 = vcmp.ge.f32.partialorder %v196_v18, 0.0  ;;  %v323_v25 = vmul.f32 0.2, %v195_v17 }
  0x3d   :  { %v324_v26 = vmul.f32 0.2, %v196_v18  ;;  %v385_v27 = vsel %vm257_vm4, %v193_v14, %v321_v23  ;;  %vm261_vm8 = vcmp.ge.f32.partialorder %v197_v19, 0.0  ;;  %v325_v35 = vmul.f32 0.2, %v197_v19  ;;  %v71_v23 = vld [vmem:[%s1539_s0 + $0x130] sm:$0xff] }
  0x3e   :  { %v386_v28 = vsel %vm258_vm5, %v194_v15, %v322_v24  ;;  %v387_v33 = vsel %vm259_vm6, %v195_v17, %v323_v25  ;;  %vm262_vm9 = vcmp.ge.f32.partialorder %v198_v29, 0.0  ;;  %v326_v40 = vmul.f32 0.2, %v198_v29 }
  0x3f   :  { %v934_v32 = vpack.c.bf16 %v386_v28, %v385_v27  ;;  %v388_v34 = vsel %vm260_vm7, %v196_v18, %v324_v26  ;;  %v130_v41 = vmul.f32 %v1131_v20, %v60_v21  ;;  %v389_v42 = vsel %vm261_vm8, %v197_v19, %v325_v35 }
  0x40   :  { %v939_v39 = vpack.c.bf16 %v388_v34, %v387_v33  ;;  %v199_v43 = vadd.f32 %v1167_v38, %v129_v22  ;;  %v131_v44 = vmul.f32 %v1131_v20, %v61_v30  ;;  %v132_v45 = vmul.f32 %v1131_v20, %v62_v31  ;;  %v73_v33 = vld [vmem:[%s1539_s0 + $0x140] sm:$0xff] }
  0x41   :  { %1050 = vst [vmem:[%s1541_s5 + $0x50] sm:$0xff] %v934_v32   ;;  %v390_v46 = vsel %vm262_vm9, %v198_v29, %v326_v40  ;;  %v200_v47 = vadd.f32 %v1167_v38, %v130_v41  ;;  %v133_v48 = vmul.f32 %v1131_v20, %v63_v36  ;;  %v134_v49 = vmul.f32 %v1131_v20, %v64_v37  ;;  %v72_v32 = vld [vmem:[%s1539_s0 + $0x138] sm:$0xff]  ;;  %v75_v40 = vld [vmem:[%s1539_s0 + $0x150] sm:$0xff] }
  0x42   :  { %1051 = vst [vmem:[%s1541_s5 + $0x58] sm:$0xff] %v939_v39   ;;  %v944_v50 = vpack.c.bf16 %v390_v46, %v389_v42  ;;  %vm263_vm10 = vcmp.ge.f32.partialorder %v199_v43, 0.0  ;;  %v327_v51 = vmul.f32 0.2, %v199_v43  ;;  %v201_v52 = vadd.f32 %v1167_v38, %v131_v44  ;;  %v74_v39 = vld [vmem:[%s1539_s0 + $0x148] sm:$0xff]  ;;  %v76_v41 = vld [vmem:[%s1539_s0 + $0x158] sm:$0xff] }
  0x43   :  { %vm264_vm11 = vcmp.ge.f32.partialorder %v200_v47, 0.0  ;;  %v328_v53 = vmul.f32 0.2, %v200_v47  ;;  %v202_v54 = vadd.f32 %v1167_v38, %v132_v45  ;;  %v203_v55 = vadd.f32 %v1167_v38, %v133_v48 }
  0x44   :  { %1052 = vst [vmem:[%s1541_s5 + $0x60] sm:$0xff] %v944_v50   ;;  %v391_v56 = vsel %vm263_vm10, %v199_v43, %v327_v51  ;;  %vm265_vm12 = vcmp.ge.f32.partialorder %v201_v52, 0.0  ;;  %v329_v57 = vmul.f32 0.2, %v201_v52  ;;  %v204_v58 = vadd.f32 %v1167_v38, %v134_v49 }
  0x45   :  { %v392_v61 = vsel %vm264_vm11, %v200_v47, %v328_v53  ;;  %vm266_vm13 = vcmp.ge.f32.partialorder %v202_v54, 0.0  ;;  %v330_v62 = vmul.f32 0.2, %v202_v54  ;;  %vm267_vm14 = vcmp.ge.f32.partialorder %v203_v55, 0.0 }
  0x46   :  { %v949_v1 = vpack.c.bf16 %v392_v61, %v391_v56  ;;  %v393_v2 = vsel %vm265_vm12, %v201_v52, %v329_v57  ;;  %vm268_vm15 = vcmp.ge.f32.partialorder %v204_v58, 0.0  ;;  %v331_v3 = vmul.f32 0.2, %v203_v55 }
  0x47   :  { %v394_v5 = vsel %vm266_vm13, %v202_v54, %v330_v62  ;;  %v332_v6 = vmul.f32 0.2, %v204_v58  ;;  %v135_v7 = vmul.f32 %v1131_v20, %v65_v59  ;;  %v136_v8 = vmul.f32 %v1131_v20, %v66_v60  ;;  %v77_v62 = vld [vmem:[%s1539_s0 + $0x160] sm:$0xff] }
  0x48   :  { %1053 = vst [vmem:[%s1541_s5 + $0x68] sm:$0xff] %v949_v1   ;;  %v954_v10 = vpack.c.bf16 %v394_v5, %v393_v2  ;;  %v395_v11 = vsel %vm267_vm14, %v203_v55, %v331_v3  ;;  %v137_v12 = vmul.f32 %v1131_v20, %v67_v63  ;;  %v138_v13 = vmul.f32 %v1131_v20, %v68_v0  ;;  %v78_v63 = vld [vmem:[%s1539_s0 + $0x168] sm:$0xff]  ;;  %v79_v0 = vld [vmem:[%s1539_s0 + $0x170] sm:$0xff]  ;;  %v80_v5 = vld [vmem:[%s1539_s0 + $0x178] sm:$0xff] }
  0x49   :  { %v396_v14 = vsel %vm268_vm15, %v204_v58, %v332_v6  ;;  %v205_v15 = vadd.f32 %v1167_v38, %v135_v7  ;;  %v206_v16 = vadd.f32 %v1167_v38, %v136_v8  ;;  %v139_v17 = vmul.f32 %v1131_v20, %v69_v4  ;;  %v81_v6 = vld [vmem:[%s1539_s0 + $0x180] sm:$0xff] }
  0x4a   :  { %1054 = vst [vmem:[%s1541_s5 + $0x70] sm:$0xff] %v954_v10   ;;  %v959_v18 = vpack.c.bf16 %v396_v14, %v395_v11  ;;  %v207_v19 = vadd.f32 %v1167_v38, %v137_v12  ;;  %v208_v21 = vadd.f32 %v1167_v38, %v138_v13  ;;  %v140_v22 = vmul.f32 %v1131_v20, %v70_v9  ;;  %v82_v11 = vld [vmem:[%s1539_s0 + $0x188] sm:$0xff] }
  0x4b   :  { %vm269_vm0 = vcmp.ge.f32.partialorder %v205_v15, 0.0  ;;  %vm270_vm1 = vcmp.ge.f32.partialorder %v206_v16, 0.0  ;;  %v333_v24 = vmul.f32 0.2, %v205_v15  ;;  %v334_v25 = vmul.f32 0.2, %v206_v16 }
  0x4c   :  { %1055 = vst [vmem:[%s1541_s5 + $0x78] sm:$0xff] %v959_v18   ;;  %vm271_vm2 = vcmp.ge.f32.partialorder %v207_v19, 0.0  ;;  %vm272_vm3 = vcmp.ge.f32.partialorder %v208_v21, 0.0  ;;  %v335_v26 = vmul.f32 0.2, %v207_v19  ;;  %v209_v30 = vadd.f32 %v1167_v38, %v139_v17 }
  0x4d   :  { %v336_v27 = vmul.f32 0.2, %v208_v21  ;;  %v397_v28 = vsel %vm269_vm0, %v205_v15, %v333_v24  ;;  %v398_v29 = vsel %vm270_vm1, %v206_v16, %v334_v25  ;;  %v210_v31 = vadd.f32 %v1167_v38, %v140_v22  ;;  %v83_v16 = vld [vmem:[%s1539_s0 + $0x190] sm:$0xff] }
  0x4e   :  { %v964_v34 = vpack.c.bf16 %v398_v29, %v397_v28  ;;  %v399_v35 = vsel %vm271_vm2, %v207_v19, %v335_v26  ;;  %v141_v37 = vmul.f32 %v1131_v20, %v71_v23  ;;  %vm273_vm4 = vcmp.ge.f32.partialorder %v209_v30, 0.0  ;;  %v84_v29 = vld [vmem:[%s1539_s0 + $0x198] sm:$0xff] }
  0x4f   :  { %v400_v36 = vsel %vm272_vm3, %v208_v21, %v336_v27  ;;  %vm274_vm5 = vcmp.ge.f32.partialorder %v210_v31, 0.0  ;;  %v337_v43 = vmul.f32 0.2, %v209_v30  ;;  %v338_v44 = vmul.f32 0.2, %v210_v31 }
  0x50   :  { %v969_v42 = vpack.c.bf16 %v400_v36, %v399_v35  ;;  %1056 = vst [vmem:[%s1541_s5 + $0x80] sm:$0xff] %v964_v34   ;;  %v142_v45 = vmul.f32 %v1131_v20, %v72_v32  ;;  %v211_v46 = vadd.f32 %v1167_v38, %v141_v37  ;;  %v143_v47 = vmul.f32 %v1131_v20, %v73_v33 }
  0x51   :  { %v401_v48 = vsel %vm273_vm4, %v209_v30, %v337_v43  ;;  %v144_v49 = vmul.f32 %v1131_v20, %v74_v39  ;;  %v145_v50 = vmul.f32 %v1131_v20, %v75_v40  ;;  %v146_v51 = vmul.f32 %v1131_v20, %v76_v41  ;;  %v85_v39 = vld [vmem:[%s1539_s0 + $0x1a0] sm:$0xff]  ;;  %v86_v40 = vld [vmem:[%s1539_s0 + $0x1a8] sm:$0xff] }
  0x52   :  { %1057 = vst [vmem:[%s1541_s5 + $0x88] sm:$0xff] %v969_v42   ;;  %v402_v52 = vsel %vm274_vm5, %v210_v31, %v338_v44  ;;  %v212_v53 = vadd.f32 %v1167_v38, %v142_v45  ;;  %vm275_vm6 = vcmp.ge.f32.partialorder %v211_v46, 0.0  ;;  %v339_v54 = vmul.f32 0.2, %v211_v46  ;;  %v87_v45 = vld [vmem:[%s1539_s0 + $0x1b0] sm:$0xff] }
  0x53   :  { %v974_v55 = vpack.c.bf16 %v402_v52, %v401_v48  ;;  %v213_v56 = vadd.f32 %v1167_v38, %v143_v47  ;;  %v214_v57 = vadd.f32 %v1167_v38, %v144_v49  ;;  %v215_v58 = vadd.f32 %v1167_v38, %v145_v50 }
  0x54   :  { %vm276_vm7 = vcmp.ge.f32.partialorder %v212_v53, 0.0  ;;  %v340_v59 = vmul.f32 0.2, %v212_v53  ;;  %v403_v60 = vsel %vm275_vm6, %v211_v46, %v339_v54  ;;  %v216_v61 = vadd.f32 %v1167_v38, %v146_v51  ;;  %v88_v46 = vld [vmem:[%s1539_s0 + $0x1b8] sm:$0xff] }
  0x55   :  { %1058 = vst [vmem:[%s1541_s5 + $0x90] sm:$0xff] %v974_v55   ;;  %vm277_vm8 = vcmp.ge.f32.partialorder %v213_v56, 0.0  ;;  %vm278_vm9 = vcmp.ge.f32.partialorder %v214_v57, 0.0  ;;  %v341_v1 = vmul.f32 0.2, %v213_v56  ;;  %vm279_vm10 = vcmp.ge.f32.partialorder %v215_v58, 0.0 }
  0x56   :  { %v342_v2 = vmul.f32 0.2, %v214_v57  ;;  %v404_v3 = vsel %vm276_vm7, %v212_v53, %v340_v59  ;;  %vm280_vm11 = vcmp.ge.f32.partialorder %v216_v61, 0.0  ;;  %v343_v4 = vmul.f32 0.2, %v215_v58 }
  0x57   :  { %v979_v7 = vpack.c.bf16 %v404_v3, %v403_v60  ;;  %v405_v8 = vsel %vm277_vm8, %v213_v56, %v341_v1  ;;  %v344_v10 = vmul.f32 0.2, %v216_v61  ;;  %v147_v14 = vmul.f32 %v1131_v20, %v77_v62  ;;  %v89_v3 = vld [vmem:[%s1539_s0 + $0x1c0] sm:$0xff] }
  0x58   :  { %v406_v9 = vsel %vm278_vm9, %v214_v57, %v342_v2  ;;  %v407_v13 = vsel %vm279_vm10, %v215_v58, %v343_v4  ;;  %v148_v15 = vmul.f32 %v1131_v20, %v78_v63  ;;  %v149_v18 = vmul.f32 %v1131_v20, %v79_v0  ;;  %v90_v4 = vld [vmem:[%s1539_s0 + $0x1c8] sm:$0xff] }
  0x59   :  { %v984_v12 = vpack.c.bf16 %v406_v9, %v405_v8  ;;  %1059 = vst [vmem:[%s1541_s5 + $0x98] sm:$0xff] %v979_v7   ;;  %v408_v17 = vsel %vm280_vm11, %v216_v61, %v344_v10  ;;  %v150_v19 = vmul.f32 %v1131_v20, %v80_v5  ;;  %v151_v21 = vmul.f32 %v1131_v20, %v81_v6  ;;  %v91_v7 = vld [vmem:[%s1539_s0 + $0x1d0] sm:$0xff]  ;;  %v92_v8 = vld [vmem:[%s1539_s0 + $0x1d8] sm:$0xff] }
  0x5a   :  { %v989_v22 = vpack.c.bf16 %v408_v17, %v407_v13  ;;  %v217_v23 = vadd.f32 %v1167_v38, %v147_v14  ;;  %v218_v24 = vadd.f32 %v1167_v38, %v148_v15  ;;  %v152_v25 = vmul.f32 %v1131_v20, %v82_v11  ;;  %v94_v17 = vld [vmem:[%s1539_s0 + $0x1e8] sm:$0xff] }
  0x5b   :  { %1060 = vst [vmem:[%s1541_s5 + $0xa0] sm:$0xff] %v984_v12   ;;  %v219_v26 = vadd.f32 %v1167_v38, %v149_v18  ;;  %v220_v27 = vadd.f32 %v1167_v38, %v150_v19  ;;  %v221_v28 = vadd.f32 %v1167_v38, %v151_v21  ;;  %v153_v30 = vmul.f32 %v1131_v20, %v83_v16  ;;  %v93_v12 = vld [vmem:[%s1539_s0 + $0x1e0] sm:$0xff] }
  0x5c   :  { %1061 = vst [vmem:[%s1541_s5 + $0xa8] sm:$0xff] %v989_v22   ;;  %vm281_vm12 = vcmp.ge.f32.partialorder %v217_v23, 0.0  ;;  %vm282_vm13 = vcmp.ge.f32.partialorder %v218_v24, 0.0  ;;  %v345_v31 = vmul.f32 0.2, %v217_v23  ;;  %v222_v37 = vadd.f32 %v1167_v38, %v152_v25 }
  0x5d   :  { %v346_v32 = vmul.f32 0.2, %v218_v24  ;;  %vm283_vm14 = vcmp.ge.f32.partialorder %v219_v26, 0.0  ;;  %vm284_vm15 = vcmp.ge.f32.partialorder %v220_v27, 0.0  ;;  %v347_v33 = vmul.f32 0.2, %v219_v26 }
  0x5e   :  { %v348_v34 = vmul.f32 0.2, %v220_v27  ;;  %v409_v35 = vsel %vm281_vm12, %v217_v23, %v345_v31  ;;  %vm285_vm0 = vcmp.ge.f32.partialorder %v221_v28, 0.0  ;;  %v349_v44 = vmul.f32 0.2, %v221_v28  ;;  %v95_v31 = vld [vmem:[%s1539_s0 + $0x1f0] sm:$0xff] }
  0x5f   :  { %v410_v36 = vsel %vm282_vm13, %v218_v24, %v346_v32  ;;  %v411_v42 = vsel %vm283_vm14, %v219_v26, %v347_v33  ;;  %vm286_vm1 = vcmp.ge.f32.partialorder %v222_v37, 0.0  ;;  %v350_v48 = vmul.f32 0.2, %v222_v37 }
  0x60   :  { %v994_v41 = vpack.c.bf16 %v410_v36, %v409_v35  ;;  %v412_v43 = vsel %vm284_vm15, %v220_v27, %v348_v34  ;;  %v154_v49 = vmul.f32 %v1131_v20, %v84_v29  ;;  %v413_v50 = vsel %vm285_vm0, %v221_v28, %v349_v44 }
  0x61   :  { %v999_v47 = vpack.c.bf16 %v412_v43, %v411_v42  ;;  %v223_v51 = vadd.f32 %v1167_v38, %v153_v30  ;;  %v155_v52 = vmul.f32 %v1131_v20, %v85_v39  ;;  %v156_v53 = vmul.f32 %v1131_v20, %v86_v40 }
  0x62   :  { %1062 = vst [vmem:[%s1541_s5 + $0xb0] sm:$0xff] %v994_v41   ;;  %v414_v54 = vsel %vm286_vm1, %v222_v37, %v350_v48  ;;  %v224_v55 = vadd.f32 %v1167_v38, %v154_v49  ;;  %v157_v56 = vmul.f32 %v1131_v20, %v87_v45  ;;  %v158_v57 = vmul.f32 %v1131_v20, %v88_v46  ;;  %v96_v41 = vld [vmem:[%s1539_s0 + $0x1f8] sm:$0xff] }
  0x63   :  { %1063 = vst [vmem:[%s1541_s5 + $0xb8] sm:$0xff] %v999_v47   ;;  %v1004_v58 = vpack.c.bf16 %v414_v54, %v413_v50  ;;  %vm287_vm2 = vcmp.ge.f32.partialorder %v223_v51, 0.0  ;;  %v351_v59 = vmul.f32 0.2, %v223_v51  ;;  %v225_v60 = vadd.f32 %v1167_v38, %v155_v52 }
  0x64   :  { %vm288_vm3 = vcmp.ge.f32.partialorder %v224_v55, 0.0  ;;  %v352_v61 = vmul.f32 0.2, %v224_v55  ;;  %v226_v62 = vadd.f32 %v1167_v38, %v156_v53  ;;  %v227_v63 = vadd.f32 %v1167_v38, %v157_v56 }
  0x65   :  { %1064 = vst [vmem:[%s1541_s5 + $0xc0] sm:$0xff] %v1004_v58   ;;  %v415_v0 = vsel %vm287_vm2, %v223_v51, %v351_v59  ;;  %vm289_vm4 = vcmp.ge.f32.partialorder %v225_v60, 0.0  ;;  %v353_v1 = vmul.f32 0.2, %v225_v60  ;;  %v228_v2 = vadd.f32 %v1167_v38, %v158_v57 }
  0x66   :  { %v416_v5 = vsel %vm288_vm3, %v224_v55, %v352_v61  ;;  %vm290_vm5 = vcmp.ge.f32.partialorder %v226_v62, 0.0  ;;  %v354_v6 = vmul.f32 0.2, %v226_v62  ;;  %vm291_vm6 = vcmp.ge.f32.partialorder %v227_v63, 0.0 }
  0x67   :  { %v1009_v9 = vpack.c.bf16 %v416_v5, %v415_v0  ;;  %v417_v10 = vsel %vm289_vm4, %v225_v60, %v353_v1  ;;  %vm292_vm7 = vcmp.ge.f32.partialorder %v228_v2, 0.0  ;;  %v355_v11 = vmul.f32 0.2, %v227_v63 }
  0x68   :  { %v418_v13 = vsel %vm290_vm5, %v226_v62, %v354_v6  ;;  %v356_v14 = vmul.f32 0.2, %v228_v2  ;;  %v159_v15 = vmul.f32 %v1131_v20, %v89_v3  ;;  %v160_v16 = vmul.f32 %v1131_v20, %v90_v4 }
  0x69   :  { %1065 = vst [vmem:[%s1541_s5 + $0xc8] sm:$0xff] %v1009_v9   ;;  %v1014_v18 = vpack.c.bf16 %v418_v13, %v417_v10  ;;  %v419_v19 = vsel %vm291_vm6, %v227_v63, %v355_v11  ;;  %v161_v21 = vmul.f32 %v1131_v20, %v91_v7  ;;  %v162_v22 = vmul.f32 %v1131_v20, %v92_v8 }
  0x6a   :  { %v420_v23 = vsel %vm292_vm7, %v228_v2, %v356_v14  ;;  %v229_v24 = vadd.f32 %v1167_v38, %v159_v15  ;;  %v230_v25 = vadd.f32 %v1167_v38, %v160_v16  ;;  %v163_v26 = vmul.f32 %v1131_v20, %v93_v12 }
  0x6b   :  { %1066 = vst [vmem:[%s1541_s5 + $0xd0] sm:$0xff] %v1014_v18   ;;  %v1019_v27 = vpack.c.bf16 %v420_v23, %v419_v19  ;;  %v231_v28 = vadd.f32 %v1167_v38, %v161_v21  ;;  %v232_v29 = vadd.f32 %v1167_v38, %v162_v22  ;;  %v164_v30 = vmul.f32 %v1131_v20, %v94_v17 }
  0x6c   :  { %vm293_vm8 = vcmp.ge.f32.partialorder %v229_v24, 0.0  ;;  %vm294_vm9 = vcmp.ge.f32.partialorder %v230_v25, 0.0  ;;  %v357_v32 = vmul.f32 0.2, %v229_v24  ;;  %v358_v33 = vmul.f32 0.2, %v230_v25 }
  0x6d   :  { %1067 = vst [vmem:[%s1541_s5 + $0xd8] sm:$0xff] %v1019_v27   ;;  %vm295_vm10 = vcmp.ge.f32.partialorder %v231_v28, 0.0  ;;  %vm296_vm11 = vcmp.ge.f32.partialorder %v232_v29, 0.0  ;;  %v359_v34 = vmul.f32 0.2, %v231_v28  ;;  %v233_v39 = vadd.f32 %v1167_v38, %v163_v26 }
  0x6e   :  { %v360_v35 = vmul.f32 0.2, %v232_v29  ;;  %v421_v36 = vsel %vm293_vm8, %v229_v24, %v357_v32  ;;  %v422_v37 = vsel %vm294_vm9, %v230_v25, %v358_v33  ;;  %v234_v40 = vadd.f32 %v1167_v38, %v164_v30 }
  0x6f   :  { %v1024_v42 = vpack.c.bf16 %v422_v37, %v421_v36  ;;  %v423_v43 = vsel %vm295_vm10, %v231_v28, %v359_v34  ;;  %v165_v45 = vmul.f32 %v1131_v20, %v95_v31  ;;  %vm297_vm12 = vcmp.ge.f32.partialorder %v233_v39, 0.0 }
  0x70   :  { %v424_v44 = vsel %vm296_vm11, %v232_v29, %v360_v35  ;;  %vm298_vm13 = vcmp.ge.f32.partialorder %v234_v40, 0.0  ;;  %v361_v47 = vmul.f32 0.2, %v233_v39  ;;  %v362_v48 = vmul.f32 0.2, %v234_v40 }
  0x71   :  { %v1029_v46 = vpack.c.bf16 %v424_v44, %v423_v43  ;;  %1068 = vst [vmem:[%s1541_s5 + $0xe0] sm:$0xff] %v1024_v42   ;;  %v166_v49 = vmul.f32 %v1131_v20, %v96_v41  ;;  %v235_v50 = vadd.f32 %v1167_v38, %v165_v45 }
  0x72   :  { %v425_v51 = vsel %vm297_vm12, %v233_v39, %v361_v47  ;;  %v426_v52 = vsel %vm298_vm13, %v234_v40, %v362_v48 }
  0x73   :  { %1069 = vst [vmem:[%s1541_s5 + $0xe8] sm:$0xff] %v1029_v46   ;;  %v236_v53 = vadd.f32 %v1167_v38, %v166_v49  ;;  %vm299_vm14 = vcmp.ge.f32.partialorder %v235_v50, 0.0  ;;  %v363_v54 = vmul.f32 0.2, %v235_v50  ;;  %v1034_v55 = vpack.c.bf16 %v426_v52, %v425_v51 }
  0x75   :  { %vm300_vm15 = vcmp.ge.f32.partialorder %v236_v53, 0.0  ;;  %v364_v56 = vmul.f32 0.2, %v236_v53  ;;  %v427_v57 = vsel %vm299_vm14, %v235_v50, %v363_v54  ;;  %1070 = vst [vmem:[%s1541_s5 + $0xf0] sm:$0xff] %v1034_v55  }
  0x77   :  { %v428_v20 = vsel %vm300_vm15, %v236_v53, %v364_v56 }
  0x78   :  { %v1039_v58 = vpack.c.bf16 %v428_v20, %v427_v57 }
  0x7a   :  { %1071 = vst [vmem:[%s1541_s5 + $0xf8] sm:$0xff] %v1039_v58  }

// kernel: discriminator_forward.10
= control target key start
LH: loop header
LB: loop body
LE: loop exit
PB: predicated region body
PF: predicated region fallthrough
CT: control target
= control target key end

     0   :  { %s1308_s1 = inlined_call_operand.vmem [shape: bf16[512,128], index: 1, kind: input, shape index: {}]   ;;  %s1309_s0 = inlined_call_operand.vmem [shape: bf16[128,512], index: 0, kind: input, shape index: {}]   ;;  %s1310_s2 = inlined_call_operand.vmem [shape: f32[128,128], index: 2, kind: output, shape index: {0}]   ;;  %s1311_s3 = inlined_call_operand.vmem [shape: f32[1,128], index: 3, kind: output, shape index: {1}]   ;;  %s1312_s4 = inlined_call_operand.vmem [shape: f32[1,128], index: 4, kind: output, shape index: {2}]  }
   0x1   :  { %v951_v0 = vld [vmem:[%s1308_s1 + $0x78] sm:$0xff]   ;;  %v955_v4 = vld [vmem:[%s1308_s1 + $0x70] sm:$0xff]   ;;  %v959_v8 = vld [vmem:[%s1308_s1 + $0x68] sm:$0xff]  }
   0x2   :  { %v952_v1 = vld [vmem:[%s1308_s1 + $0xf8] sm:$0xff]   ;;  %823 = vmatprep.subr.bf16.mxu0 %v951_v0  ;;  %v956_v5 = vld [vmem:[%s1308_s1 + $0xf0] sm:$0xff]   ;;  %v960_v9 = vld [vmem:[%s1308_s1 + $0xe8] sm:$0xff]  }
   0x3   :  { %v953_v2 = vld [vmem:[%s1308_s1 + $0x38] sm:$0xff]   ;;  %887 = vmatprep.subr.bf16.mxu1 %v952_v1  ;;  %v957_v6 = vld [vmem:[%s1308_s1 + $0x30] sm:$0xff]   ;;  %v961_v10 = vld [vmem:[%s1308_s1 + $0x28] sm:$0xff]  }
   0x4   :  { %v954_v3 = vld [vmem:[%s1308_s1 + $0xb8] sm:$0xff]   ;;  %824 = vmatpush3.bf16.msra.mxu0 %v953_v2  ;;  %v958_v7 = vld [vmem:[%s1308_s1 + $0xb0] sm:$0xff]   ;;  %v962_v11 = vld [vmem:[%s1308_s1 + $0xa8] sm:$0xff]  }
   0x5   :  { %888 = vmatpush3.bf16.msra.mxu1 %v954_v3  ;;  %825 = vmatprep.subr.bf16.mxu0 %v955_v4  ;;  %v963_v12 = vld [vmem:[%s1308_s1 + $0x60] sm:$0xff]   ;;  %v967_v16 = vld [vmem:[%s1308_s1 + $0x58] sm:$0xff]   ;;  %v971_v20 = vld [vmem:[%s1308_s1 + $0x50] sm:$0xff]  }
   0x6   :  { %889 = vmatprep.subr.bf16.mxu1 %v956_v5  ;;  %v964_v13 = vld [vmem:[%s1308_s1 + $0xe0] sm:$0xff]   ;;  %v968_v17 = vld [vmem:[%s1308_s1 + $0xd8] sm:$0xff]   ;;  %v972_v21 = vld [vmem:[%s1308_s1 + $0xd0] sm:$0xff]  }
   0x7   :  { %v965_v14 = vld [vmem:[%s1308_s1 + $0x20] sm:$0xff]   ;;  %v969_v18 = vld [vmem:[%s1308_s1 + $0x18] sm:$0xff]   ;;  %v973_v22 = vld [vmem:[%s1308_s1 + $0x10] sm:$0xff]  }
   0x8   :  { %826 = vmatpush3.bf16.msra.mxu0 %v957_v6  ;;  %v966_v15 = vld [vmem:[%s1308_s1 + $0xa0] sm:$0xff]   ;;  %v970_v19 = vld [vmem:[%s1308_s1 + $0x98] sm:$0xff]   ;;  %v974_v23 = vld [vmem:[%s1308_s1 + $0x90] sm:$0xff]  }
   0x9   :  { %890 = vmatpush3.bf16.msra.mxu1 %v958_v7  ;;  %827 = vmatprep.subr.bf16.mxu0 %v959_v8  ;;  %v975_v24 = vld [vmem:[%s1308_s1 + $0x48] sm:$0xff]   ;;  %v979_v28 = vld [vmem:[%s1308_s1 + $0x40] sm:$0xff]  }
   0xa   :  { %891 = vmatprep.subr.bf16.mxu1 %v960_v9  ;;  %v976_v25 = vld [vmem:[%s1308_s1 + $0xc8] sm:$0xff]   ;;  %v980_v29 = vld [vmem:[%s1308_s1 + $0xc0] sm:$0xff]  }
   0xb   :  { %v977_v26 = vld [vmem:[%s1308_s1 + $0x8] sm:$0xff]   ;;  %v981_v30 = vld [vmem:[%s1308_s1] sm:$0xff]  }
   0xc   :  { %828 = vmatpush3.bf16.msra.mxu0 %v961_v10  ;;  %v978_v27 = vld [vmem:[%s1308_s1 + $0x88] sm:$0xff]   ;;  %v982_v31 = vld [vmem:[%s1308_s1 + $0x80] sm:$0xff]  }
   0xd   :  { %892 = vmatpush3.bf16.msra.mxu1 %v962_v11  ;;  %829 = vmatprep.subr.bf16.mxu0 %v963_v12  ;;  %v983_v32 = vld [vmem:[%s1309_s0] ss:$16 sps:$4 sm:$0xff]   ;;  %v985_v33 = vld [vmem:[%s1309_s0 + $0x4] ss:$16 sps:$4 sm:$0xff]   ;;  %v986_v34 = vld [vmem:[%s1309_s0 + $0x8] ss:$16 sps:$4 sm:$0xff]  }
   0xe   :  { %893 = vmatprep.subr.bf16.mxu1 %v964_v13  ;;  %v988_v35 = vld [vmem:[%s1309_s0 + $0xc] ss:$16 sps:$4 sm:$0xff]   ;;  %495 = vmatprep.mubr.bf16.mxu0 %v985_v33  ;;  %v989_v36 = vld [vmem:[%s1309_s0 + $0x24] ss:$16 sps:$4 sm:$0xff]   ;;  %v993_v38 = vld [vmem:[%s1309_s0 + $0x20] ss:$16 sps:$4 sm:$0xff]  }
   0xf   :  { %592 = vmatprep.mubr.bf16.mxu1 %v988_v35  ;;  %v991_v37 = vld [vmem:[%s1309_s0 + $0x2c] ss:$16 sps:$4 sm:$0xff]   ;;  %v994_v39 = vld [vmem:[%s1309_s0 + $0x28] ss:$16 sps:$4 sm:$0xff]   ;;  %v995_v40 = vld [vmem:[%s1309_s0 + $0x44] ss:$16 sps:$4 sm:$0xff]  }
  0x10   :  { %830 = vmatpush3.bf16.msra.mxu0 %v965_v14  ;;  %v997_v41 = vld [vmem:[%s1309_s0 + $0x4c] ss:$16 sps:$4 sm:$0xff]   ;;  %v999_v42 = vld [vmem:[%s1309_s0 + $0x40] ss:$16 sps:$4 sm:$0xff]   ;;  %v1000_v43 = vld [vmem:[%s1309_s0 + $0x48] ss:$16 sps:$4 sm:$0xff]  }
  0x11   :  { %894 = vmatpush3.bf16.msra.mxu1 %v966_v15  ;;  %831 = vmatprep.subr.bf16.mxu0 %v967_v16  ;;  %v1001_v44 = vld [vmem:[%s1309_s0 + $0x64] ss:$16 sps:$4 sm:$0xff]   ;;  %v1003_v45 = vld [vmem:[%s1309_s0 + $0x6c] ss:$16 sps:$4 sm:$0xff]   ;;  %v1005_v46 = vld [vmem:[%s1309_s0 + $0x60] ss:$16 sps:$4 sm:$0xff]  }
  0x12   :  { %895 = vmatprep.subr.bf16.mxu1 %v968_v17  ;;  %v1006_v47 = vld [vmem:[%s1309_s0 + $0x68] ss:$16 sps:$4 sm:$0xff]   ;;  %v1007_v48 = vld [vmem:[%s1309_s0 + $0x84] ss:$16 sps:$4 sm:$0xff]   ;;  %v1009_v49 = vld [vmem:[%s1309_s0 + $0x8c] ss:$16 sps:$4 sm:$0xff]  }
  0x13   :  { %v1011_v50 = vld [vmem:[%s1309_s0 + $0x80] ss:$16 sps:$4 sm:$0xff]   ;;  %v1012_v51 = vld [vmem:[%s1309_s0 + $0x88] ss:$16 sps:$4 sm:$0xff]   ;;  %v1013_v52 = vld [vmem:[%s1309_s0 + $0xa4] ss:$16 sps:$4 sm:$0xff]  }
  0x14   :  { %832 = vmatpush3.bf16.msra.mxu0 %v969_v18  ;;  %v1015_v53 = vld [vmem:[%s1309_s0 + $0xac] ss:$16 sps:$4 sm:$0xff]   ;;  %v1017_v54 = vld [vmem:[%s1309_s0 + $0xa0] ss:$16 sps:$4 sm:$0xff]   ;;  %v1018_v55 = vld [vmem:[%s1309_s0 + $0xa8] ss:$16 sps:$4 sm:$0xff]  }
  0x15   :  { %896 = vmatpush3.bf16.msra.mxu1 %v970_v19  ;;  %833 = vmatprep.subr.bf16.mxu0 %v971_v20  ;;  %v1019_v56 = vld [vmem:[%s1309_s0 + $0xc4] ss:$16 sps:$4 sm:$0xff]   ;;  %v1021_v57 = vld [vmem:[%s1309_s0 + $0xcc] ss:$16 sps:$4 sm:$0xff]   ;;  %v1023_v58 = vld [vmem:[%s1309_s0 + $0xc0] ss:$16 sps:$4 sm:$0xff]  }
  0x16   :  { %897 = vmatprep.subr.bf16.mxu1 %v972_v21  ;;  %v1024_v59 = vld [vmem:[%s1309_s0 + $0xc8] ss:$16 sps:$4 sm:$0xff]   ;;  %v1025_v60 = vld [vmem:[%s1309_s0 + $0xe4] ss:$16 sps:$4 sm:$0xff]   ;;  %v1027_v61 = vld [vmem:[%s1309_s0 + $0xec] ss:$16 sps:$4 sm:$0xff]  }
  0x17   :  { %v1029_v62 = vld [vmem:[%s1309_s0 + $0xe0] ss:$16 sps:$4 sm:$0xff]   ;;  %v1030_v63 = vld [vmem:[%s1309_s0 + $0xe8] ss:$16 sps:$4 sm:$0xff]  }
  0x18   :  { %834 = vmatpush3.bf16.msra.mxu0 %v973_v22 }
  0x19   :  { %898 = vmatpush3.bf16.msra.mxu1 %v974_v23  ;;  %835 = vmatprep.subr.bf16.mxu0 %v975_v24 }
  0x1a   :  { %899 = vmatprep.subr.bf16.mxu1 %v976_v25 }
  0x1c   :  { %836 = vmatpush3.bf16.msra.mxu0 %v977_v26 }
  0x1d   :  { %900 = vmatpush3.bf16.msra.mxu1 %v978_v27  ;;  %837 = vmatprep.subr.bf16.mxu0 %v979_v28 }
  0x1e   :  { %901 = vmatprep.subr.bf16.mxu1 %v980_v29 }
  0x20   :  { %838 = vmatpush3.bf16.msra.mxu0 %v981_v30 }
  0x21   :  { %902 = vmatpush3.bf16.msra.mxu1 %v982_v31 }
  0x23   :  { %496 = vmatmul.mubr.bf16.vlgmr.msra.gmra.mxu0 %v983_v32 }
  0x24   :  { %593 = vmatmul.mubr.bf16.vlgmr.msra.gmra.mxu1 %v986_v34  ;;  %503 = vmatprep.mubr.bf16.mxu0 %v989_v36 }
  0x25   :  { %600 = vmatprep.mubr.bf16.mxu1 %v991_v37 }
  0x2b   :  { %504 = vmatmul.mubr.bf16.gmra.mxu0 %v993_v38 }
  0x2c   :  { %601 = vmatmul.mubr.bf16.gmra.mxu1 %v994_v39  ;;  %511 = vmatprep.mubr.bf16.mxu0 %v995_v40 }
  0x2d   :  { %608 = vmatprep.mubr.bf16.mxu1 %v997_v41 }
  0x33   :  { %512 = vmatmul.mubr.bf16.gmra.mxu0 %v999_v42 }
  0x34   :  { %609 = vmatmul.mubr.bf16.gmra.mxu1 %v1000_v43  ;;  %519 = vmatprep.mubr.bf16.mxu0 %v1001_v44 }
  0x35   :  { %616 = vmatprep.mubr.bf16.mxu1 %v1003_v45 }
  0x3b   :  { %520 = vmatmul.mubr.bf16.gmra.mxu0 %v1005_v46 }
  0x3c   :  { %617 = vmatmul.mubr.bf16.gmra.mxu1 %v1006_v47  ;;  %527 = vmatprep.mubr.bf16.mxu0 %v1007_v48 }
  0x3d   :  { %624 = vmatprep.mubr.bf16.mxu1 %v1009_v49 }
  0x43   :  { %528 = vmatmul.mubr.bf16.gmra.mxu0 %v1011_v50 }
  0x44   :  { %625 = vmatmul.mubr.bf16.gmra.mxu1 %v1012_v51  ;;  %535 = vmatprep.mubr.bf16.mxu0 %v1013_v52 }
  0x45   :  { %632 = vmatprep.mubr.bf16.mxu1 %v1015_v53 }
  0x4b   :  { %536 = vmatmul.mubr.bf16.gmra.mxu0 %v1017_v54 }
  0x4c   :  { %633 = vmatmul.mubr.bf16.gmra.mxu1 %v1018_v55  ;;  %543 = vmatprep.mubr.bf16.mxu0 %v1019_v56 }
  0x4d   :  { %640 = vmatprep.mubr.bf16.mxu1 %v1021_v57 }
  0x53   :  { %544 = vmatmul.mubr.bf16.gmra.mxu0 %v1023_v58 }
  0x54   :  { %641 = vmatmul.mubr.bf16.gmra.mxu1 %v1024_v59  ;;  %551 = vmatprep.mubr.bf16.mxu0 %v1025_v60 }
  0x55   :  { %648 = vmatprep.mubr.bf16.mxu1 %v1027_v61 }
  0x5b   :  { %552 = vmatmul.mubr.bf16.gmra.mxu0 %v1029_v62 }
  0x5c   :  { %649 = vmatmul.mubr.bf16.gmra.mxu1 %v1030_v63 }
  0xe3   :  { %v839_v0 = vpop.f32.mrf.mxu0 }
  0xe4   :  { %v903_v1 = vpop.f32.mrf.mxu1 }
  0xe5   :  { %v840_v2 = vpop.f32.mrf.mxu0 }
  0xe6   :  { %v841_v3 = vadd.f32 %v840_v2, %v839_v0  ;;  %v904_v4 = vpop.f32.mrf.mxu1 }
  0xe7   :  { %v905_v5 = vadd.f32 %v904_v4, %v903_v1  ;;  %v842_v6 = vpop.f32.mrf.mxu0 }
  0xe8   :  { %v906_v7 = vpop.f32.mrf.mxu1 }
  0xe9   :  { %v1248_v8 = vadd.f32 %v905_v5, %v841_v3  ;;  %v843_v9 = vpop.f32.mrf.mxu0 }
  0xea   :  { %v844_v10 = vadd.f32 %v843_v9, %v842_v6  ;;  %v907_v11 = vpop.f32.mrf.mxu1 }
  0xeb   :  { %657 = vst [vmem:[%s1310_s2] sm:$0xff] %v1248_v8  ;;  %v908_v12 = vadd.f32 %v907_v11, %v906_v7  ;;  %v845_v13 = vpop.f32.mrf.mxu0  ;;  %v694_v5 = vmul.f32 %v1248_v8, %v1248_v8 }
  0xec   :  { %v909_v14 = vpop.f32.mrf.mxu1 }
  0xed   :  { %v598_v15 = vadd.f32 %v908_v12, %v844_v10  ;;  %v846_v16 = vpop.f32.mrf.mxu0 }
  0xee   :  { %v847_v17 = vadd.f32 %v846_v16, %v845_v13  ;;  %v910_v18 = vpop.f32.mrf.mxu1 }
  0xef   :  { %658 = vst [vmem:[%s1310_s2 + $0x8] sm:$0xff] %v598_v15  ;;  %v911_v19 = vadd.f32 %v910_v18, %v909_v14  ;;  %v848_v20 = vpop.f32.mrf.mxu0  ;;  %v695_v0 = vmul.f32 %v598_v15, %v598_v15  ;;  %v673_v6 = vadd.f32 %v598_v15, %v1248_v8 }
  0xf0   :  { %v912_v21 = vpop.f32.mrf.mxu1 }
  0xf1   :  { %v603_v22 = vadd.f32 %v911_v19, %v847_v17  ;;  %v849_v23 = vpop.f32.mrf.mxu0  ;;  %v710_v12 = vadd.f32 %v695_v0, %v694_v5 }
  0xf2   :  { %v850_v24 = vadd.f32 %v849_v23, %v848_v20  ;;  %v913_v25 = vpop.f32.mrf.mxu1 }
  0xf3   :  { %659 = vst [vmem:[%s1310_s2 + $0x10] sm:$0xff] %v603_v22  ;;  %v914_v26 = vadd.f32 %v913_v25, %v912_v21  ;;  %v851_v27 = vpop.f32.mrf.mxu0  ;;  %v696_v7 = vmul.f32 %v603_v22, %v603_v22  ;;  %v674_v13 = vadd.f32 %v673_v6, %v603_v22 }
  0xf4   :  { %v915_v28 = vpop.f32.mrf.mxu1 }
  0xf5   :  { %v606_v29 = vadd.f32 %v914_v26, %v850_v24  ;;  %v852_v30 = vpop.f32.mrf.mxu0  ;;  %v711_v20 = vadd.f32 %v710_v12, %v696_v7 }
  0xf6   :  { %v853_v31 = vadd.f32 %v852_v30, %v851_v27  ;;  %v916_v32 = vpop.f32.mrf.mxu1 }
  0xf7   :  { %660 = vst [vmem:[%s1310_s2 + $0x18] sm:$0xff] %v606_v29  ;;  %v917_v33 = vadd.f32 %v916_v32, %v915_v28  ;;  %v854_v34 = vpop.f32.mrf.mxu0  ;;  %v697_v14 = vmul.f32 %v606_v29, %v606_v29  ;;  %v675_v21 = vadd.f32 %v674_v13, %v606_v29 }
  0xf8   :  { %v918_v35 = vpop.f32.mrf.mxu1 }
  0xf9   :  { %v611_v36 = vadd.f32 %v917_v33, %v853_v31  ;;  %v855_v37 = vpop.f32.mrf.mxu0  ;;  %v712_v25 = vadd.f32 %v711_v20, %v697_v14 }
  0xfa   :  { %v856_v38 = vadd.f32 %v855_v37, %v854_v34  ;;  %v919_v39 = vpop.f32.mrf.mxu1 }
  0xfb   :  { %661 = vst [vmem:[%s1310_s2 + $0x20] sm:$0xff] %v611_v36  ;;  %v920_v40 = vadd.f32 %v919_v39, %v918_v35  ;;  %v857_v41 = vpop.f32.mrf.mxu0  ;;  %v698_v23 = vmul.f32 %v611_v36, %v611_v36  ;;  %v676_v26 = vadd.f32 %v675_v21, %v611_v36 }
  0xfc   :  { %v921_v42 = vpop.f32.mrf.mxu1 }
  0xfd   :  { %v614_v43 = vadd.f32 %v920_v40, %v856_v38  ;;  %v858_v44 = vpop.f32.mrf.mxu0  ;;  %v713_v32 = vadd.f32 %v712_v25, %v698_v23 }
  0xfe   :  { %v859_v45 = vadd.f32 %v858_v44, %v857_v41  ;;  %v922_v46 = vpop.f32.mrf.mxu1 }
  0xff   :  { %662 = vst [vmem:[%s1310_s2 + $0x28] sm:$0xff] %v614_v43  ;;  %v923_v47 = vadd.f32 %v922_v46, %v921_v42  ;;  %v860_v48 = vpop.f32.mrf.mxu0  ;;  %v699_v27 = vmul.f32 %v614_v43, %v614_v43  ;;  %v677_v33 = vadd.f32 %v676_v26, %v614_v43 }
 0x100   :  { %v924_v49 = vpop.f32.mrf.mxu1 }
 0x101   :  { %v619_v50 = vadd.f32 %v923_v47, %v859_v45  ;;  %v861_v51 = vpop.f32.mrf.mxu0  ;;  %v714_v38 = vadd.f32 %v713_v32, %v699_v27 }
 0x102   :  { %v862_v52 = vadd.f32 %v861_v51, %v860_v48  ;;  %v925_v53 = vpop.f32.mrf.mxu1 }
 0x103   :  { %663 = vst [vmem:[%s1310_s2 + $0x30] sm:$0xff] %v619_v50  ;;  %v926_v54 = vadd.f32 %v925_v53, %v924_v49  ;;  %v863_v55 = vpop.f32.mrf.mxu0  ;;  %v700_v34 = vmul.f32 %v619_v50, %v619_v50  ;;  %v678_v39 = vadd.f32 %v677_v33, %v619_v50 }
 0x104   :  { %v927_v56 = vpop.f32.mrf.mxu1 }
 0x105   :  { %v622_v57 = vadd.f32 %v926_v54, %v862_v52  ;;  %v864_v58 = vpop.f32.mrf.mxu0  ;;  %v715_v45 = vadd.f32 %v714_v38, %v700_v34 }
 0x106   :  { %v865_v59 = vadd.f32 %v864_v58, %v863_v55  ;;  %v928_v60 = vpop.f32.mrf.mxu1 }
 0x107   :  { %664 = vst [vmem:[%s1310_s2 + $0x38] sm:$0xff] %v622_v57  ;;  %v929_v61 = vadd.f32 %v928_v60, %v927_v56  ;;  %v866_v62 = vpop.f32.mrf.mxu0  ;;  %v701_v40 = vmul.f32 %v622_v57, %v622_v57  ;;  %v679_v46 = vadd.f32 %v678_v39, %v622_v57 }
 0x108   :  { %v930_v63 = vpop.f32.mrf.mxu1 }
 0x109   :  { %v627_v1 = vadd.f32 %v929_v61, %v865_v59  ;;  %v867_v2 = vpop.f32.mrf.mxu0  ;;  %v716_v51 = vadd.f32 %v715_v45, %v701_v40 }
 0x10a   :  { %v868_v3 = vadd.f32 %v867_v2, %v866_v62  ;;  %v931_v4 = vpop.f32.mrf.mxu1 }
 0x10b   :  { %665 = vst [vmem:[%s1310_s2 + $0x40] sm:$0xff] %v627_v1  ;;  %v932_v9 = vadd.f32 %v931_v4, %v930_v63  ;;  %v869_v10 = vpop.f32.mrf.mxu0  ;;  %v702_v47 = vmul.f32 %v627_v1, %v627_v1  ;;  %v680_v52 = vadd.f32 %v679_v46, %v627_v1 }
 0x10c   :  { %v933_v11 = vpop.f32.mrf.mxu1 }
 0x10d   :  { %v630_v16 = vadd.f32 %v932_v9, %v868_v3  ;;  %v870_v17 = vpop.f32.mrf.mxu0  ;;  %v717_v58 = vadd.f32 %v716_v51, %v702_v47 }
 0x10e   :  { %v871_v18 = vadd.f32 %v870_v17, %v869_v10  ;;  %v934_v19 = vpop.f32.mrf.mxu1 }
 0x10f   :  { %666 = vst [vmem:[%s1310_s2 + $0x48] sm:$0xff] %v630_v16  ;;  %v935_v8 = vadd.f32 %v934_v19, %v933_v11  ;;  %v872_v15 = vpop.f32.mrf.mxu0  ;;  %v703_v53 = vmul.f32 %v630_v16, %v630_v16  ;;  %v681_v59 = vadd.f32 %v680_v52, %v630_v16 }
 0x110   :  { %v936_v24 = vpop.f32.mrf.mxu1 }
 0x111   :  { %v635_v28 = vadd.f32 %v935_v8, %v871_v18  ;;  %v873_v22 = vpop.f32.mrf.mxu0  ;;  %v718_v63 = vadd.f32 %v717_v58, %v703_v53 }
 0x112   :  { %v874_v30 = vadd.f32 %v873_v22, %v872_v15  ;;  %v937_v31 = vpop.f32.mrf.mxu1 }
 0x113   :  { %667 = vst [vmem:[%s1310_s2 + $0x50] sm:$0xff] %v635_v28  ;;  %v938_v29 = vadd.f32 %v937_v31, %v936_v24  ;;  %v875_v35 = vpop.f32.mrf.mxu0  ;;  %v704_v60 = vmul.f32 %v635_v28, %v635_v28  ;;  %v682_v0 = vadd.f32 %v681_v59, %v635_v28 }
 0x114   :  { %v939_v37 = vpop.f32.mrf.mxu1 }
 0x115   :  { %v638_v41 = vadd.f32 %v938_v29, %v874_v30  ;;  %v876_v36 = vpop.f32.mrf.mxu0  ;;  %v719_v6 = vadd.f32 %v718_v63, %v704_v60 }
 0x116   :  { %v877_v42 = vadd.f32 %v876_v36, %v875_v35  ;;  %v940_v44 = vpop.f32.mrf.mxu1 }
 0x117   :  { %668 = vst [vmem:[%s1310_s2 + $0x58] sm:$0xff] %v638_v41  ;;  %v941_v43 = vadd.f32 %v940_v44, %v939_v37  ;;  %v878_v48 = vpop.f32.mrf.mxu0  ;;  %v705_v2 = vmul.f32 %v638_v41, %v638_v41  ;;  %v683_v7 = vadd.f32 %v682_v0, %v638_v41 }
 0x118   :  { %v942_v49 = vpop.f32.mrf.mxu1 }
 0x119   :  { %v643_v54 = vadd.f32 %v941_v43, %v877_v42  ;;  %v879_v50 = vpop.f32.mrf.mxu0  ;;  %v720_v13 = vadd.f32 %v719_v6, %v705_v2 }
 0x11a   :  { %v880_v55 = vadd.f32 %v879_v50, %v878_v48  ;;  %v943_v56 = vpop.f32.mrf.mxu1 }
 0x11b   :  { %669 = vst [vmem:[%s1310_s2 + $0x60] sm:$0xff] %v643_v54  ;;  %v944_v57 = vadd.f32 %v943_v56, %v942_v49  ;;  %v881_v61 = vpop.f32.mrf.mxu0  ;;  %v706_v9 = vmul.f32 %v643_v54, %v643_v54  ;;  %v684_v14 = vadd.f32 %v683_v7, %v643_v54 }
 0x11c   :  { %v945_v62 = vpop.f32.mrf.mxu1 }
 0x11d   :  { %v646_v3 = vadd.f32 %v944_v57, %v880_v55  ;;  %v882_v1 = vpop.f32.mrf.mxu0  ;;  %v721_v21 = vadd.f32 %v720_v13, %v706_v9 }
 0x11e   :  { %v883_v4 = vadd.f32 %v882_v1, %v881_v61  ;;  %v946_v5 = vpop.f32.mrf.mxu1 }
 0x11f   :  { %670 = vst [vmem:[%s1310_s2 + $0x68] sm:$0xff] %v646_v3  ;;  %v947_v10 = vadd.f32 %v946_v5, %v945_v62  ;;  %v884_v11 = vpop.f32.mrf.mxu0  ;;  %v707_v16 = vmul.f32 %v646_v3, %v646_v3  ;;  %v685_v23 = vadd.f32 %v684_v14, %v646_v3 }
 0x120   :  { %v948_v12 = vpop.f32.mrf.mxu1 }
 0x121   :  { %v651_v17 = vadd.f32 %v947_v10, %v883_v4  ;;  %v885_v18 = vpop.f32.mrf.mxu0  ;;  %v722_v24 = vadd.f32 %v721_v21, %v707_v16 }
 0x122   :  { %v886_v19 = vadd.f32 %v885_v18, %v884_v11  ;;  %v949_v20 = vpop.f32.mrf.mxu1 }
 0x123   :  { %671 = vst [vmem:[%s1310_s2 + $0x70] sm:$0xff] %v651_v17  ;;  %v708_v8 = vmul.f32 %v651_v17, %v651_v17  ;;  %v950_v15 = vadd.f32 %v949_v20, %v948_v12  ;;  %v686_v25 = vadd.f32 %v685_v23, %v651_v17 }
 0x125   :  { %v654_v26 = vadd.f32 %v950_v15, %v886_v19  ;;  %v723_v27 = vadd.f32 %v722_v24, %v708_v8 }
 0x127   :  { %672 = vst [vmem:[%s1310_s2 + $0x78] sm:$0xff] %v654_v26  ;;  %v687_v28 = vadd.f32 %v686_v25, %v654_v26  ;;  %v709_v22 = vmul.f32 %v654_v26, %v654_v26 }
 0x129   :  { %v688_v30 = vrot.slane %v687_v28, 4  ;;  %v724_v31 = vadd.f32 %v723_v27, %v709_v22 }
 0x12b   :  { %v689_v32 = vadd.f32 %v688_v30, %v687_v28  ;;  %v725_v33 = vrot.slane %v724_v31, 4 }
 0x12d   :  { %v690_v34 = vrot.slane %v689_v32, 2  ;;  %v726_v29 = vadd.f32 %v725_v33, %v724_v31 }
 0x12f   :  { %v691_v35 = vadd.f32 %v690_v34, %v689_v32  ;;  %v727_v37 = vrot.slane %v726_v29, 2 }
 0x131   :  { %v692_v38 = vrot.slane %v691_v35, 1  ;;  %v728_v39 = vadd.f32 %v727_v37, %v726_v29 }
 0x133   :  { %v693_v40 = vadd.f32 %v692_v38, %v691_v35  ;;  %v729_v41 = vrot.slane %v728_v39, 1 }
 0x135   :  { %v730_v36 = vadd.f32 %v729_v41, %v728_v39  ;;  %735 = vst [vmem:[%s1311_s3] sm:$0x1] %v693_v40 }
 0x137   :  { %736 = vst [vmem:[%s1312_s4] sm:$0x1] %v730_v36 }

// kernel: discriminator_forward.11
= control target key start
LH: loop header
LB: loop body
LE: loop exit
PB: predicated region body
PF: predicated region fallthrough
CT: control target
= control target key end

     0   :  { %v50_v7 = vlaneseq  ;;  %s456_s1 = inlined_call_operand.vmem [shape: f32[1,128], index: 1, kind: input, shape index: {}]   ;;  %s457_s2 = inlined_call_operand.vmem [shape: f32[1,128], index: 2, kind: input, shape index: {}]   ;;  %s458_s3 = inlined_call_operand.vmem [shape: f32[1,128], index: 3, kind: input, shape index: {}]   ;;  %s459_s0 = inlined_call_operand.vmem [shape: f32[128,128], index: 0, kind: input, shape index: {}]   ;;  %s460_s4 = inlined_call_operand.vmem [shape: f32[1,128], index: 4, kind: input, shape index: {}]   ;;  %s461_s5 = inlined_call_operand.vmem [shape: bf16[128,128], index: 5, kind: output, shape index: {}]  }
   0x1   :  { %v20_v0 = vld [vmem:[%s456_s1] sm:$0x1]  ;;  %v34_v15 = vld [vmem:[%s459_s0 + $0x8] sm:$0xff]  ;;  %v35_v16 = vld [vmem:[%s459_s0 + $0x10] sm:$0xff] }
   0x2   :  { %v22_v1 = vld [vmem:[%s457_s2] sm:$0x1]  ;;  %v21_v2 = vmul.f32 0.0078125, %v20_v0  ;;  %v51_v8 = vshrl.u32 %v50_v7, 7  ;;  %v36_v17 = vld [vmem:[%s459_s0 + $0x18] sm:$0xff]  ;;  %v38_v21 = vld [vmem:[%s459_s0 + $0x28] sm:$0xff] }
   0x3   :  { %v23_v3 = vmul.f32 0.0078125, %v22_v1  ;;  %v26_v9 = vld [vmem:[%s458_s3] sm:$0x1]  ;;  %v39_v22 = vld [vmem:[%s459_s0 + $0x30] sm:$0xff]  ;;  %v40_v23 = vld [vmem:[%s459_s0 + $0x38] sm:$0xff] }
   0x4   :  { %v24_v4 = vmul.f32 %v21_v2, %v21_v2  ;;  %v52_v10 = vsub.s32 0, %v51_v8  ;;  %v30_v13 = vld [vmem:[%s460_s4] sm:$0x1]  ;;  %v42_v25 = vld [vmem:[%s459_s0 + $0x48] sm:$0xff]  ;;  %v43_v26 = vld [vmem:[%s459_s0 + $0x50] sm:$0xff] }
   0x5   :  { %v33_v14 = vld [vmem:[%s459_s0] sm:$0xff]  ;;  %v44_v31 = vld [vmem:[%s459_s0 + $0x58] sm:$0xff]  ;;  %v46_v33 = vld [vmem:[%s459_s0 + $0x68] sm:$0xff] }
   0x6   :  { %v25_v5 = vsub.f32 %v23_v3, %v24_v4  ;;  %v37_v18 = vld [vmem:[%s459_s0 + $0x20] sm:$0xff] }
   0x7   :  { %v41_v24 = vld [vmem:[%s459_s0 + $0x40] sm:$0xff] }
   0x8   :  { %v27_v6 = vadd.f32 1e-05, %v25_v5  ;;  %v45_v32 = vld [vmem:[%s459_s0 + $0x60] sm:$0xff] }
   0xa   :  { %304 = vrsqrt.f32 %v27_v6 }
  0x17   :  { %v305_v11 = vpop.eup %304 }
  0x18   :  { %v29_v12 = vmul.f32 %v305_v11, %v26_v9 }
  0x1a   :  { %v31_v19 = vmul.f32 %v29_v12, %v21_v2  ;;  %v363_v20 = vrot.slane %v29_v12, %v52_v10 }
  0x1c   :  { %v32_v27 = vsub.f32 %v30_v13, %v31_v19  ;;  %v55_v28 = vmul.f32 %v363_v20, %v33_v14  ;;  %v56_v29 = vmul.f32 %v363_v20, %v34_v15  ;;  %v57_v30 = vmul.f32 %v363_v20, %v35_v16  ;;  %v47_v16 = vld [vmem:[%s459_s0 + $0x70] sm:$0xff] }
  0x1d   :  { %v58_v34 = vmul.f32 %v363_v20, %v36_v17  ;;  %v59_v35 = vmul.f32 %v363_v20, %v37_v18  ;;  %v60_v36 = vmul.f32 %v363_v20, %v38_v21  ;;  %v61_v37 = vmul.f32 %v363_v20, %v39_v22 }
  0x1e   :  { %v399_v38 = vrot.slane %v32_v27, %v52_v10  ;;  %v62_v39 = vmul.f32 %v363_v20, %v40_v23  ;;  %v63_v40 = vmul.f32 %v363_v20, %v41_v24  ;;  %v64_v41 = vmul.f32 %v363_v20, %v42_v25  ;;  %v48_v24 = vld [vmem:[%s459_s0 + $0x78] sm:$0xff] }
  0x1f   :  { %v65_v42 = vmul.f32 %v363_v20, %v43_v26  ;;  %v66_v43 = vmul.f32 %v363_v20, %v44_v31  ;;  %v67_v44 = vmul.f32 %v363_v20, %v45_v32  ;;  %v68_v45 = vmul.f32 %v363_v20, %v46_v33 }
  0x20   :  { %v77_v46 = vadd.f32 %v399_v38, %v55_v28  ;;  %v78_v47 = vadd.f32 %v399_v38, %v56_v29  ;;  %v79_v48 = vadd.f32 %v399_v38, %v57_v30  ;;  %v80_v49 = vadd.f32 %v399_v38, %v58_v34 }
  0x21   :  { %v81_v50 = vadd.f32 %v399_v38, %v59_v35  ;;  %v82_v51 = vadd.f32 %v399_v38, %v60_v36  ;;  %v83_v52 = vadd.f32 %v399_v38, %v61_v37  ;;  %v84_v53 = vadd.f32 %v399_v38, %v62_v39 }
  0x22   :  { %vm93_vm0 = vcmp.ge.f32.partialorder %v77_v46, 0.0  ;;  %vm94_vm1 = vcmp.ge.f32.partialorder %v78_v47, 0.0  ;;  %v109_v54 = vmul.f32 0.2, %v77_v46  ;;  %v110_v55 = vmul.f32 0.2, %v78_v47 }
  0x23   :  { %vm95_vm2 = vcmp.ge.f32.partialorder %v79_v48, 0.0  ;;  %vm96_vm3 = vcmp.ge.f32.partialorder %v80_v49, 0.0  ;;  %v111_v56 = vmul.f32 0.2, %v79_v48  ;;  %v112_v57 = vmul.f32 0.2, %v80_v49 }
  0x24   :  { %v125_v58 = vsel %vm93_vm0, %v77_v46, %v109_v54  ;;  %v126_v59 = vsel %vm94_vm1, %v78_v47, %v110_v55  ;;  %vm97_vm4 = vcmp.ge.f32.partialorder %v81_v50, 0.0  ;;  %vm98_vm5 = vcmp.ge.f32.partialorder %v82_v51, 0.0 }
  0x25   :  { %v260_v60 = vpack.c.bf16 %v126_v59, %v125_v58  ;;  %v127_v61 = vsel %vm95_vm2, %v79_v48, %v111_v56  ;;  %v128_v62 = vsel %vm96_vm3, %v80_v49, %v112_v57  ;;  %v113_v63 = vmul.f32 0.2, %v81_v50 }
  0x26   :  { %v265_v0 = vpack.c.bf16 %v128_v62, %v127_v61  ;;  %v114_v1 = vmul.f32 0.2, %v82_v51  ;;  %vm99_vm6 = vcmp.ge.f32.partialorder %v83_v52, 0.0  ;;  %vm100_vm7 = vcmp.ge.f32.partialorder %v84_v53, 0.0 }
  0x27   :  { %261 = vst [vmem:[%s461_s5] sm:$0xff] %v260_v60   ;;  %v129_v2 = vsel %vm97_vm4, %v81_v50, %v113_v63  ;;  %v115_v3 = vmul.f32 0.2, %v83_v52  ;;  %v116_v4 = vmul.f32 0.2, %v84_v53  ;;  %v85_v5 = vadd.f32 %v399_v38, %v63_v40 }
  0x28   :  { %297 = vst [vmem:[%s461_s5 + $0x8] sm:$0xff] %v265_v0   ;;  %v130_v6 = vsel %vm98_vm5, %v82_v51, %v114_v1  ;;  %v86_v7 = vadd.f32 %v399_v38, %v64_v41  ;;  %v87_v8 = vadd.f32 %v399_v38, %v65_v42  ;;  %v88_v9 = vadd.f32 %v399_v38, %v66_v43 }
  0x29   :  { %v270_v10 = vpack.c.bf16 %v130_v6, %v129_v2  ;;  %v131_v11 = vsel %vm99_vm6, %v83_v52, %v115_v3  ;;  %v132_v12 = vsel %vm100_vm7, %v84_v53, %v116_v4  ;;  %vm101_vm8 = vcmp.ge.f32.partialorder %v85_v5, 0.0 }
  0x2a   :  { %v275_v13 = vpack.c.bf16 %v132_v12, %v131_v11  ;;  %vm102_vm9 = vcmp.ge.f32.partialorder %v86_v7, 0.0  ;;  %v117_v14 = vmul.f32 0.2, %v85_v5  ;;  %v118_v15 = vmul.f32 0.2, %v86_v7 }
  0x2b   :  { %298 = vst [vmem:[%s461_s5 + $0x10] sm:$0xff] %v270_v10   ;;  %vm103_vm10 = vcmp.ge.f32.partialorder %v87_v8, 0.0  ;;  %vm104_vm11 = vcmp.ge.f32.partialorder %v88_v9, 0.0  ;;  %v119_v17 = vmul.f32 0.2, %v87_v8  ;;  %v89_v22 = vadd.f32 %v399_v38, %v67_v44 }
  0x2c   :  { %v120_v18 = vmul.f32 0.2, %v88_v9  ;;  %299 = vst [vmem:[%s461_s5 + $0x18] sm:$0xff] %v275_v13   ;;  %v133_v19 = vsel %vm101_vm8, %v85_v5, %v117_v14  ;;  %v134_v21 = vsel %vm102_vm9, %v86_v7, %v118_v15  ;;  %v90_v23 = vadd.f32 %v399_v38, %v68_v45 }
  0x2d   :  { %v280_v25 = vpack.c.bf16 %v134_v21, %v133_v19  ;;  %v135_v26 = vsel %vm103_vm10, %v87_v8, %v119_v17  ;;  %v69_v28 = vmul.f32 %v363_v20, %v47_v16  ;;  %vm105_vm12 = vcmp.ge.f32.partialorder %v89_v22, 0.0 }
  0x2e   :  { %v136_v27 = vsel %vm104_vm11, %v88_v9, %v120_v18  ;;  %vm106_vm13 = vcmp.ge.f32.partialorder %v90_v23, 0.0  ;;  %v121_v30 = vmul.f32 0.2, %v89_v22  ;;  %v122_v31 = vmul.f32 0.2, %v90_v23 }
  0x2f   :  { %v285_v29 = vpack.c.bf16 %v136_v27, %v135_v26  ;;  %300 = vst [vmem:[%s461_s5 + $0x20] sm:$0xff] %v280_v25   ;;  %v70_v32 = vmul.f32 %v363_v20, %v48_v24  ;;  %v91_v33 = vadd.f32 %v399_v38, %v69_v28 }
  0x30   :  { %v137_v34 = vsel %vm105_vm12, %v89_v22, %v121_v30  ;;  %v138_v35 = vsel %vm106_vm13, %v90_v23, %v122_v31 }
  0x31   :  { %301 = vst [vmem:[%s461_s5 + $0x28] sm:$0xff] %v285_v29   ;;  %v92_v36 = vadd.f32 %v399_v38, %v70_v32  ;;  %vm107_vm14 = vcmp.ge.f32.partialorder %v91_v33, 0.0  ;;  %v123_v37 = vmul.f32 0.2, %v91_v33  ;;  %v290_v39 = vpack.c.bf16 %v138_v35, %v137_v34 }
  0x33   :  { %vm108_vm15 = vcmp.ge.f32.partialorder %v92_v36, 0.0  ;;  %v124_v40 = vmul.f32 0.2, %v92_v36  ;;  %v139_v41 = vsel %vm107_vm14, %v91_v33, %v123_v37  ;;  %302 = vst [vmem:[%s461_s5 + $0x30] sm:$0xff] %v290_v39  }
  0x35   :  { %v140_v20 = vsel %vm108_vm15, %v92_v36, %v124_v40 }
  0x36   :  { %v295_v42 = vpack.c.bf16 %v140_v20, %v139_v41 }
  0x38   :  { %303 = vst [vmem:[%s461_s5 + $0x38] sm:$0xff] %v295_v42  }

// kernel: discriminator_forward.13
= control target key start
LH: loop header
LB: loop body
LE: loop exit
PB: predicated region body
PF: predicated region fallthrough
CT: control target
= control target key end

     0   :  { %v38_v7 = vlaneseq  ;;  %s174_s1 = inlined_call_operand.vmem [shape: f32[1,128], index: 1, kind: input, shape index: {}]   ;;  %s175_s2 = inlined_call_operand.vmem [shape: f32[1,128], index: 2, kind: input, shape index: {}]   ;;  %s176_s3 = inlined_call_operand.vmem [shape: f32[1,128], index: 3, kind: input, shape index: {}]   ;;  %s177_s4 = inlined_call_operand.vmem [shape: f32[1,128], index: 4, kind: input, shape index: {}]   ;;  %s178_s0 = inlined_call_operand.vmem [shape: f32[32,128], index: 0, kind: input, shape index: {}]   ;;  %s179_s5 = inlined_call_operand.vmem [shape: bf16[32,128], index: 5, kind: output, shape index: {}]  }
   0x1   :  { %v20_v0 = vld [vmem:[%s174_s1] sm:$0x1]  ;;  %v34_v15 = vld [vmem:[%s178_s0 + $0x8] sm:$0xff]  ;;  %v35_v16 = vld [vmem:[%s178_s0 + $0x10] sm:$0xff] }
   0x2   :  { %v22_v1 = vld [vmem:[%s175_s2] sm:$0x1]  ;;  %v21_v2 = vmul.f32 0.03125, %v20_v0  ;;  %v39_v8 = vshrl.u32 %v38_v7, 7  ;;  %v36_v19 = vld [vmem:[%s178_s0 + $0x18] sm:$0xff] }
   0x3   :  { %v23_v3 = vmul.f32 0.03125, %v22_v1  ;;  %v26_v9 = vld [vmem:[%s176_s3] sm:$0x1] }
   0x4   :  { %v24_v4 = vmul.f32 %v21_v2, %v21_v2  ;;  %v40_v10 = vsub.s32 0, %v39_v8  ;;  %v30_v13 = vld [vmem:[%s177_s4] sm:$0x1] }
   0x5   :  { %v33_v14 = vld [vmem:[%s178_s0] sm:$0xff] }
   0x6   :  { %v25_v5 = vsub.f32 %v23_v3, %v24_v4 }
   0x8   :  { %v27_v6 = vadd.f32 1e-05, %v25_v5 }
   0xa   :  { %112 = vrsqrt.f32 %v27_v6 }
  0x17   :  { %v113_v11 = vpop.eup %112 }
  0x18   :  { %v29_v12 = vmul.f32 %v113_v11, %v26_v9 }
  0x1a   :  { %v31_v17 = vmul.f32 %v29_v12, %v21_v2  ;;  %v41_v18 = vrot.slane %v29_v12, %v40_v10 }
  0x1c   :  { %v32_v20 = vsub.f32 %v30_v13, %v31_v17  ;;  %v43_v21 = vmul.f32 %v41_v18, %v33_v14  ;;  %v44_v22 = vmul.f32 %v41_v18, %v34_v15  ;;  %v45_v23 = vmul.f32 %v41_v18, %v35_v16 }
  0x1d   :  { %v46_v24 = vmul.f32 %v41_v18, %v36_v19 }
  0x1e   :  { %v51_v25 = vrot.slane %v32_v20, %v40_v10 }
  0x20   :  { %v53_v26 = vadd.f32 %v51_v25, %v43_v21  ;;  %v54_v27 = vadd.f32 %v51_v25, %v44_v22  ;;  %v55_v28 = vadd.f32 %v51_v25, %v45_v23  ;;  %v56_v29 = vadd.f32 %v51_v25, %v46_v24 }
  0x22   :  { %vm57_vm0 = vcmp.ge.f32.partialorder %v53_v26, 0.0  ;;  %vm58_vm1 = vcmp.ge.f32.partialorder %v54_v27, 0.0  ;;  %v61_v30 = vmul.f32 0.2, %v53_v26  ;;  %v62_v31 = vmul.f32 0.2, %v54_v27 }
  0x23   :  { %vm59_vm2 = vcmp.ge.f32.partialorder %v55_v28, 0.0  ;;  %vm60_vm3 = vcmp.ge.f32.partialorder %v56_v29, 0.0  ;;  %v63_v32 = vmul.f32 0.2, %v55_v28  ;;  %v64_v33 = vmul.f32 0.2, %v56_v29 }
  0x24   :  { %v65_v34 = vsel %vm57_vm0, %v53_v26, %v61_v30  ;;  %v66_v35 = vsel %vm58_vm1, %v54_v27, %v62_v31 }
  0x25   :  { %v104_v36 = vpack.c.bf16 %v66_v35, %v65_v34  ;;  %v67_v37 = vsel %vm59_vm2, %v55_v28, %v63_v32  ;;  %v68_v38 = vsel %vm60_vm3, %v56_v29, %v64_v33 }
  0x26   :  { %v109_v39 = vpack.c.bf16 %v68_v38, %v67_v37 }
  0x27   :  { %105 = vst [vmem:[%s179_s5] sm:$0xff] %v104_v36  }
  0x28   :  { %111 = vst [vmem:[%s179_s5 + $0x8] sm:$0xff] %v109_v39  }

// kernel: discriminator_forward.12
= control target key start
LH: loop header
LB: loop body
LE: loop exit
PB: predicated region body
PF: predicated region fallthrough
CT: control target
= control target key end

     0   :  { %s1412_s1 = inlined_call_operand.vmem [shape: bf16[1024,128], index: 1, kind: input, shape index: {}]   ;;  %s1413_s0 = inlined_call_operand.vmem [shape: bf16[32,1024], index: 0, kind: input, shape index: {}]   ;;  %s1414_s2 = inlined_call_operand.vmem [shape: f32[32,128], index: 2, kind: output, shape index: {0}]   ;;  %s1415_s3 = inlined_call_operand.vmem [shape: f32[1,128], index: 3, kind: output, shape index: {1}]   ;;  %s1416_s4 = inlined_call_operand.vmem [shape: f32[1,128], index: 4, kind: output, shape index: {2}]  }
   0x1   :  { %v1065_v0 = vld [vmem:[%s1412_s1 + $0x78] sm:$0xff]   ;;  %v1069_v4 = vld [vmem:[%s1412_s1 + $0x70] sm:$0xff]   ;;  %v1073_v8 = vld [vmem:[%s1412_s1 + $0x68] sm:$0xff]  }
   0x2   :  { %v1066_v1 = vld [vmem:[%s1412_s1 + $0xf8] sm:$0xff]   ;;  %953 = vmatprep.subr.bf16.mxu0 %v1065_v0  ;;  %v1070_v5 = vld [vmem:[%s1412_s1 + $0xf0] sm:$0xff]   ;;  %v1074_v9 = vld [vmem:[%s1412_s1 + $0xe8] sm:$0xff]  }
   0x3   :  { %v1067_v2 = vld [vmem:[%s1412_s1 + $0x38] sm:$0xff]   ;;  %981 = vmatprep.subr.bf16.mxu1 %v1066_v1  ;;  %v1071_v6 = vld [vmem:[%s1412_s1 + $0x30] sm:$0xff]   ;;  %v1075_v10 = vld [vmem:[%s1412_s1 + $0x28] sm:$0xff]  }
   0x4   :  { %v1068_v3 = vld [vmem:[%s1412_s1 + $0xb8] sm:$0xff]   ;;  %954 = vmatpush3.bf16.msra.mxu0 %v1067_v2  ;;  %v1072_v7 = vld [vmem:[%s1412_s1 + $0xb0] sm:$0xff]   ;;  %v1076_v11 = vld [vmem:[%s1412_s1 + $0xa8] sm:$0xff]  }
   0x5   :  { %982 = vmatpush3.bf16.msra.mxu1 %v1068_v3  ;;  %955 = vmatprep.subr.bf16.mxu0 %v1069_v4  ;;  %v1077_v12 = vld [vmem:[%s1412_s1 + $0x60] sm:$0xff]   ;;  %v1081_v16 = vld [vmem:[%s1412_s1 + $0x58] sm:$0xff]   ;;  %v1085_v20 = vld [vmem:[%s1412_s1 + $0x50] sm:$0xff]  }
   0x6   :  { %983 = vmatprep.subr.bf16.mxu1 %v1070_v5  ;;  %v1078_v13 = vld [vmem:[%s1412_s1 + $0xe0] sm:$0xff]   ;;  %v1082_v17 = vld [vmem:[%s1412_s1 + $0xd8] sm:$0xff]   ;;  %v1086_v21 = vld [vmem:[%s1412_s1 + $0xd0] sm:$0xff]  }
   0x7   :  { %v1079_v14 = vld [vmem:[%s1412_s1 + $0x20] sm:$0xff]   ;;  %v1083_v18 = vld [vmem:[%s1412_s1 + $0x18] sm:$0xff]   ;;  %v1087_v22 = vld [vmem:[%s1412_s1 + $0x10] sm:$0xff]  }
   0x8   :  { %956 = vmatpush3.bf16.msra.mxu0 %v1071_v6  ;;  %v1080_v15 = vld [vmem:[%s1412_s1 + $0xa0] sm:$0xff]   ;;  %v1084_v19 = vld [vmem:[%s1412_s1 + $0x98] sm:$0xff]   ;;  %v1088_v23 = vld [vmem:[%s1412_s1 + $0x90] sm:$0xff]  }
   0x9   :  { %984 = vmatpush3.bf16.msra.mxu1 %v1072_v7  ;;  %957 = vmatprep.subr.bf16.mxu0 %v1073_v8  ;;  %v1089_v24 = vld [vmem:[%s1412_s1 + $0x48] sm:$0xff]   ;;  %v1093_v28 = vld [vmem:[%s1412_s1 + $0x40] sm:$0xff]   ;;  %v1097_v40 = vld [vmem:[%s1412_s1 + $0x178] sm:$0xff]  }
   0xa   :  { %985 = vmatprep.subr.bf16.mxu1 %v1074_v9  ;;  %v1090_v25 = vld [vmem:[%s1412_s1 + $0xc8] sm:$0xff]   ;;  %v1094_v29 = vld [vmem:[%s1412_s1 + $0xc0] sm:$0xff]   ;;  %v1098_v41 = vld [vmem:[%s1412_s1 + $0x1f8] sm:$0xff]  }
   0xb   :  { %v1091_v26 = vld [vmem:[%s1412_s1 + $0x8] sm:$0xff]   ;;  %v1095_v30 = vld [vmem:[%s1412_s1] sm:$0xff]   ;;  %v1099_v42 = vld [vmem:[%s1412_s1 + $0x138] sm:$0xff]  }
   0xc   :  { %958 = vmatpush3.bf16.msra.mxu0 %v1075_v10  ;;  %v1092_v27 = vld [vmem:[%s1412_s1 + $0x88] sm:$0xff]   ;;  %v1096_v31 = vld [vmem:[%s1412_s1 + $0x80] sm:$0xff]   ;;  %v1100_v43 = vld [vmem:[%s1412_s1 + $0x1b8] sm:$0xff]  }
   0xd   :  { %986 = vmatpush3.bf16.msra.mxu1 %v1076_v11  ;;  %959 = vmatprep.subr.bf16.mxu0 %v1077_v12  ;;  %v15_v32 = vld [vmem:[%s1413_s0] sm:$0xff]  ;;  %v16_v34 = vld [vmem:[%s1413_s0 + $0x8] sm:$0xff]  ;;  %v1101_v44 = vld [vmem:[%s1412_s1 + $0x170] sm:$0xff]  }
   0xe   :  { %987 = vmatprep.subr.bf16.mxu1 %v1078_v13  ;;  %v19_v33 = vld [vmem:[%s1413_s0 + $0x20] sm:$0xff]  ;;  %v20_v37 = vld [vmem:[%s1413_s0 + $0x28] sm:$0xff]  ;;  %v1102_v45 = vld [vmem:[%s1412_s1 + $0x1f0] sm:$0xff]  }
   0xf   :  { %v873_v35 = vcombine.low %v15_v32, %v19_v33  ;;  %v874_v36 = vcombine.high %v15_v32, %v19_v33  ;;  %v875_v38 = vcombine.low %v16_v34, %v20_v37  ;;  %v876_v39 = vcombine.high %v16_v34, %v20_v37  ;;  %v1103_v46 = vld [vmem:[%s1412_s1 + $0x130] sm:$0xff]   ;;  %v1105_v48 = vld [vmem:[%s1412_s1 + $0x168] sm:$0xff]   ;;  %v1109_v52 = vld [vmem:[%s1412_s1 + $0x160] sm:$0xff]  }
  0x10   :  { %960 = vmatpush3.bf16.msra.mxu0 %v1079_v14  ;;  %v1104_v47 = vld [vmem:[%s1412_s1 + $0x1b0] sm:$0xff]   ;;  %v1106_v49 = vld [vmem:[%s1412_s1 + $0x1e8] sm:$0xff]   ;;  %v1110_v53 = vld [vmem:[%s1412_s1 + $0x1e0] sm:$0xff]  }
  0x11   :  { %988 = vmatpush3.bf16.msra.mxu1 %v1080_v15  ;;  %961 = vmatprep.subr.bf16.mxu0 %v1081_v16  ;;  %v1107_v50 = vld [vmem:[%s1412_s1 + $0x128] sm:$0xff]   ;;  %v1111_v54 = vld [vmem:[%s1412_s1 + $0x120] sm:$0xff]   ;;  %v1113_v56 = vld [vmem:[%s1412_s1 + $0x158] sm:$0xff]  }
  0x12   :  { %989 = vmatprep.subr.bf16.mxu1 %v1082_v17  ;;  %655 = vmatprep.mubr.bf16.mxu0 %v874_v36  ;;  %v1108_v51 = vld [vmem:[%s1412_s1 + $0x1a8] sm:$0xff]   ;;  %v1112_v55 = vld [vmem:[%s1412_s1 + $0x1a0] sm:$0xff]   ;;  %v1114_v57 = vld [vmem:[%s1412_s1 + $0x1d8] sm:$0xff]  }
  0x13   :  { %704 = vmatprep.mubr.bf16.mxu1 %v876_v39  ;;  %v23_v58 = vld [vmem:[%s1413_s0 + $0x40] sm:$0xff]  ;;  %v24_v61 = vld [vmem:[%s1413_s0 + $0x48] sm:$0xff]  ;;  %v1115_v1 = vld [vmem:[%s1412_s1 + $0x118] sm:$0xff]  }
  0x14   :  { %962 = vmatpush3.bf16.msra.mxu0 %v1083_v18  ;;  %v27_v59 = vld [vmem:[%s1413_s0 + $0x60] sm:$0xff]  ;;  %v28_v62 = vld [vmem:[%s1413_s0 + $0x68] sm:$0xff]  ;;  %v1116_v3 = vld [vmem:[%s1412_s1 + $0x198] sm:$0xff]  }
  0x15   :  { %990 = vmatpush3.bf16.msra.mxu1 %v1084_v19  ;;  %963 = vmatprep.subr.bf16.mxu0 %v1085_v20  ;;  %v882_v60 = vcombine.high %v23_v58, %v27_v59  ;;  %v881_v63 = vcombine.low %v23_v58, %v27_v59  ;;  %v884_v0 = vcombine.high %v24_v61, %v28_v62  ;;  %v1117_v4 = vld [vmem:[%s1412_s1 + $0x150] sm:$0xff]   ;;  %v1121_v8 = vld [vmem:[%s1412_s1 + $0x148] sm:$0xff]   ;;  %v1125_v12 = vld [vmem:[%s1412_s1 + $0x140] sm:$0xff]  }
  0x16   :  { %991 = vmatprep.subr.bf16.mxu1 %v1086_v21  ;;  %v883_v2 = vcombine.low %v24_v61, %v28_v62  ;;  %v1118_v5 = vld [vmem:[%s1412_s1 + $0x1d0] sm:$0xff]   ;;  %v1122_v9 = vld [vmem:[%s1412_s1 + $0x1c8] sm:$0xff]   ;;  %v1126_v13 = vld [vmem:[%s1412_s1 + $0x1c0] sm:$0xff]  }
  0x17   :  { %v1119_v6 = vld [vmem:[%s1412_s1 + $0x110] sm:$0xff]   ;;  %v1123_v10 = vld [vmem:[%s1412_s1 + $0x108] sm:$0xff]   ;;  %v1127_v14 = vld [vmem:[%s1412_s1 + $0x100] sm:$0xff]  }
  0x18   :  { %964 = vmatpush3.bf16.msra.mxu0 %v1087_v22  ;;  %v1120_v7 = vld [vmem:[%s1412_s1 + $0x190] sm:$0xff]   ;;  %v1124_v11 = vld [vmem:[%s1412_s1 + $0x188] sm:$0xff]   ;;  %v1128_v15 = vld [vmem:[%s1412_s1 + $0x180] sm:$0xff]  }
  0x19   :  { %992 = vmatpush3.bf16.msra.mxu1 %v1088_v23  ;;  %965 = vmatprep.subr.bf16.mxu0 %v1089_v24  ;;  %v17_v16 = vld [vmem:[%s1413_s0 + $0x10] sm:$0xff]  ;;  %v18_v18 = vld [vmem:[%s1413_s0 + $0x18] sm:$0xff] }
  0x1a   :  { %993 = vmatprep.subr.bf16.mxu1 %v1090_v25  ;;  %v21_v17 = vld [vmem:[%s1413_s0 + $0x30] sm:$0xff]  ;;  %v22_v19 = vld [vmem:[%s1413_s0 + $0x38] sm:$0xff] }
  0x1b   :  { %v877_v20 = vcombine.low %v17_v16, %v21_v17  ;;  %v878_v21 = vcombine.high %v17_v16, %v21_v17  ;;  %v879_v22 = vcombine.low %v18_v18, %v22_v19  ;;  %v880_v23 = vcombine.high %v18_v18, %v22_v19  ;;  %v25_v24 = vld [vmem:[%s1413_s0 + $0x50] sm:$0xff] }
  0x1c   :  { %966 = vmatpush3.bf16.msra.mxu0 %v1091_v26  ;;  %v29_v25 = vld [vmem:[%s1413_s0 + $0x70] sm:$0xff]  ;;  %v26_v26 = vld [vmem:[%s1413_s0 + $0x58] sm:$0xff] }
  0x1d   :  { %994 = vmatpush3.bf16.msra.mxu1 %v1092_v27  ;;  %967 = vmatprep.subr.bf16.mxu0 %v1093_v28  ;;  %v886_v27 = vcombine.high %v25_v24, %v29_v25  ;;  %v30_v28 = vld [vmem:[%s1413_s0 + $0x78] sm:$0xff] }
  0x1e   :  { %995 = vmatprep.subr.bf16.mxu1 %v1094_v29  ;;  %v888_v29 = vcombine.high %v26_v26, %v30_v28 }
  0x20   :  { %968 = vmatpush3.bf16.msra.mxu0 %v1095_v30  ;;  %v885_v30 = vcombine.low %v25_v24, %v29_v25 }
  0x21   :  { %996 = vmatpush3.bf16.msra.mxu1 %v1096_v31  ;;  %1009 = vmatprep.subr.bf16.mxu0 %v1097_v40  ;;  %v887_v31 = vcombine.low %v26_v26, %v30_v28 }
  0x22   :  { %1037 = vmatprep.subr.bf16.mxu1 %v1098_v41 }
  0x23   :  { %656 = vmatmul.mubr.bf16.vlgmr.msra.gmra.mxu0 %v873_v35 }
  0x24   :  { %705 = vmatmul.mubr.bf16.vlgmr.msra.gmra.mxu1 %v875_v38  ;;  %1010 = vmatpush3.bf16.msra.mxu0 %v1099_v42 }
  0x25   :  { %1038 = vmatpush3.bf16.msra.mxu1 %v1100_v43  ;;  %1011 = vmatprep.subr.bf16.mxu0 %v1101_v44 }
  0x26   :  { %1039 = vmatprep.subr.bf16.mxu1 %v1102_v45  ;;  %663 = vmatprep.mubr.bf16.mxu0 %v882_v60 }
  0x27   :  { %712 = vmatprep.mubr.bf16.mxu1 %v884_v0 }
  0x28   :  { %1012 = vmatpush3.bf16.msra.mxu0 %v1103_v46 }
  0x29   :  { %1040 = vmatpush3.bf16.msra.mxu1 %v1104_v47  ;;  %1013 = vmatprep.subr.bf16.mxu0 %v1105_v48 }
  0x2a   :  { %1041 = vmatprep.subr.bf16.mxu1 %v1106_v49 }
  0x2b   :  { %664 = vmatmul.mubr.bf16.gmra.mxu0 %v881_v63 }
  0x2c   :  { %1014 = vmatpush3.bf16.msra.mxu0 %v1107_v50  ;;  %713 = vmatmul.mubr.bf16.gmra.mxu1 %v883_v2 }
  0x2d   :  { %1042 = vmatpush3.bf16.msra.mxu1 %v1108_v51  ;;  %1015 = vmatprep.subr.bf16.mxu0 %v1109_v52 }
  0x2e   :  { %1043 = vmatprep.subr.bf16.mxu1 %v1110_v53  ;;  %753 = vmatprep.mubr.bf16.mxu0 %v878_v21 }
  0x2f   :  { %802 = vmatprep.mubr.bf16.mxu1 %v880_v23 }
  0x30   :  { %1016 = vmatpush3.bf16.msra.mxu0 %v1111_v54 }
  0x31   :  { %1044 = vmatpush3.bf16.msra.mxu1 %v1112_v55  ;;  %1017 = vmatprep.subr.bf16.mxu0 %v1113_v56 }
  0x32   :  { %1045 = vmatprep.subr.bf16.mxu1 %v1114_v57 }
  0x34   :  { %1018 = vmatpush3.bf16.msra.mxu0 %v1115_v1 }
  0x35   :  { %1046 = vmatpush3.bf16.msra.mxu1 %v1116_v3  ;;  %1019 = vmatprep.subr.bf16.mxu0 %v1117_v4 }
  0x36   :  { %1047 = vmatprep.subr.bf16.mxu1 %v1118_v5 }
  0x38   :  { %1020 = vmatpush3.bf16.msra.mxu0 %v1119_v6 }
  0x39   :  { %1048 = vmatpush3.bf16.msra.mxu1 %v1120_v7  ;;  %1021 = vmatprep.subr.bf16.mxu0 %v1121_v8 }
  0x3a   :  { %1049 = vmatprep.subr.bf16.mxu1 %v1122_v9 }
  0x3c   :  { %1022 = vmatpush3.bf16.msra.mxu0 %v1123_v10 }
  0x3d   :  { %1050 = vmatpush3.bf16.msra.mxu1 %v1124_v11  ;;  %1023 = vmatprep.subr.bf16.mxu0 %v1125_v12 }
  0x3e   :  { %1051 = vmatprep.subr.bf16.mxu1 %v1126_v13 }
  0x40   :  { %1024 = vmatpush3.bf16.msra.mxu0 %v1127_v14 }
  0x41   :  { %1052 = vmatpush3.bf16.msra.mxu1 %v1128_v15 }
  0x43   :  { %754 = vmatmul.mubr.bf16.vlgmr.msra.gmra.mxu0 %v877_v20 }
  0x44   :  { %803 = vmatmul.mubr.bf16.vlgmr.msra.gmra.mxu1 %v879_v22  ;;  %761 = vmatprep.mubr.bf16.mxu0 %v886_v27 }
  0x45   :  { %810 = vmatprep.mubr.bf16.mxu1 %v888_v29 }
  0x4b   :  { %762 = vmatmul.mubr.bf16.gmra.mxu0 %v885_v30 }
  0x4c   :  { %811 = vmatmul.mubr.bf16.gmra.mxu1 %v887_v31 }
  0xe3   :  { %v969_v32 = vpop.f32.mrf.mxu0 }
  0xe4   :  { %v997_v33 = vpop.f32.mrf.mxu1 }
  0xe5   :  { %v970_v34 = vpop.f32.mrf.mxu0 }
  0xe6   :  { %v998_v35 = vpop.f32.mrf.mxu1  ;;  %v971_v48 = vadd.f32 %v970_v34, %v969_v32 }
  0xe7   :  { %v972_v36 = vpop.f32.mrf.mxu0  ;;  %v999_v49 = vadd.f32 %v998_v35, %v997_v33 }
  0xe8   :  { %v1000_v37 = vpop.f32.mrf.mxu1 }
  0xe9   :  { %v973_v38 = vpop.f32.mrf.mxu0  ;;  %v707_v54 = vadd.f32 %v999_v49, %v971_v48 }
  0xea   :  { %v1001_v39 = vpop.f32.mrf.mxu1  ;;  %v974_v55 = vadd.f32 %v973_v38, %v972_v36 }
  0xeb   :  { %v975_v40 = vpop.f32.mrf.mxu0  ;;  %v1002_v56 = vadd.f32 %v1001_v39, %v1000_v37 }
  0xec   :  { %v1003_v41 = vpop.f32.mrf.mxu1 }
  0xed   :  { %v976_v42 = vpop.f32.mrf.mxu0  ;;  %v710_v2 = vadd.f32 %v1002_v56, %v974_v55 }
  0xee   :  { %v1004_v43 = vpop.f32.mrf.mxu1  ;;  %v977_v62 = vadd.f32 %v976_v42, %v975_v40 }
  0xef   :  { %v978_v44 = vpop.f32.mrf.mxu0  ;;  %v1005_v63 = vadd.f32 %v1004_v43, %v1003_v41 }
  0xf0   :  { %v1006_v45 = vpop.f32.mrf.mxu1 }
  0xf1   :  { %v979_v46 = vpop.f32.mrf.mxu0  ;;  %v715_v9 = vadd.f32 %v1005_v63, %v977_v62 }
  0xf2   :  { %v1007_v47 = vpop.f32.mrf.mxu1  ;;  %v980_v12 = vadd.f32 %v979_v46, %v978_v44 }
  0xf3   :  { %v1008_v13 = vadd.f32 %v1007_v47, %v1006_v45 }
  0xf5   :  { %v718_v22 = vadd.f32 %v1008_v13, %v980_v12 }
 0x103   :  { %v1025_v50 = vpop.f32.mrf.mxu0 }
 0x104   :  { %v1053_v51 = vpop.f32.mrf.mxu1 }
 0x105   :  { %v1026_v52 = vpop.f32.mrf.mxu0 }
 0x106   :  { %v1054_v53 = vpop.f32.mrf.mxu1  ;;  %v1027_v57 = vadd.f32 %v1026_v52, %v1025_v50 }
 0x107   :  { %v1028_v58 = vpop.f32.mrf.mxu0  ;;  %v1055_v61 = vadd.f32 %v1054_v53, %v1053_v51 }
 0x108   :  { %v1056_v59 = vpop.f32.mrf.mxu1  ;;  %v756_v60 = vadd.f32 %v1027_v57, %v707_v54 }
 0x109   :  { %v1029_v0 = vpop.f32.mrf.mxu0 }
 0x10a   :  { %v1057_v1 = vpop.f32.mrf.mxu1  ;;  %v805_v3 = vadd.f32 %v1055_v61, %v756_v60  ;;  %v1030_v4 = vadd.f32 %v1029_v0, %v1028_v58 }
 0x10b   :  { %v1031_v5 = vpop.f32.mrf.mxu0  ;;  %v1058_v8 = vadd.f32 %v1057_v1, %v1056_v59 }
 0x10c   :  { %v1059_v6 = vpop.f32.mrf.mxu1  ;;  %819 = vst [vmem:[%s1414_s2] sm:$0xff] %v805_v3  ;;  %v759_v7 = vadd.f32 %v1030_v4, %v710_v2  ;;  %v832_v26 = vmul.f32 %v805_v3, %v805_v3 }
 0x10d   :  { %v1032_v10 = vpop.f32.mrf.mxu0 }
 0x10e   :  { %v1060_v11 = vpop.f32.mrf.mxu1  ;;  %v808_v14 = vadd.f32 %v1058_v8, %v759_v7  ;;  %v1033_v15 = vadd.f32 %v1032_v10, %v1031_v5 }
 0x10f   :  { %v1034_v16 = vpop.f32.mrf.mxu0  ;;  %v1061_v19 = vadd.f32 %v1060_v11, %v1059_v6 }
 0x110   :  { %v1062_v17 = vpop.f32.mrf.mxu1  ;;  %820 = vst [vmem:[%s1414_s2 + $0x8] sm:$0xff] %v808_v14  ;;  %v764_v18 = vadd.f32 %v1033_v15, %v715_v9  ;;  %v833_v23 = vmul.f32 %v808_v14, %v808_v14  ;;  %v823_v27 = vadd.f32 %v808_v14, %v805_v3 }
 0x111   :  { %v1035_v20 = vpop.f32.mrf.mxu0 }
 0x112   :  { %v1063_v21 = vpop.f32.mrf.mxu1  ;;  %v813_v24 = vadd.f32 %v1061_v19, %v764_v18  ;;  %v1036_v25 = vadd.f32 %v1035_v20, %v1034_v16  ;;  %v836_v31 = vadd.f32 %v833_v23, %v832_v26 }
 0x113   :  { %v1064_v30 = vadd.f32 %v1063_v21, %v1062_v17 }
 0x114   :  { %821 = vst [vmem:[%s1414_s2 + $0x10] sm:$0xff] %v813_v24  ;;  %v834_v28 = vmul.f32 %v813_v24, %v813_v24  ;;  %v767_v29 = vadd.f32 %v1036_v25, %v718_v22  ;;  %v824_v32 = vadd.f32 %v823_v27, %v813_v24 }
 0x116   :  { %v816_v33 = vadd.f32 %v1064_v30, %v767_v29  ;;  %v837_v34 = vadd.f32 %v836_v31, %v834_v28 }
 0x118   :  { %822 = vst [vmem:[%s1414_s2 + $0x18] sm:$0xff] %v816_v33  ;;  %v825_v35 = vadd.f32 %v824_v32, %v816_v33  ;;  %v835_v36 = vmul.f32 %v816_v33, %v816_v33 }
 0x11a   :  { %v826_v37 = vrot.slane %v825_v35, 4  ;;  %v838_v38 = vadd.f32 %v837_v34, %v835_v36 }
 0x11c   :  { %v827_v39 = vadd.f32 %v826_v37, %v825_v35  ;;  %v839_v40 = vrot.slane %v838_v38, 4 }
 0x11e   :  { %v828_v41 = vrot.slane %v827_v39, 2  ;;  %v840_v42 = vadd.f32 %v839_v40, %v838_v38 }
 0x120   :  { %v829_v43 = vadd.f32 %v828_v41, %v827_v39  ;;  %v841_v44 = vrot.slane %v840_v42, 2 }
 0x122   :  { %v830_v45 = vrot.slane %v829_v43, 1  ;;  %v842_v46 = vadd.f32 %v841_v44, %v840_v42 }
 0x124   :  { %v831_v47 = vadd.f32 %v830_v45, %v829_v43  ;;  %v843_v48 = vrot.slane %v842_v46, 1 }
 0x126   :  { %v844_v49 = vadd.f32 %v843_v48, %v842_v46  ;;  %849 = vst [vmem:[%s1415_s3] sm:$0x1] %v831_v47 }
 0x128   :  { %850 = vst [vmem:[%s1416_s4] sm:$0x1] %v844_v49 }

</bundles_post_ra>
